<compile_context>
chip_gen: v5e
topology: v5e:2x2
jax: 0.10.0
libtpu: 0.0.40
codegen_flags: <defaults>
</compile_context>

<pallas_src>
import functools
import math

import jax
import jax.numpy as jnp
import numpy as np
from jax.experimental import pallas as pl
from jax.experimental.pallas import tpu as pltpu


def _layer_norm(h, w, b, eps=1e-5):
    # h: (M, D) f32;  w, b: (1, D) f32
    mu = jnp.mean(h, axis=-1, keepdims=True)
    var = jnp.mean((h - mu) ** 2, axis=-1, keepdims=True)
    return (h - mu) * jax.lax.rsqrt(var + eps) * w + b


def denoiser_kernel(noisy_ref, sv_ref, w_in_ref, b_in_ref, pos_ref,
                    ln1w_ref, ln1b_ref, wqkv_ref, bqkv_ref, wo_ref, bo_ref,
                    ln2w_ref, ln2b_ref, w1_ref, b1_ref, w2_ref, b2_ref,
                    wout_ref, bout_ref, out_ref, *, n_heads, n_layers):
    Bt = noisy_ref.shape[0]
    N = noisy_ref.shape[2]
    D = pos_ref.shape[1]
    head_dim = D // n_heads
    scale = 1.0 / math.sqrt(head_dim)
    M = Bt * N

    nz = noisy_ref[...].reshape(Bt, N)          # (Bt, N) f32
    sv = sv_ref[...].reshape(Bt, N)             # (Bt, N) f32
    sqrt_sv = jnp.sqrt(sv)
    sqrt_1msv = jnp.sqrt(1.0 - sv)

    # ----- input_proj (Linear(3, D)) expanded elementwise + pos encoding -----
    w_in = w_in_ref[...]                        # (3, D) f32
    x = (nz[..., None] * w_in[0]
         + sqrt_sv[..., None] * w_in[1]
         + sqrt_1msv[..., None] * w_in[2]
         + b_in_ref[...]                        # (1, D)  broadcast
         + pos_ref[...][None])                  # (1, N, D) broadcast
    x = x.reshape(M, D)                         # f32 residual stream

    # ----- transformer encoder layers (pre-norm), weights VMEM-resident -----
    for l in range(n_layers):
        # pre-norm multi-head self-attention
        h = _layer_norm(x, ln1w_ref[l], ln1b_ref[l])
        hb = h.astype(jnp.bfloat16)
        q = (jnp.dot(hb, wqkv_ref[l, 0], preferred_element_type=jnp.float32)
             + bqkv_ref[l, 0])
        k = (jnp.dot(hb, wqkv_ref[l, 1], preferred_element_type=jnp.float32)
             + bqkv_ref[l, 1])
        v = (jnp.dot(hb, wqkv_ref[l, 2], preferred_element_type=jnp.float32)
             + bqkv_ref[l, 2])
        q3 = q.reshape(Bt, N, D)
        k3 = k.reshape(Bt, N, D)
        v3 = v.reshape(Bt, N, D)

        ctx_heads = []
        for hh in range(n_heads):
            lo = hh * head_dim
            hi = lo + head_dim
            qh = q3[:, :, lo:hi].astype(jnp.bfloat16)     # (Bt, N, hd)
            kh = k3[:, :, lo:hi].astype(jnp.bfloat16)
            vh = v3[:, :, lo:hi].astype(jnp.bfloat16)
            s = jnp.einsum('bnd,bmd->bnm', qh, kh,
                           preferred_element_type=jnp.float32) * scale
            s = s - jnp.max(s, axis=-1, keepdims=True)
            p = jnp.exp(s)
            p = p * pl.reciprocal(jnp.sum(p, axis=-1, keepdims=True), approx=True)
            ctx_heads.append(jnp.einsum('bnm,bmd->bnd', p.astype(jnp.bfloat16), vh,
                                        preferred_element_type=jnp.float32))
        ctx = jnp.concatenate(ctx_heads, axis=-1).reshape(M, D)

        attn = (jnp.dot(ctx.astype(jnp.bfloat16), wo_ref[l],
                        preferred_element_type=jnp.float32) + bo_ref[l])
        x = x + attn

        # pre-norm feed-forward (ReLU)
        h2 = _layer_norm(x, ln2w_ref[l], ln2b_ref[l])
        ff = (jnp.dot(h2.astype(jnp.bfloat16), w1_ref[l],
                      preferred_element_type=jnp.float32) + b1_ref[l])
        ff = jnp.maximum(ff, 0.0)
        ff = (jnp.dot(ff.astype(jnp.bfloat16), w2_ref[l],
                      preferred_element_type=jnp.float32) + b2_ref[l])
        x = x + ff

    # ----- output_proj (D -> 1) + eps -> x0 reconstruction -----
    xf = x.reshape(Bt, N, D)
    eps = jnp.sum(xf * wout_ref[...], axis=-1) + bout_ref[...]   # (Bt, N)
    # predict_eps=True:  x0 = (noisy - sqrt(1 - sv) * eps) / sqrt(sv)
    x0 = (nz - sqrt_1msv * eps) * jax.lax.rsqrt(sv)
    out_ref[...] = x0.reshape(Bt, 1, N)


def _vmem_limit_bytes():
    """3/4 of physical VMEM (per-core on v7x), capped; safe cross-generation."""
    default = 48 * 1024 * 1024
    try:
        info = pltpu.get_tpu_info()
        cap = int(getattr(info, "vmem_capacity_bytes", 0))
        if cap > 0:
            return min((cap * 3) // 4, 112 * 1024 * 1024)
    except Exception:
        pass
    return default


def denoiser_forward(noisy, signal_var, params, *, n_heads, n_layers,
                     batch_tile=None):
    B, N = noisy.shape
    if batch_tile is None:
        batch_tile = B
    assert B % batch_tile == 0, "batch must be divisible by batch_tile"
    n_tiles = B // batch_tile

    noisy3 = noisy.reshape(B, 1, N)
    sv3 = signal_var.reshape(B, 1, N)

    def io_spec():
        return pl.BlockSpec((batch_tile, 1, N), lambda b: (b, 0, 0))

    def full_spec(a):
        nd = a.ndim
        return pl.BlockSpec(a.shape, lambda b, _nd=nd: (0,) * _nd)

    weight_args = [params['w_in'], params['b_in'], params['pos'],
                   params['ln1_w'], params['ln1_b'],
                   params['w_qkv'], params['b_qkv'],
                   params['w_o'], params['b_o'],
                   params['ln2_w'], params['ln2_b'],
                   params['w_ff1'], params['b_ff1'],
                   params['w_ff2'], params['b_ff2'],
                   params['w_out'], params['b_out']]

    in_specs = [io_spec(), io_spec()] + [full_spec(a) for a in weight_args]

    out3 = pl.pallas_call(
        functools.partial(denoiser_kernel, n_heads=n_heads, n_layers=n_layers),
        out_shape=jax.ShapeDtypeStruct((B, 1, N), jnp.float32),
        grid=(n_tiles,),                       # batch tiles; weights resident
        in_specs=in_specs,
        out_specs=pl.BlockSpec((batch_tile, 1, N), lambda b: (b, 0, 0)),
        compiler_params=pltpu.CompilerParams(
            dimension_semantics=("parallel",),
            vmem_limit_bytes=_vmem_limit_bytes(),
        ),
    )(noisy3, sv3, *weight_args)
    return out3.reshape(B, N)


def init_params(key, N, d_model, n_heads, n_layers):
    D = d_model
    Dff = 4 * D
    ks = jax.random.split(key, 16)
    s = 0.05

    # sinusoidal positional encoding (matches Denoiser._init_pos_encoding)
    position = jnp.arange(N, dtype=jnp.float32)[:, None]
    div_term = jnp.pi * jnp.exp(jnp.arange(0, D, 2, dtype=jnp.float32)
                                * (-math.log(1000.0) / D))
    pe = jnp.zeros((N, D), dtype=jnp.float32)
    pe = pe.at[:, 0::2].set(jnp.sin(position * div_term))
    pe = pe.at[:, 1::2].set(jnp.cos(position * div_term))

    bf16 = jnp.bfloat16
    return {
        'w_in':  s * jax.random.normal(ks[0], (3, D), jnp.float32),
        'b_in':  s * jax.random.normal(ks[1], (1, D), jnp.float32),
        'pos':   pe,
        'ln1_w': 1.0 + s * jax.random.normal(ks[2], (n_layers, 1, D), jnp.float32),
        'ln1_b': s * jax.random.normal(ks[3], (n_layers, 1, D), jnp.float32),
        'w_qkv': (s * jax.random.normal(ks[4], (n_layers, 3, D, D), jnp.float32)).astype(bf16),
        'b_qkv': s * jax.random.normal(ks[5], (n_layers, 3, D), jnp.float32),
        'w_o':   (s * jax.random.normal(ks[6], (n_layers, D, D), jnp.float32)).astype(bf16),
        'b_o':   s * jax.random.normal(ks[7], (n_layers, 1, D), jnp.float32),
        'ln2_w': 1.0 + s * jax.random.normal(ks[8], (n_layers, 1, D), jnp.float32),
        'ln2_b': s * jax.random.normal(ks[9], (n_layers, 1, D), jnp.float32),
        'w_ff1': (s * jax.random.normal(ks[10], (n_layers, D, Dff), jnp.float32)).astype(bf16),
        'b_ff1': s * jax.random.normal(ks[11], (n_layers, 1, Dff), jnp.float32),
        'w_ff2': (s * jax.random.normal(ks[12], (n_layers, Dff, D), jnp.float32)).astype(bf16),
        'b_ff2': s * jax.random.normal(ks[13], (n_layers, 1, D), jnp.float32),
        'w_out': s * jax.random.normal(ks[14], (1, D), jnp.float32),
        'b_out': s * jax.random.normal(ks[15], (1, 1), jnp.float32),
    }


def reference_forward(noisy, sv, params, *, n_heads, n_layers):
    """Pure-JAX f32 reference mirroring the PyTorch forward (for validation)."""
    B, N = noisy.shape
    D = params['w_o'].shape[-1]
    head_dim = D // n_heads
    scale = 1.0 / math.sqrt(head_dim)
    sqrt_sv = jnp.sqrt(sv)
    sqrt_1msv = jnp.sqrt(1.0 - sv)

    feats = jnp.stack([noisy, sqrt_sv, sqrt_1msv], axis=-1)          # [B, N, 3]
    x = feats @ params['w_in'] + params['b_in'][0]
    x = x + params['pos'][None]

    def ln(h, w, b):
        mu = jnp.mean(h, -1, keepdims=True)
        var = jnp.mean((h - mu) ** 2, -1, keepdims=True)
        return (h - mu) / jnp.sqrt(var + 1e-5) * w + b

    for l in range(n_layers):
        h = ln(x, params['ln1_w'][l, 0], params['ln1_b'][l, 0])
        wqkv = params['w_qkv'][l].astype(jnp.float32)                # [3, D, D]
        q = h @ wqkv[0] + params['b_qkv'][l, 0]
        k = h @ wqkv[1] + params['b_qkv'][l, 1]
        v = h @ wqkv[2] + params['b_qkv'][l, 2]
        q = q.reshape(B, N, n_heads, head_dim).transpose(0, 2, 1, 3)
        k = k.reshape(B, N, n_heads, head_dim).transpose(0, 2, 1, 3)
        v = v.reshape(B, N, n_heads, head_dim).transpose(0, 2, 1, 3)
        sc = jnp.einsum('bhnd,bhmd->bhnm', q, k) * scale
        p = jax.nn.softmax(sc, axis=-1)
        ctx = jnp.einsum('bhnm,bhmd->bhnd', p, v).transpose(0, 2, 1, 3).reshape(B, N, D)
        x = x + ctx @ params['w_o'][l].astype(jnp.float32) + params['b_o'][l, 0]
        h2 = ln(x, params['ln2_w'][l, 0], params['ln2_b'][l, 0])
        ff = jax.nn.relu(h2 @ params['w_ff1'][l].astype(jnp.float32) + params['b_ff1'][l, 0])
        x = x + ff @ params['w_ff2'][l].astype(jnp.float32) + params['b_ff2'][l, 0]

    eps = x @ params['w_out'][0] + params['b_out'][0, 0]
    return (noisy - sqrt_1msv * eps) / sqrt_sv


if __name__ == "__main__":
    B, N = 2, 8                     # batch, seq_len
    d_model, n_heads, n_layers = 32, 4, 2

    key = jax.random.PRNGKey(0)
    k_noisy, k_sv, k_params = jax.random.split(key, 3)
    noisy = jax.random.normal(k_noisy, (B, N), jnp.float32)
    signal_var = jax.random.uniform(k_sv, (B, N), dtype=jnp.float32,
                                    minval=0.3, maxval=0.9)
    params = init_params(k_params, N, d_model, n_heads, n_layers)

    out = denoiser_forward(noisy, signal_var, params,
                           n_heads=n_heads, n_layers=n_layers)
    out = jax.block_until_ready(out)

    ref = reference_forward(noisy, signal_var, params,
                            n_heads=n_heads, n_layers=n_layers)
    np.testing.assert_allclose(np.asarray(out), np.asarray(ref),
                               rtol=2e-2, atol=2e-2)
    print("KERNEL_OK")
</pallas_src>

<mosaic_0001>
module attributes {stable_mosaic.version = 11 : i64} {
  func.func @denoiser_kernel(%arg0: i32, %arg1: memref<2x1x8xf32, #tpu.memory_space<vmem>>, %arg2: memref<2x1x8xf32, #tpu.memory_space<vmem>>, %arg3: memref<3x32xf32, #tpu.memory_space<vmem>>, %arg4: memref<1x32xf32, #tpu.memory_space<vmem>>, %arg5: memref<8x32xf32, #tpu.memory_space<vmem>>, %arg6: memref<2x1x32xf32, #tpu.memory_space<vmem>>, %arg7: memref<2x1x32xf32, #tpu.memory_space<vmem>>, %arg8: memref<2x3x32x32xbf16, #tpu.memory_space<vmem>>, %arg9: memref<2x3x32xf32, #tpu.memory_space<vmem>>, %arg10: memref<2x32x32xbf16, #tpu.memory_space<vmem>>, %arg11: memref<2x1x32xf32, #tpu.memory_space<vmem>>, %arg12: memref<2x1x32xf32, #tpu.memory_space<vmem>>, %arg13: memref<2x1x32xf32, #tpu.memory_space<vmem>>, %arg14: memref<2x32x128xbf16, #tpu.memory_space<vmem>>, %arg15: memref<2x1x128xf32, #tpu.memory_space<vmem>>, %arg16: memref<2x128x32xbf16, #tpu.memory_space<vmem>>, %arg17: memref<2x1x32xf32, #tpu.memory_space<vmem>>, %arg18: memref<1x32xf32, #tpu.memory_space<vmem>>, %arg19: memref<1x1xf32, #tpu.memory_space<vmem>>, %arg20: memref<2x1x8xf32, #tpu.memory_space<vmem>>) attributes {dimension_semantics = [#tpu.dimension_semantics<parallel>], iteration_bounds = array<i64: 1>, scalar_prefetch = 0 : i64, scratch_operands = 0 : i64, tpu.core_type = #tpu.core_type<tc>, window_params = [{transform_indices = @transform_0, window_bounds = array<i64: 2, 1, 8>}, {transform_indices = @transform_1, window_bounds = array<i64: 2, 1, 8>}, {pipeline_mode = #tpu.pipeline_mode<synchronous>, transform_indices = @transform_2, window_bounds = array<i64: 3, 32>}, {pipeline_mode = #tpu.pipeline_mode<synchronous>, transform_indices = @transform_3, window_bounds = array<i64: 1, 32>}, {pipeline_mode = #tpu.pipeline_mode<synchronous>, transform_indices = @transform_4, window_bounds = array<i64: 8, 32>}, {pipeline_mode = #tpu.pipeline_mode<synchronous>, transform_indices = @transform_5, window_bounds = array<i64: 2, 1, 32>}, {pipeline_mode = #tpu.pipeline_mode<synchronous>, transform_indices = @transform_6, window_bounds = array<i64: 2, 1, 32>}, {pipeline_mode = #tpu.pipeline_mode<synchronous>, transform_indices = @transform_7, window_bounds = array<i64: 2, 3, 32, 32>}, {pipeline_mode = #tpu.pipeline_mode<synchronous>, transform_indices = @transform_8, window_bounds = array<i64: 2, 3, 32>}, {pipeline_mode = #tpu.pipeline_mode<synchronous>, transform_indices = @transform_9, window_bounds = array<i64: 2, 32, 32>}, {pipeline_mode = #tpu.pipeline_mode<synchronous>, transform_indices = @transform_10, window_bounds = array<i64: 2, 1, 32>}, {pipeline_mode = #tpu.pipeline_mode<synchronous>, transform_indices = @transform_11, window_bounds = array<i64: 2, 1, 32>}, {pipeline_mode = #tpu.pipeline_mode<synchronous>, transform_indices = @transform_12, window_bounds = array<i64: 2, 1, 32>}, {pipeline_mode = #tpu.pipeline_mode<synchronous>, transform_indices = @transform_13, window_bounds = array<i64: 2, 32, 128>}, {pipeline_mode = #tpu.pipeline_mode<synchronous>, transform_indices = @transform_14, window_bounds = array<i64: 2, 1, 128>}, {pipeline_mode = #tpu.pipeline_mode<synchronous>, transform_indices = @transform_15, window_bounds = array<i64: 2, 128, 32>}, {pipeline_mode = #tpu.pipeline_mode<synchronous>, transform_indices = @transform_16, window_bounds = array<i64: 2, 1, 32>}, {pipeline_mode = #tpu.pipeline_mode<synchronous>, transform_indices = @transform_17, window_bounds = array<i64: 1, 32>}, {pipeline_mode = #tpu.pipeline_mode<synchronous>, transform_indices = @transform_18, window_bounds = array<i64: 1, 1>}, {transform_indices = @transform_19, window_bounds = array<i64: 2, 1, 8>}]} {
    %c0 = arith.constant 0 : index
    %c0_0 = arith.constant 0 : index
    %c0_1 = arith.constant 0 : index
    %0 = vector.load %arg1[%c0, %c0_0, %c0_1] : memref<2x1x8xf32, #tpu.memory_space<vmem>>, vector<2x1x8xf32>
    %1 = vector.shape_cast %0 : vector<2x1x8xf32> to vector<2x8xf32>
    %c0_2 = arith.constant 0 : index
    %c0_3 = arith.constant 0 : index
    %c0_4 = arith.constant 0 : index
    %2 = vector.load %arg2[%c0_2, %c0_3, %c0_4] : memref<2x1x8xf32, #tpu.memory_space<vmem>>, vector<2x1x8xf32>
    %3 = vector.shape_cast %2 : vector<2x1x8xf32> to vector<2x8xf32>
    %4 = math.sqrt %3 : vector<2x8xf32>
    %cst = arith.constant 1.000000e+00 : f32
    %5 = vector.broadcast %cst : f32 to vector<2x8xf32>
    %6 = arith.subf %5, %3 : vector<2x8xf32>
    %7 = math.sqrt %6 : vector<2x8xf32>
    %c0_5 = arith.constant 0 : index
    %c0_6 = arith.constant 0 : index
    %8 = vector.load %arg3[%c0_5, %c0_6] : memref<3x32xf32, #tpu.memory_space<vmem>>, vector<3x32xf32>
    %9 = vector.shape_cast %1 : vector<2x8xf32> to vector<2x8x1xf32>
    %10 = vector.extract_strided_slice %8 {offsets = [0, 0], sizes = [1, 32], strides = [1, 1]} : vector<3x32xf32> to vector<1x32xf32>
    %11 = vector.shape_cast %10 : vector<1x32xf32> to vector<32xf32>
    %12 = vector.shape_cast %11 : vector<32xf32> to vector<1x1x32xf32>
    %13 = vector.broadcast %9 : vector<2x8x1xf32> to vector<2x8x32xf32>
    %14 = vector.broadcast %12 : vector<1x1x32xf32> to vector<2x8x32xf32>
    %15 = arith.mulf %13, %14 : vector<2x8x32xf32>
    %16 = vector.shape_cast %4 : vector<2x8xf32> to vector<2x8x1xf32>
    %17 = vector.extract_strided_slice %8 {offsets = [1, 0], sizes = [1, 32], strides = [1, 1]} : vector<3x32xf32> to vector<1x32xf32>
    %18 = vector.shape_cast %17 : vector<1x32xf32> to vector<32xf32>
    %19 = vector.shape_cast %18 : vector<32xf32> to vector<1x1x32xf32>
    %20 = vector.broadcast %16 : vector<2x8x1xf32> to vector<2x8x32xf32>
    %21 = vector.broadcast %19 : vector<1x1x32xf32> to vector<2x8x32xf32>
    %22 = arith.mulf %20, %21 : vector<2x8x32xf32>
    %23 = arith.addf %15, %22 : vector<2x8x32xf32>
    %24 = vector.shape_cast %7 : vector<2x8xf32> to vector<2x8x1xf32>
    %25 = vector.extract_strided_slice %8 {offsets = [2, 0], sizes = [1, 32], strides = [1, 1]} : vector<3x32xf32> to vector<1x32xf32>
    %26 = vector.shape_cast %25 : vector<1x32xf32> to vector<32xf32>
    %27 = vector.shape_cast %26 : vector<32xf32> to vector<1x1x32xf32>
    %28 = vector.broadcast %24 : vector<2x8x1xf32> to vector<2x8x32xf32>
    %29 = vector.broadcast %27 : vector<1x1x32xf32> to vector<2x8x32xf32>
    %30 = arith.mulf %28, %29 : vector<2x8x32xf32>
    %31 = arith.addf %23, %30 : vector<2x8x32xf32>
    %c0_7 = arith.constant 0 : index
    %c0_8 = arith.constant 0 : index
    %32 = vector.load %arg4[%c0_7, %c0_8] : memref<1x32xf32, #tpu.memory_space<vmem>>, vector<1x32xf32>
    %33 = vector.shape_cast %32 : vector<1x32xf32> to vector<1x1x32xf32>
    %34 = vector.broadcast %33 : vector<1x1x32xf32> to vector<2x8x32xf32>
    %35 = arith.addf %31, %34 : vector<2x8x32xf32>
    %c0_9 = arith.constant 0 : index
    %c0_10 = arith.constant 0 : index
    %36 = vector.load %arg5[%c0_9, %c0_10] : memref<8x32xf32, #tpu.memory_space<vmem>>, vector<8x32xf32>
    %37 = vector.shape_cast %36 : vector<8x32xf32> to vector<1x8x32xf32>
    %38 = vector.broadcast %37 : vector<1x8x32xf32> to vector<2x8x32xf32>
    %39 = arith.addf %35, %38 : vector<2x8x32xf32>
    %40 = vector.shape_cast %39 : vector<2x8x32xf32> to vector<16x32xf32>
    %c0_11 = arith.constant 0 : index
    %c0_12 = arith.constant 0 : index
    %c0_13 = arith.constant 0 : index
    %41 = vector.load %arg6[%c0_11, %c0_12, %c0_13] : memref<2x1x32xf32, #tpu.memory_space<vmem>>, vector<1x1x32xf32>
    %42 = vector.shape_cast %41 : vector<1x1x32xf32> to vector<1x32xf32>
    %c0_14 = arith.constant 0 : index
    %c0_15 = arith.constant 0 : index
    %c0_16 = arith.constant 0 : index
    %43 = vector.load %arg7[%c0_14, %c0_15, %c0_16] : memref<2x1x32xf32, #tpu.memory_space<vmem>>, vector<1x1x32xf32>
    %44 = vector.shape_cast %43 : vector<1x1x32xf32> to vector<1x32xf32>
    %cst_17 = arith.constant dense<0.000000e+00> : vector<16xf32>
    %45 = vector.multi_reduction <add>, %40, %cst_17 [1] : vector<16x32xf32> to vector<16xf32>
    %46 = vector.shape_cast %45 : vector<16xf32> to vector<16x1xf32>
    %cst_18 = arith.constant 3.200000e+01 : f32
    %47 = vector.broadcast %cst_18 : f32 to vector<16x1xf32>
    %48 = arith.divf %46, %47 : vector<16x1xf32>
    %49 = vector.broadcast %48 : vector<16x1xf32> to vector<16x32xf32>
    %50 = arith.subf %40, %49 : vector<16x32xf32>
    %51 = arith.mulf %50, %50 : vector<16x32xf32>
    %cst_19 = arith.constant dense<0.000000e+00> : vector<16xf32>
    %52 = vector.multi_reduction <add>, %51, %cst_19 [1] : vector<16x32xf32> to vector<16xf32>
    %53 = vector.shape_cast %52 : vector<16xf32> to vector<16x1xf32>
    %cst_20 = arith.constant 3.200000e+01 : f32
    %54 = vector.broadcast %cst_20 : f32 to vector<16x1xf32>
    %55 = arith.divf %53, %54 : vector<16x1xf32>
    %56 = vector.broadcast %48 : vector<16x1xf32> to vector<16x32xf32>
    %57 = arith.subf %40, %56 : vector<16x32xf32>
    %cst_21 = arith.constant 9.99999974E-6 : f32
    %58 = vector.broadcast %cst_21 : f32 to vector<16x1xf32>
    %59 = arith.addf %55, %58 : vector<16x1xf32>
    %60 = math.rsqrt %59 : vector<16x1xf32>
    %61 = vector.broadcast %60 : vector<16x1xf32> to vector<16x32xf32>
    %62 = arith.mulf %57, %61 : vector<16x32xf32>
    %63 = vector.broadcast %42 : vector<1x32xf32> to vector<16x32xf32>
    %64 = arith.mulf %62, %63 : vector<16x32xf32>
    %65 = vector.broadcast %44 : vector<1x32xf32> to vector<16x32xf32>
    %66 = arith.addf %64, %65 : vector<16x32xf32>
    %67 = arith.truncf %66 : vector<16x32xf32> to vector<16x32xbf16>
    %c0_22 = arith.constant 0 : index
    %c0_23 = arith.constant 0 : index
    %c0_24 = arith.constant 0 : index
    %c0_25 = arith.constant 0 : index
    %68 = vector.load %arg8[%c0_22, %c0_23, %c0_24, %c0_25] : memref<2x3x32x32xbf16, #tpu.memory_space<vmem>>, vector<1x1x32x32xbf16>
    %69 = vector.shape_cast %68 : vector<1x1x32x32xbf16> to vector<32x32xbf16>
    %cst_26 = arith.constant dense<0.000000e+00> : vector<16x32xf32>
    %70 = tpu.matmul %67, %69, %cst_26 {dimension_numbers = #tpu.dot_dimension_numbers<[1], [0], [0], [1], [0, 0, 1, 1], [], []>} : vector<16x32xbf16>, vector<32x32xbf16>, vector<16x32xf32> -> vector<16x32xf32>
    %c0_27 = arith.constant 0 : index
    %c0_28 = arith.constant 0 : index
    %c0_29 = arith.constant 0 : index
    %71 = vector.load %arg9[%c0_27, %c0_28, %c0_29] : memref<2x3x32xf32, #tpu.memory_space<vmem>>, vector<1x1x32xf32>
    %72 = vector.shape_cast %71 : vector<1x1x32xf32> to vector<32xf32>
    %73 = vector.shape_cast %72 : vector<32xf32> to vector<1x32xf32>
    %74 = vector.broadcast %73 : vector<1x32xf32> to vector<16x32xf32>
    %75 = arith.addf %70, %74 : vector<16x32xf32>
    %c0_30 = arith.constant 0 : index
    %c1 = arith.constant 1 : index
    %c0_31 = arith.constant 0 : index
    %c0_32 = arith.constant 0 : index
    %76 = vector.load %arg8[%c0_30, %c1, %c0_31, %c0_32] : memref<2x3x32x32xbf16, #tpu.memory_space<vmem>>, vector<1x1x32x32xbf16>
    %77 = vector.shape_cast %76 : vector<1x1x32x32xbf16> to vector<32x32xbf16>
    %cst_33 = arith.constant dense<0.000000e+00> : vector<16x32xf32>
    %78 = tpu.matmul %67, %77, %cst_33 {dimension_numbers = #tpu.dot_dimension_numbers<[1], [0], [0], [1], [0, 0, 1, 1], [], []>} : vector<16x32xbf16>, vector<32x32xbf16>, vector<16x32xf32> -> vector<16x32xf32>
    %c0_34 = arith.constant 0 : index
    %c1_35 = arith.constant 1 : index
    %c0_36 = arith.constant 0 : index
    %79 = vector.load %arg9[%c0_34, %c1_35, %c0_36] : memref<2x3x32xf32, #tpu.memory_space<vmem>>, vector<1x1x32xf32>
    %80 = vector.shape_cast %79 : vector<1x1x32xf32> to vector<32xf32>
    %81 = vector.shape_cast %80 : vector<32xf32> to vector<1x32xf32>
    %82 = vector.broadcast %81 : vector<1x32xf32> to vector<16x32xf32>
    %83 = arith.addf %78, %82 : vector<16x32xf32>
    %c0_37 = arith.constant 0 : index
    %c2 = arith.constant 2 : index
    %c0_38 = arith.constant 0 : index
    %c0_39 = arith.constant 0 : index
    %84 = vector.load %arg8[%c0_37, %c2, %c0_38, %c0_39] : memref<2x3x32x32xbf16, #tpu.memory_space<vmem>>, vector<1x1x32x32xbf16>
    %85 = vector.shape_cast %84 : vector<1x1x32x32xbf16> to vector<32x32xbf16>
    %cst_40 = arith.constant dense<0.000000e+00> : vector<16x32xf32>
    %86 = tpu.matmul %67, %85, %cst_40 {dimension_numbers = #tpu.dot_dimension_numbers<[1], [0], [0], [1], [0, 0, 1, 1], [], []>} : vector<16x32xbf16>, vector<32x32xbf16>, vector<16x32xf32> -> vector<16x32xf32>
    %c0_41 = arith.constant 0 : index
    %c2_42 = arith.constant 2 : index
    %c0_43 = arith.constant 0 : index
    %87 = vector.load %arg9[%c0_41, %c2_42, %c0_43] : memref<2x3x32xf32, #tpu.memory_space<vmem>>, vector<1x1x32xf32>
    %88 = vector.shape_cast %87 : vector<1x1x32xf32> to vector<32xf32>
    %89 = vector.shape_cast %88 : vector<32xf32> to vector<1x32xf32>
    %90 = vector.broadcast %89 : vector<1x32xf32> to vector<16x32xf32>
    %91 = arith.addf %86, %90 : vector<16x32xf32>
    %92 = vector.shape_cast %75 : vector<16x32xf32> to vector<2x8x32xf32>
    %93 = vector.shape_cast %83 : vector<16x32xf32> to vector<2x8x32xf32>
    %94 = vector.shape_cast %91 : vector<16x32xf32> to vector<2x8x32xf32>
    %95 = vector.extract_strided_slice %92 {offsets = [0, 0, 0], sizes = [2, 8, 8], strides = [1, 1, 1]} : vector<2x8x32xf32> to vector<2x8x8xf32>
    %96 = arith.truncf %95 : vector<2x8x8xf32> to vector<2x8x8xbf16>
    %97 = vector.extract_strided_slice %93 {offsets = [0, 0, 0], sizes = [2, 8, 8], strides = [1, 1, 1]} : vector<2x8x32xf32> to vector<2x8x8xf32>
    %98 = arith.truncf %97 : vector<2x8x8xf32> to vector<2x8x8xbf16>
    %99 = vector.extract_strided_slice %94 {offsets = [0, 0, 0], sizes = [2, 8, 8], strides = [1, 1, 1]} : vector<2x8x32xf32> to vector<2x8x8xf32>
    %100 = arith.truncf %99 : vector<2x8x8xf32> to vector<2x8x8xbf16>
    "tpu.trace_start"() <{level = 10 : i32, message = "bnd,bmd->bnm"}> : () -> ()
    %cst_44 = arith.constant dense<0.000000e+00> : vector<2x8x8xf32>
    %101 = tpu.matmul %96, %98, %cst_44 {dimension_numbers = #tpu.dot_dimension_numbers<[2], [2], [1], [1], [0, 0, 0, 1, 1, 1], [0], [0]>} : vector<2x8x8xbf16>, vector<2x8x8xbf16>, vector<2x8x8xf32> -> vector<2x8x8xf32>
    "tpu.trace_stop"() : () -> ()
    %cst_45 = arith.constant 0.353553385 : f32
    %102 = vector.broadcast %cst_45 : f32 to vector<2x8x8xf32>
    %103 = arith.mulf %101, %102 : vector<2x8x8xf32>
    %cst_46 = arith.constant dense<0xFF800000> : vector<2x8xf32>
    %104 = vector.multi_reduction <maximumf>, %103, %cst_46 [2] : vector<2x8x8xf32> to vector<2x8xf32>
    %105 = vector.shape_cast %104 : vector<2x8xf32> to vector<2x8x1xf32>
    %106 = vector.broadcast %105 : vector<2x8x1xf32> to vector<2x8x8xf32>
    %107 = arith.subf %103, %106 : vector<2x8x8xf32>
    %108 = math.exp %107 : vector<2x8x8xf32>
    %cst_47 = arith.constant dense<0.000000e+00> : vector<2x8xf32>
    %109 = vector.multi_reduction <add>, %108, %cst_47 [2] : vector<2x8x8xf32> to vector<2x8xf32>
    %110 = vector.shape_cast %109 : vector<2x8xf32> to vector<2x8x1xf32>
    %111 = tpu.reciprocal %110 {approx = true} : vector<2x8x1xf32> -> vector<2x8x1xf32>
    %112 = vector.broadcast %111 : vector<2x8x1xf32> to vector<2x8x8xf32>
    %113 = arith.mulf %108, %112 : vector<2x8x8xf32>
    %114 = arith.truncf %113 : vector<2x8x8xf32> to vector<2x8x8xbf16>
    "tpu.trace_start"() <{level = 10 : i32, message = "bnm,bmd->bnd"}> : () -> ()
    %cst_48 = arith.constant dense<0.000000e+00> : vector<2x8x8xf32>
    %115 = tpu.matmul %114, %100, %cst_48 {dimension_numbers = #tpu.dot_dimension_numbers<[2], [1], [1], [2], [0, 0, 0, 1, 1, 2], [0], [0]>} : vector<2x8x8xbf16>, vector<2x8x8xbf16>, vector<2x8x8xf32> -> vector<2x8x8xf32>
    "tpu.trace_stop"() : () -> ()
    %116 = vector.extract_strided_slice %92 {offsets = [0, 0, 8], sizes = [2, 8, 8], strides = [1, 1, 1]} : vector<2x8x32xf32> to vector<2x8x8xf32>
    %117 = arith.truncf %116 : vector<2x8x8xf32> to vector<2x8x8xbf16>
    %118 = vector.extract_strided_slice %93 {offsets = [0, 0, 8], sizes = [2, 8, 8], strides = [1, 1, 1]} : vector<2x8x32xf32> to vector<2x8x8xf32>
    %119 = arith.truncf %118 : vector<2x8x8xf32> to vector<2x8x8xbf16>
    %120 = vector.extract_strided_slice %94 {offsets = [0, 0, 8], sizes = [2, 8, 8], strides = [1, 1, 1]} : vector<2x8x32xf32> to vector<2x8x8xf32>
    %121 = arith.truncf %120 : vector<2x8x8xf32> to vector<2x8x8xbf16>
    "tpu.trace_start"() <{level = 10 : i32, message = "bnd,bmd->bnm"}> : () -> ()
    %cst_49 = arith.constant dense<0.000000e+00> : vector<2x8x8xf32>
    %122 = tpu.matmul %117, %119, %cst_49 {dimension_numbers = #tpu.dot_dimension_numbers<[2], [2], [1], [1], [0, 0, 0, 1, 1, 1], [0], [0]>} : vector<2x8x8xbf16>, vector<2x8x8xbf16>, vector<2x8x8xf32> -> vector<2x8x8xf32>
    "tpu.trace_stop"() : () -> ()
    %cst_50 = arith.constant 0.353553385 : f32
    %123 = vector.broadcast %cst_50 : f32 to vector<2x8x8xf32>
    %124 = arith.mulf %122, %123 : vector<2x8x8xf32>
    %cst_51 = arith.constant dense<0xFF800000> : vector<2x8xf32>
    %125 = vector.multi_reduction <maximumf>, %124, %cst_51 [2] : vector<2x8x8xf32> to vector<2x8xf32>
    %126 = vector.shape_cast %125 : vector<2x8xf32> to vector<2x8x1xf32>
    %127 = vector.broadcast %126 : vector<2x8x1xf32> to vector<2x8x8xf32>
    %128 = arith.subf %124, %127 : vector<2x8x8xf32>
    %129 = math.exp %128 : vector<2x8x8xf32>
    %cst_52 = arith.constant dense<0.000000e+00> : vector<2x8xf32>
    %130 = vector.multi_reduction <add>, %129, %cst_52 [2] : vector<2x8x8xf32> to vector<2x8xf32>
    %131 = vector.shape_cast %130 : vector<2x8xf32> to vector<2x8x1xf32>
    %132 = tpu.reciprocal %131 {approx = true} : vector<2x8x1xf32> -> vector<2x8x1xf32>
    %133 = vector.broadcast %132 : vector<2x8x1xf32> to vector<2x8x8xf32>
    %134 = arith.mulf %129, %133 : vector<2x8x8xf32>
    %135 = arith.truncf %134 : vector<2x8x8xf32> to vector<2x8x8xbf16>
    "tpu.trace_start"() <{level = 10 : i32, message = "bnm,bmd->bnd"}> : () -> ()
    %cst_53 = arith.constant dense<0.000000e+00> : vector<2x8x8xf32>
    %136 = tpu.matmul %135, %121, %cst_53 {dimension_numbers = #tpu.dot_dimension_numbers<[2], [1], [1], [2], [0, 0, 0, 1, 1, 2], [0], [0]>} : vector<2x8x8xbf16>, vector<2x8x8xbf16>, vector<2x8x8xf32> -> vector<2x8x8xf32>
    "tpu.trace_stop"() : () -> ()
    %137 = vector.extract_strided_slice %92 {offsets = [0, 0, 16], sizes = [2, 8, 8], strides = [1, 1, 1]} : vector<2x8x32xf32> to vector<2x8x8xf32>
    %138 = arith.truncf %137 : vector<2x8x8xf32> to vector<2x8x8xbf16>
    %139 = vector.extract_strided_slice %93 {offsets = [0, 0, 16], sizes = [2, 8, 8], strides = [1, 1, 1]} : vector<2x8x32xf32> to vector<2x8x8xf32>
    %140 = arith.truncf %139 : vector<2x8x8xf32> to vector<2x8x8xbf16>
    %141 = vector.extract_strided_slice %94 {offsets = [0, 0, 16], sizes = [2, 8, 8], strides = [1, 1, 1]} : vector<2x8x32xf32> to vector<2x8x8xf32>
    %142 = arith.truncf %141 : vector<2x8x8xf32> to vector<2x8x8xbf16>
    "tpu.trace_start"() <{level = 10 : i32, message = "bnd,bmd->bnm"}> : () -> ()
    %cst_54 = arith.constant dense<0.000000e+00> : vector<2x8x8xf32>
    %143 = tpu.matmul %138, %140, %cst_54 {dimension_numbers = #tpu.dot_dimension_numbers<[2], [2], [1], [1], [0, 0, 0, 1, 1, 1], [0], [0]>} : vector<2x8x8xbf16>, vector<2x8x8xbf16>, vector<2x8x8xf32> -> vector<2x8x8xf32>
    "tpu.trace_stop"() : () -> ()
    %cst_55 = arith.constant 0.353553385 : f32
    %144 = vector.broadcast %cst_55 : f32 to vector<2x8x8xf32>
    %145 = arith.mulf %143, %144 : vector<2x8x8xf32>
    %cst_56 = arith.constant dense<0xFF800000> : vector<2x8xf32>
    %146 = vector.multi_reduction <maximumf>, %145, %cst_56 [2] : vector<2x8x8xf32> to vector<2x8xf32>
    %147 = vector.shape_cast %146 : vector<2x8xf32> to vector<2x8x1xf32>
    %148 = vector.broadcast %147 : vector<2x8x1xf32> to vector<2x8x8xf32>
    %149 = arith.subf %145, %148 : vector<2x8x8xf32>
    %150 = math.exp %149 : vector<2x8x8xf32>
    %cst_57 = arith.constant dense<0.000000e+00> : vector<2x8xf32>
    %151 = vector.multi_reduction <add>, %150, %cst_57 [2] : vector<2x8x8xf32> to vector<2x8xf32>
    %152 = vector.shape_cast %151 : vector<2x8xf32> to vector<2x8x1xf32>
    %153 = tpu.reciprocal %152 {approx = true} : vector<2x8x1xf32> -> vector<2x8x1xf32>
    %154 = vector.broadcast %153 : vector<2x8x1xf32> to vector<2x8x8xf32>
    %155 = arith.mulf %150, %154 : vector<2x8x8xf32>
    %156 = arith.truncf %155 : vector<2x8x8xf32> to vector<2x8x8xbf16>
    "tpu.trace_start"() <{level = 10 : i32, message = "bnm,bmd->bnd"}> : () -> ()
    %cst_58 = arith.constant dense<0.000000e+00> : vector<2x8x8xf32>
    %157 = tpu.matmul %156, %142, %cst_58 {dimension_numbers = #tpu.dot_dimension_numbers<[2], [1], [1], [2], [0, 0, 0, 1, 1, 2], [0], [0]>} : vector<2x8x8xbf16>, vector<2x8x8xbf16>, vector<2x8x8xf32> -> vector<2x8x8xf32>
    "tpu.trace_stop"() : () -> ()
    %158 = vector.extract_strided_slice %92 {offsets = [0, 0, 24], sizes = [2, 8, 8], strides = [1, 1, 1]} : vector<2x8x32xf32> to vector<2x8x8xf32>
    %159 = arith.truncf %158 : vector<2x8x8xf32> to vector<2x8x8xbf16>
    %160 = vector.extract_strided_slice %93 {offsets = [0, 0, 24], sizes = [2, 8, 8], strides = [1, 1, 1]} : vector<2x8x32xf32> to vector<2x8x8xf32>
    %161 = arith.truncf %160 : vector<2x8x8xf32> to vector<2x8x8xbf16>
    %162 = vector.extract_strided_slice %94 {offsets = [0, 0, 24], sizes = [2, 8, 8], strides = [1, 1, 1]} : vector<2x8x32xf32> to vector<2x8x8xf32>
    %163 = arith.truncf %162 : vector<2x8x8xf32> to vector<2x8x8xbf16>
    "tpu.trace_start"() <{level = 10 : i32, message = "bnd,bmd->bnm"}> : () -> ()
    %cst_59 = arith.constant dense<0.000000e+00> : vector<2x8x8xf32>
    %164 = tpu.matmul %159, %161, %cst_59 {dimension_numbers = #tpu.dot_dimension_numbers<[2], [2], [1], [1], [0, 0, 0, 1, 1, 1], [0], [0]>} : vector<2x8x8xbf16>, vector<2x8x8xbf16>, vector<2x8x8xf32> -> vector<2x8x8xf32>
    "tpu.trace_stop"() : () -> ()
    %cst_60 = arith.constant 0.353553385 : f32
    %165 = vector.broadcast %cst_60 : f32 to vector<2x8x8xf32>
    %166 = arith.mulf %164, %165 : vector<2x8x8xf32>
    %cst_61 = arith.constant dense<0xFF800000> : vector<2x8xf32>
    %167 = vector.multi_reduction <maximumf>, %166, %cst_61 [2] : vector<2x8x8xf32> to vector<2x8xf32>
    %168 = vector.shape_cast %167 : vector<2x8xf32> to vector<2x8x1xf32>
    %169 = vector.broadcast %168 : vector<2x8x1xf32> to vector<2x8x8xf32>
    %170 = arith.subf %166, %169 : vector<2x8x8xf32>
    %171 = math.exp %170 : vector<2x8x8xf32>
    %cst_62 = arith.constant dense<0.000000e+00> : vector<2x8xf32>
    %172 = vector.multi_reduction <add>, %171, %cst_62 [2] : vector<2x8x8xf32> to vector<2x8xf32>
    %173 = vector.shape_cast %172 : vector<2x8xf32> to vector<2x8x1xf32>
    %174 = tpu.reciprocal %173 {approx = true} : vector<2x8x1xf32> -> vector<2x8x1xf32>
    %175 = vector.broadcast %174 : vector<2x8x1xf32> to vector<2x8x8xf32>
    %176 = arith.mulf %171, %175 : vector<2x8x8xf32>
    %177 = arith.truncf %176 : vector<2x8x8xf32> to vector<2x8x8xbf16>
    "tpu.trace_start"() <{level = 10 : i32, message = "bnm,bmd->bnd"}> : () -> ()
    %cst_63 = arith.constant dense<0.000000e+00> : vector<2x8x8xf32>
    %178 = tpu.matmul %177, %163, %cst_63 {dimension_numbers = #tpu.dot_dimension_numbers<[2], [1], [1], [2], [0, 0, 0, 1, 1, 2], [0], [0]>} : vector<2x8x8xbf16>, vector<2x8x8xbf16>, vector<2x8x8xf32> -> vector<2x8x8xf32>
    "tpu.trace_stop"() : () -> ()
    %179 = tpu.concatenate %115, %136, %157, %178 in 2 : vector<2x8x8xf32>, vector<2x8x8xf32>, vector<2x8x8xf32>, vector<2x8x8xf32> -> vector<2x8x32xf32>
    %180 = vector.shape_cast %179 : vector<2x8x32xf32> to vector<16x32xf32>
    %181 = arith.truncf %180 : vector<16x32xf32> to vector<16x32xbf16>
    %c0_64 = arith.constant 0 : index
    %c0_65 = arith.constant 0 : index
    %c0_66 = arith.constant 0 : index
    %182 = vector.load %arg10[%c0_64, %c0_65, %c0_66] : memref<2x32x32xbf16, #tpu.memory_space<vmem>>, vector<1x32x32xbf16>
    %183 = vector.shape_cast %182 : vector<1x32x32xbf16> to vector<32x32xbf16>
    %cst_67 = arith.constant dense<0.000000e+00> : vector<16x32xf32>
    %184 = tpu.matmul %181, %183, %cst_67 {dimension_numbers = #tpu.dot_dimension_numbers<[1], [0], [0], [1], [0, 0, 1, 1], [], []>} : vector<16x32xbf16>, vector<32x32xbf16>, vector<16x32xf32> -> vector<16x32xf32>
    %c0_68 = arith.constant 0 : index
    %c0_69 = arith.constant 0 : index
    %c0_70 = arith.constant 0 : index
    %185 = vector.load %arg11[%c0_68, %c0_69, %c0_70] : memref<2x1x32xf32, #tpu.memory_space<vmem>>, vector<1x1x32xf32>
    %186 = vector.shape_cast %185 : vector<1x1x32xf32> to vector<1x32xf32>
    %187 = vector.broadcast %186 : vector<1x32xf32> to vector<16x32xf32>
    %188 = arith.addf %184, %187 : vector<16x32xf32>
    %189 = arith.addf %40, %188 : vector<16x32xf32>
    %c0_71 = arith.constant 0 : index
    %c0_72 = arith.constant 0 : index
    %c0_73 = arith.constant 0 : index
    %190 = vector.load %arg12[%c0_71, %c0_72, %c0_73] : memref<2x1x32xf32, #tpu.memory_space<vmem>>, vector<1x1x32xf32>
    %191 = vector.shape_cast %190 : vector<1x1x32xf32> to vector<1x32xf32>
    %c0_74 = arith.constant 0 : index
    %c0_75 = arith.constant 0 : index
    %c0_76 = arith.constant 0 : index
    %192 = vector.load %arg13[%c0_74, %c0_75, %c0_76] : memref<2x1x32xf32, #tpu.memory_space<vmem>>, vector<1x1x32xf32>
    %193 = vector.shape_cast %192 : vector<1x1x32xf32> to vector<1x32xf32>
    %cst_77 = arith.constant dense<0.000000e+00> : vector<16xf32>
    %194 = vector.multi_reduction <add>, %189, %cst_77 [1] : vector<16x32xf32> to vector<16xf32>
    %195 = vector.shape_cast %194 : vector<16xf32> to vector<16x1xf32>
    %cst_78 = arith.constant 3.200000e+01 : f32
    %196 = vector.broadcast %cst_78 : f32 to vector<16x1xf32>
    %197 = arith.divf %195, %196 : vector<16x1xf32>
    %198 = vector.broadcast %197 : vector<16x1xf32> to vector<16x32xf32>
    %199 = arith.subf %189, %198 : vector<16x32xf32>
    %200 = arith.mulf %199, %199 : vector<16x32xf32>
    %cst_79 = arith.constant dense<0.000000e+00> : vector<16xf32>
    %201 = vector.multi_reduction <add>, %200, %cst_79 [1] : vector<16x32xf32> to vector<16xf32>
    %202 = vector.shape_cast %201 : vector<16xf32> to vector<16x1xf32>
    %cst_80 = arith.constant 3.200000e+01 : f32
    %203 = vector.broadcast %cst_80 : f32 to vector<16x1xf32>
    %204 = arith.divf %202, %203 : vector<16x1xf32>
    %205 = vector.broadcast %197 : vector<16x1xf32> to vector<16x32xf32>
    %206 = arith.subf %189, %205 : vector<16x32xf32>
    %cst_81 = arith.constant 9.99999974E-6 : f32
    %207 = vector.broadcast %cst_81 : f32 to vector<16x1xf32>
    %208 = arith.addf %204, %207 : vector<16x1xf32>
    %209 = math.rsqrt %208 : vector<16x1xf32>
    %210 = vector.broadcast %209 : vector<16x1xf32> to vector<16x32xf32>
    %211 = arith.mulf %206, %210 : vector<16x32xf32>
    %212 = vector.broadcast %191 : vector<1x32xf32> to vector<16x32xf32>
    %213 = arith.mulf %211, %212 : vector<16x32xf32>
    %214 = vector.broadcast %193 : vector<1x32xf32> to vector<16x32xf32>
    %215 = arith.addf %213, %214 : vector<16x32xf32>
    %216 = arith.truncf %215 : vector<16x32xf32> to vector<16x32xbf16>
    %c0_82 = arith.constant 0 : index
    %c0_83 = arith.constant 0 : index
    %c0_84 = arith.constant 0 : index
    %217 = vector.load %arg14[%c0_82, %c0_83, %c0_84] : memref<2x32x128xbf16, #tpu.memory_space<vmem>>, vector<1x32x128xbf16>
    %218 = vector.shape_cast %217 : vector<1x32x128xbf16> to vector<32x128xbf16>
    %cst_85 = arith.constant dense<0.000000e+00> : vector<16x128xf32>
    %219 = tpu.matmul %216, %218, %cst_85 {dimension_numbers = #tpu.dot_dimension_numbers<[1], [0], [0], [1], [0, 0, 1, 1], [], []>} : vector<16x32xbf16>, vector<32x128xbf16>, vector<16x128xf32> -> vector<16x128xf32>
    %c0_86 = arith.constant 0 : index
    %c0_87 = arith.constant 0 : index
    %c0_88 = arith.constant 0 : index
    %220 = vector.load %arg15[%c0_86, %c0_87, %c0_88] : memref<2x1x128xf32, #tpu.memory_space<vmem>>, vector<1x1x128xf32>
    %221 = vector.shape_cast %220 : vector<1x1x128xf32> to vector<1x128xf32>
    %222 = vector.broadcast %221 : vector<1x128xf32> to vector<16x128xf32>
    %223 = arith.addf %219, %222 : vector<16x128xf32>
    %cst_89 = arith.constant 0.000000e+00 : f32
    %224 = vector.broadcast %cst_89 : f32 to vector<16x128xf32>
    %225 = arith.maximumf %223, %224 : vector<16x128xf32>
    %226 = arith.truncf %225 : vector<16x128xf32> to vector<16x128xbf16>
    %c0_90 = arith.constant 0 : index
    %c0_91 = arith.constant 0 : index
    %c0_92 = arith.constant 0 : index
    %227 = vector.load %arg16[%c0_90, %c0_91, %c0_92] : memref<2x128x32xbf16, #tpu.memory_space<vmem>>, vector<1x128x32xbf16>
    %228 = vector.shape_cast %227 : vector<1x128x32xbf16> to vector<128x32xbf16>
    %cst_93 = arith.constant dense<0.000000e+00> : vector<16x32xf32>
    %229 = tpu.matmul %226, %228, %cst_93 {dimension_numbers = #tpu.dot_dimension_numbers<[1], [0], [0], [1], [0, 0, 1, 1], [], []>} : vector<16x128xbf16>, vector<128x32xbf16>, vector<16x32xf32> -> vector<16x32xf32>
    %c0_94 = arith.constant 0 : index
    %c0_95 = arith.constant 0 : index
    %c0_96 = arith.constant 0 : index
    %230 = vector.load %arg17[%c0_94, %c0_95, %c0_96] : memref<2x1x32xf32, #tpu.memory_space<vmem>>, vector<1x1x32xf32>
    %231 = vector.shape_cast %230 : vector<1x1x32xf32> to vector<1x32xf32>
    %232 = vector.broadcast %231 : vector<1x32xf32> to vector<16x32xf32>
    %233 = arith.addf %229, %232 : vector<16x32xf32>
    %234 = arith.addf %189, %233 : vector<16x32xf32>
    %c1_97 = arith.constant 1 : index
    %c0_98 = arith.constant 0 : index
    %c0_99 = arith.constant 0 : index
    %235 = vector.load %arg6[%c1_97, %c0_98, %c0_99] : memref<2x1x32xf32, #tpu.memory_space<vmem>>, vector<1x1x32xf32>
    %236 = vector.shape_cast %235 : vector<1x1x32xf32> to vector<1x32xf32>
    %c1_100 = arith.constant 1 : index
    %c0_101 = arith.constant 0 : index
    %c0_102 = arith.constant 0 : index
    %237 = vector.load %arg7[%c1_100, %c0_101, %c0_102] : memref<2x1x32xf32, #tpu.memory_space<vmem>>, vector<1x1x32xf32>
    %238 = vector.shape_cast %237 : vector<1x1x32xf32> to vector<1x32xf32>
    %cst_103 = arith.constant dense<0.000000e+00> : vector<16xf32>
    %239 = vector.multi_reduction <add>, %234, %cst_103 [1] : vector<16x32xf32> to vector<16xf32>
    %240 = vector.shape_cast %239 : vector<16xf32> to vector<16x1xf32>
    %cst_104 = arith.constant 3.200000e+01 : f32
    %241 = vector.broadcast %cst_104 : f32 to vector<16x1xf32>
    %242 = arith.divf %240, %241 : vector<16x1xf32>
    %243 = vector.broadcast %242 : vector<16x1xf32> to vector<16x32xf32>
    %244 = arith.subf %234, %243 : vector<16x32xf32>
    %245 = arith.mulf %244, %244 : vector<16x32xf32>
    %cst_105 = arith.constant dense<0.000000e+00> : vector<16xf32>
    %246 = vector.multi_reduction <add>, %245, %cst_105 [1] : vector<16x32xf32> to vector<16xf32>
    %247 = vector.shape_cast %246 : vector<16xf32> to vector<16x1xf32>
    %cst_106 = arith.constant 3.200000e+01 : f32
    %248 = vector.broadcast %cst_106 : f32 to vector<16x1xf32>
    %249 = arith.divf %247, %248 : vector<16x1xf32>
    %250 = vector.broadcast %242 : vector<16x1xf32> to vector<16x32xf32>
    %251 = arith.subf %234, %250 : vector<16x32xf32>
    %cst_107 = arith.constant 9.99999974E-6 : f32
    %252 = vector.broadcast %cst_107 : f32 to vector<16x1xf32>
    %253 = arith.addf %249, %252 : vector<16x1xf32>
    %254 = math.rsqrt %253 : vector<16x1xf32>
    %255 = vector.broadcast %254 : vector<16x1xf32> to vector<16x32xf32>
    %256 = arith.mulf %251, %255 : vector<16x32xf32>
    %257 = vector.broadcast %236 : vector<1x32xf32> to vector<16x32xf32>
    %258 = arith.mulf %256, %257 : vector<16x32xf32>
    %259 = vector.broadcast %238 : vector<1x32xf32> to vector<16x32xf32>
    %260 = arith.addf %258, %259 : vector<16x32xf32>
    %261 = arith.truncf %260 : vector<16x32xf32> to vector<16x32xbf16>
    %c1_108 = arith.constant 1 : index
    %c0_109 = arith.constant 0 : index
    %c0_110 = arith.constant 0 : index
    %c0_111 = arith.constant 0 : index
    %262 = vector.load %arg8[%c1_108, %c0_109, %c0_110, %c0_111] : memref<2x3x32x32xbf16, #tpu.memory_space<vmem>>, vector<1x1x32x32xbf16>
    %263 = vector.shape_cast %262 : vector<1x1x32x32xbf16> to vector<32x32xbf16>
    %cst_112 = arith.constant dense<0.000000e+00> : vector<16x32xf32>
    %264 = tpu.matmul %261, %263, %cst_112 {dimension_numbers = #tpu.dot_dimension_numbers<[1], [0], [0], [1], [0, 0, 1, 1], [], []>} : vector<16x32xbf16>, vector<32x32xbf16>, vector<16x32xf32> -> vector<16x32xf32>
    %c1_113 = arith.constant 1 : index
    %c0_114 = arith.constant 0 : index
    %c0_115 = arith.constant 0 : index
    %265 = vector.load %arg9[%c1_113, %c0_114, %c0_115] : memref<2x3x32xf32, #tpu.memory_space<vmem>>, vector<1x1x32xf32>
    %266 = vector.shape_cast %265 : vector<1x1x32xf32> to vector<32xf32>
    %267 = vector.shape_cast %266 : vector<32xf32> to vector<1x32xf32>
    %268 = vector.broadcast %267 : vector<1x32xf32> to vector<16x32xf32>
    %269 = arith.addf %264, %268 : vector<16x32xf32>
    %c1_116 = arith.constant 1 : index
    %c1_117 = arith.constant 1 : index
    %c0_118 = arith.constant 0 : index
    %c0_119 = arith.constant 0 : index
    %270 = vector.load %arg8[%c1_116, %c1_117, %c0_118, %c0_119] : memref<2x3x32x32xbf16, #tpu.memory_space<vmem>>, vector<1x1x32x32xbf16>
    %271 = vector.shape_cast %270 : vector<1x1x32x32xbf16> to vector<32x32xbf16>
    %cst_120 = arith.constant dense<0.000000e+00> : vector<16x32xf32>
    %272 = tpu.matmul %261, %271, %cst_120 {dimension_numbers = #tpu.dot_dimension_numbers<[1], [0], [0], [1], [0, 0, 1, 1], [], []>} : vector<16x32xbf16>, vector<32x32xbf16>, vector<16x32xf32> -> vector<16x32xf32>
    %c1_121 = arith.constant 1 : index
    %c1_122 = arith.constant 1 : index
    %c0_123 = arith.constant 0 : index
    %273 = vector.load %arg9[%c1_121, %c1_122, %c0_123] : memref<2x3x32xf32, #tpu.memory_space<vmem>>, vector<1x1x32xf32>
    %274 = vector.shape_cast %273 : vector<1x1x32xf32> to vector<32xf32>
    %275 = vector.shape_cast %274 : vector<32xf32> to vector<1x32xf32>
    %276 = vector.broadcast %275 : vector<1x32xf32> to vector<16x32xf32>
    %277 = arith.addf %272, %276 : vector<16x32xf32>
    %c1_124 = arith.constant 1 : index
    %c2_125 = arith.constant 2 : index
    %c0_126 = arith.constant 0 : index
    %c0_127 = arith.constant 0 : index
    %278 = vector.load %arg8[%c1_124, %c2_125, %c0_126, %c0_127] : memref<2x3x32x32xbf16, #tpu.memory_space<vmem>>, vector<1x1x32x32xbf16>
    %279 = vector.shape_cast %278 : vector<1x1x32x32xbf16> to vector<32x32xbf16>
    %cst_128 = arith.constant dense<0.000000e+00> : vector<16x32xf32>
    %280 = tpu.matmul %261, %279, %cst_128 {dimension_numbers = #tpu.dot_dimension_numbers<[1], [0], [0], [1], [0, 0, 1, 1], [], []>} : vector<16x32xbf16>, vector<32x32xbf16>, vector<16x32xf32> -> vector<16x32xf32>
    %c1_129 = arith.constant 1 : index
    %c2_130 = arith.constant 2 : index
    %c0_131 = arith.constant 0 : index
    %281 = vector.load %arg9[%c1_129, %c2_130, %c0_131] : memref<2x3x32xf32, #tpu.memory_space<vmem>>, vector<1x1x32xf32>
    %282 = vector.shape_cast %281 : vector<1x1x32xf32> to vector<32xf32>
    %283 = vector.shape_cast %282 : vector<32xf32> to vector<1x32xf32>
    %284 = vector.broadcast %283 : vector<1x32xf32> to vector<16x32xf32>
    %285 = arith.addf %280, %284 : vector<16x32xf32>
    %286 = vector.shape_cast %269 : vector<16x32xf32> to vector<2x8x32xf32>
    %287 = vector.shape_cast %277 : vector<16x32xf32> to vector<2x8x32xf32>
    %288 = vector.shape_cast %285 : vector<16x32xf32> to vector<2x8x32xf32>
    %289 = vector.extract_strided_slice %286 {offsets = [0, 0, 0], sizes = [2, 8, 8], strides = [1, 1, 1]} : vector<2x8x32xf32> to vector<2x8x8xf32>
    %290 = arith.truncf %289 : vector<2x8x8xf32> to vector<2x8x8xbf16>
    %291 = vector.extract_strided_slice %287 {offsets = [0, 0, 0], sizes = [2, 8, 8], strides = [1, 1, 1]} : vector<2x8x32xf32> to vector<2x8x8xf32>
    %292 = arith.truncf %291 : vector<2x8x8xf32> to vector<2x8x8xbf16>
    %293 = vector.extract_strided_slice %288 {offsets = [0, 0, 0], sizes = [2, 8, 8], strides = [1, 1, 1]} : vector<2x8x32xf32> to vector<2x8x8xf32>
    %294 = arith.truncf %293 : vector<2x8x8xf32> to vector<2x8x8xbf16>
    "tpu.trace_start"() <{level = 10 : i32, message = "bnd,bmd->bnm"}> : () -> ()
    %cst_132 = arith.constant dense<0.000000e+00> : vector<2x8x8xf32>
    %295 = tpu.matmul %290, %292, %cst_132 {dimension_numbers = #tpu.dot_dimension_numbers<[2], [2], [1], [1], [0, 0, 0, 1, 1, 1], [0], [0]>} : vector<2x8x8xbf16>, vector<2x8x8xbf16>, vector<2x8x8xf32> -> vector<2x8x8xf32>
    "tpu.trace_stop"() : () -> ()
    %cst_133 = arith.constant 0.353553385 : f32
    %296 = vector.broadcast %cst_133 : f32 to vector<2x8x8xf32>
    %297 = arith.mulf %295, %296 : vector<2x8x8xf32>
    %cst_134 = arith.constant dense<0xFF800000> : vector<2x8xf32>
    %298 = vector.multi_reduction <maximumf>, %297, %cst_134 [2] : vector<2x8x8xf32> to vector<2x8xf32>
    %299 = vector.shape_cast %298 : vector<2x8xf32> to vector<2x8x1xf32>
    %300 = vector.broadcast %299 : vector<2x8x1xf32> to vector<2x8x8xf32>
    %301 = arith.subf %297, %300 : vector<2x8x8xf32>
    %302 = math.exp %301 : vector<2x8x8xf32>
    %cst_135 = arith.constant dense<0.000000e+00> : vector<2x8xf32>
    %303 = vector.multi_reduction <add>, %302, %cst_135 [2] : vector<2x8x8xf32> to vector<2x8xf32>
    %304 = vector.shape_cast %303 : vector<2x8xf32> to vector<2x8x1xf32>
    %305 = tpu.reciprocal %304 {approx = true} : vector<2x8x1xf32> -> vector<2x8x1xf32>
    %306 = vector.broadcast %305 : vector<2x8x1xf32> to vector<2x8x8xf32>
    %307 = arith.mulf %302, %306 : vector<2x8x8xf32>
    %308 = arith.truncf %307 : vector<2x8x8xf32> to vector<2x8x8xbf16>
    "tpu.trace_start"() <{level = 10 : i32, message = "bnm,bmd->bnd"}> : () -> ()
    %cst_136 = arith.constant dense<0.000000e+00> : vector<2x8x8xf32>
    %309 = tpu.matmul %308, %294, %cst_136 {dimension_numbers = #tpu.dot_dimension_numbers<[2], [1], [1], [2], [0, 0, 0, 1, 1, 2], [0], [0]>} : vector<2x8x8xbf16>, vector<2x8x8xbf16>, vector<2x8x8xf32> -> vector<2x8x8xf32>
    "tpu.trace_stop"() : () -> ()
    %310 = vector.extract_strided_slice %286 {offsets = [0, 0, 8], sizes = [2, 8, 8], strides = [1, 1, 1]} : vector<2x8x32xf32> to vector<2x8x8xf32>
    %311 = arith.truncf %310 : vector<2x8x8xf32> to vector<2x8x8xbf16>
    %312 = vector.extract_strided_slice %287 {offsets = [0, 0, 8], sizes = [2, 8, 8], strides = [1, 1, 1]} : vector<2x8x32xf32> to vector<2x8x8xf32>
    %313 = arith.truncf %312 : vector<2x8x8xf32> to vector<2x8x8xbf16>
    %314 = vector.extract_strided_slice %288 {offsets = [0, 0, 8], sizes = [2, 8, 8], strides = [1, 1, 1]} : vector<2x8x32xf32> to vector<2x8x8xf32>
    %315 = arith.truncf %314 : vector<2x8x8xf32> to vector<2x8x8xbf16>
    "tpu.trace_start"() <{level = 10 : i32, message = "bnd,bmd->bnm"}> : () -> ()
    %cst_137 = arith.constant dense<0.000000e+00> : vector<2x8x8xf32>
    %316 = tpu.matmul %311, %313, %cst_137 {dimension_numbers = #tpu.dot_dimension_numbers<[2], [2], [1], [1], [0, 0, 0, 1, 1, 1], [0], [0]>} : vector<2x8x8xbf16>, vector<2x8x8xbf16>, vector<2x8x8xf32> -> vector<2x8x8xf32>
    "tpu.trace_stop"() : () -> ()
    %cst_138 = arith.constant 0.353553385 : f32
    %317 = vector.broadcast %cst_138 : f32 to vector<2x8x8xf32>
    %318 = arith.mulf %316, %317 : vector<2x8x8xf32>
    %cst_139 = arith.constant dense<0xFF800000> : vector<2x8xf32>
    %319 = vector.multi_reduction <maximumf>, %318, %cst_139 [2] : vector<2x8x8xf32> to vector<2x8xf32>
    %320 = vector.shape_cast %319 : vector<2x8xf32> to vector<2x8x1xf32>
    %321 = vector.broadcast %320 : vector<2x8x1xf32> to vector<2x8x8xf32>
    %322 = arith.subf %318, %321 : vector<2x8x8xf32>
    %323 = math.exp %322 : vector<2x8x8xf32>
    %cst_140 = arith.constant dense<0.000000e+00> : vector<2x8xf32>
    %324 = vector.multi_reduction <add>, %323, %cst_140 [2] : vector<2x8x8xf32> to vector<2x8xf32>
    %325 = vector.shape_cast %324 : vector<2x8xf32> to vector<2x8x1xf32>
    %326 = tpu.reciprocal %325 {approx = true} : vector<2x8x1xf32> -> vector<2x8x1xf32>
    %327 = vector.broadcast %326 : vector<2x8x1xf32> to vector<2x8x8xf32>
    %328 = arith.mulf %323, %327 : vector<2x8x8xf32>
    %329 = arith.truncf %328 : vector<2x8x8xf32> to vector<2x8x8xbf16>
    "tpu.trace_start"() <{level = 10 : i32, message = "bnm,bmd->bnd"}> : () -> ()
    %cst_141 = arith.constant dense<0.000000e+00> : vector<2x8x8xf32>
    %330 = tpu.matmul %329, %315, %cst_141 {dimension_numbers = #tpu.dot_dimension_numbers<[2], [1], [1], [2], [0, 0, 0, 1, 1, 2], [0], [0]>} : vector<2x8x8xbf16>, vector<2x8x8xbf16>, vector<2x8x8xf32> -> vector<2x8x8xf32>
    "tpu.trace_stop"() : () -> ()
    %331 = vector.extract_strided_slice %286 {offsets = [0, 0, 16], sizes = [2, 8, 8], strides = [1, 1, 1]} : vector<2x8x32xf32> to vector<2x8x8xf32>
    %332 = arith.truncf %331 : vector<2x8x8xf32> to vector<2x8x8xbf16>
    %333 = vector.extract_strided_slice %287 {offsets = [0, 0, 16], sizes = [2, 8, 8], strides = [1, 1, 1]} : vector<2x8x32xf32> to vector<2x8x8xf32>
    %334 = arith.truncf %333 : vector<2x8x8xf32> to vector<2x8x8xbf16>
    %335 = vector.extract_strided_slice %288 {offsets = [0, 0, 16], sizes = [2, 8, 8], strides = [1, 1, 1]} : vector<2x8x32xf32> to vector<2x8x8xf32>
    %336 = arith.truncf %335 : vector<2x8x8xf32> to vector<2x8x8xbf16>
    "tpu.trace_start"() <{level = 10 : i32, message = "bnd,bmd->bnm"}> : () -> ()
    %cst_142 = arith.constant dense<0.000000e+00> : vector<2x8x8xf32>
    %337 = tpu.matmul %332, %334, %cst_142 {dimension_numbers = #tpu.dot_dimension_numbers<[2], [2], [1], [1], [0, 0, 0, 1, 1, 1], [0], [0]>} : vector<2x8x8xbf16>, vector<2x8x8xbf16>, vector<2x8x8xf32> -> vector<2x8x8xf32>
    "tpu.trace_stop"() : () -> ()
    %cst_143 = arith.constant 0.353553385 : f32
    %338 = vector.broadcast %cst_143 : f32 to vector<2x8x8xf32>
    %339 = arith.mulf %337, %338 : vector<2x8x8xf32>
    %cst_144 = arith.constant dense<0xFF800000> : vector<2x8xf32>
    %340 = vector.multi_reduction <maximumf>, %339, %cst_144 [2] : vector<2x8x8xf32> to vector<2x8xf32>
    %341 = vector.shape_cast %340 : vector<2x8xf32> to vector<2x8x1xf32>
    %342 = vector.broadcast %341 : vector<2x8x1xf32> to vector<2x8x8xf32>
    %343 = arith.subf %339, %342 : vector<2x8x8xf32>
    %344 = math.exp %343 : vector<2x8x8xf32>
    %cst_145 = arith.constant dense<0.000000e+00> : vector<2x8xf32>
    %345 = vector.multi_reduction <add>, %344, %cst_145 [2] : vector<2x8x8xf32> to vector<2x8xf32>
    %346 = vector.shape_cast %345 : vector<2x8xf32> to vector<2x8x1xf32>
    %347 = tpu.reciprocal %346 {approx = true} : vector<2x8x1xf32> -> vector<2x8x1xf32>
    %348 = vector.broadcast %347 : vector<2x8x1xf32> to vector<2x8x8xf32>
    %349 = arith.mulf %344, %348 : vector<2x8x8xf32>
    %350 = arith.truncf %349 : vector<2x8x8xf32> to vector<2x8x8xbf16>
    "tpu.trace_start"() <{level = 10 : i32, message = "bnm,bmd->bnd"}> : () -> ()
    %cst_146 = arith.constant dense<0.000000e+00> : vector<2x8x8xf32>
    %351 = tpu.matmul %350, %336, %cst_146 {dimension_numbers = #tpu.dot_dimension_numbers<[2], [1], [1], [2], [0, 0, 0, 1, 1, 2], [0], [0]>} : vector<2x8x8xbf16>, vector<2x8x8xbf16>, vector<2x8x8xf32> -> vector<2x8x8xf32>
    "tpu.trace_stop"() : () -> ()
    %352 = vector.extract_strided_slice %286 {offsets = [0, 0, 24], sizes = [2, 8, 8], strides = [1, 1, 1]} : vector<2x8x32xf32> to vector<2x8x8xf32>
    %353 = arith.truncf %352 : vector<2x8x8xf32> to vector<2x8x8xbf16>
    %354 = vector.extract_strided_slice %287 {offsets = [0, 0, 24], sizes = [2, 8, 8], strides = [1, 1, 1]} : vector<2x8x32xf32> to vector<2x8x8xf32>
    %355 = arith.truncf %354 : vector<2x8x8xf32> to vector<2x8x8xbf16>
    %356 = vector.extract_strided_slice %288 {offsets = [0, 0, 24], sizes = [2, 8, 8], strides = [1, 1, 1]} : vector<2x8x32xf32> to vector<2x8x8xf32>
    %357 = arith.truncf %356 : vector<2x8x8xf32> to vector<2x8x8xbf16>
    "tpu.trace_start"() <{level = 10 : i32, message = "bnd,bmd->bnm"}> : () -> ()
    %cst_147 = arith.constant dense<0.000000e+00> : vector<2x8x8xf32>
    %358 = tpu.matmul %353, %355, %cst_147 {dimension_numbers = #tpu.dot_dimension_numbers<[2], [2], [1], [1], [0, 0, 0, 1, 1, 1], [0], [0]>} : vector<2x8x8xbf16>, vector<2x8x8xbf16>, vector<2x8x8xf32> -> vector<2x8x8xf32>
    "tpu.trace_stop"() : () -> ()
    %cst_148 = arith.constant 0.353553385 : f32
    %359 = vector.broadcast %cst_148 : f32 to vector<2x8x8xf32>
    %360 = arith.mulf %358, %359 : vector<2x8x8xf32>
    %cst_149 = arith.constant dense<0xFF800000> : vector<2x8xf32>
    %361 = vector.multi_reduction <maximumf>, %360, %cst_149 [2] : vector<2x8x8xf32> to vector<2x8xf32>
    %362 = vector.shape_cast %361 : vector<2x8xf32> to vector<2x8x1xf32>
    %363 = vector.broadcast %362 : vector<2x8x1xf32> to vector<2x8x8xf32>
    %364 = arith.subf %360, %363 : vector<2x8x8xf32>
    %365 = math.exp %364 : vector<2x8x8xf32>
    %cst_150 = arith.constant dense<0.000000e+00> : vector<2x8xf32>
    %366 = vector.multi_reduction <add>, %365, %cst_150 [2] : vector<2x8x8xf32> to vector<2x8xf32>
    %367 = vector.shape_cast %366 : vector<2x8xf32> to vector<2x8x1xf32>
    %368 = tpu.reciprocal %367 {approx = true} : vector<2x8x1xf32> -> vector<2x8x1xf32>
    %369 = vector.broadcast %368 : vector<2x8x1xf32> to vector<2x8x8xf32>
    %370 = arith.mulf %365, %369 : vector<2x8x8xf32>
    %371 = arith.truncf %370 : vector<2x8x8xf32> to vector<2x8x8xbf16>
    "tpu.trace_start"() <{level = 10 : i32, message = "bnm,bmd->bnd"}> : () -> ()
    %cst_151 = arith.constant dense<0.000000e+00> : vector<2x8x8xf32>
    %372 = tpu.matmul %371, %357, %cst_151 {dimension_numbers = #tpu.dot_dimension_numbers<[2], [1], [1], [2], [0, 0, 0, 1, 1, 2], [0], [0]>} : vector<2x8x8xbf16>, vector<2x8x8xbf16>, vector<2x8x8xf32> -> vector<2x8x8xf32>
    "tpu.trace_stop"() : () -> ()
    %373 = tpu.concatenate %309, %330, %351, %372 in 2 : vector<2x8x8xf32>, vector<2x8x8xf32>, vector<2x8x8xf32>, vector<2x8x8xf32> -> vector<2x8x32xf32>
    %374 = vector.shape_cast %373 : vector<2x8x32xf32> to vector<16x32xf32>
    %375 = arith.truncf %374 : vector<16x32xf32> to vector<16x32xbf16>
    %c1_152 = arith.constant 1 : index
    %c0_153 = arith.constant 0 : index
    %c0_154 = arith.constant 0 : index
    %376 = vector.load %arg10[%c1_152, %c0_153, %c0_154] : memref<2x32x32xbf16, #tpu.memory_space<vmem>>, vector<1x32x32xbf16>
    %377 = vector.shape_cast %376 : vector<1x32x32xbf16> to vector<32x32xbf16>
    %cst_155 = arith.constant dense<0.000000e+00> : vector<16x32xf32>
    %378 = tpu.matmul %375, %377, %cst_155 {dimension_numbers = #tpu.dot_dimension_numbers<[1], [0], [0], [1], [0, 0, 1, 1], [], []>} : vector<16x32xbf16>, vector<32x32xbf16>, vector<16x32xf32> -> vector<16x32xf32>
    %c1_156 = arith.constant 1 : index
    %c0_157 = arith.constant 0 : index
    %c0_158 = arith.constant 0 : index
    %379 = vector.load %arg11[%c1_156, %c0_157, %c0_158] : memref<2x1x32xf32, #tpu.memory_space<vmem>>, vector<1x1x32xf32>
    %380 = vector.shape_cast %379 : vector<1x1x32xf32> to vector<1x32xf32>
    %381 = vector.broadcast %380 : vector<1x32xf32> to vector<16x32xf32>
    %382 = arith.addf %378, %381 : vector<16x32xf32>
    %383 = arith.addf %234, %382 : vector<16x32xf32>
    %c1_159 = arith.constant 1 : index
    %c0_160 = arith.constant 0 : index
    %c0_161 = arith.constant 0 : index
    %384 = vector.load %arg12[%c1_159, %c0_160, %c0_161] : memref<2x1x32xf32, #tpu.memory_space<vmem>>, vector<1x1x32xf32>
    %385 = vector.shape_cast %384 : vector<1x1x32xf32> to vector<1x32xf32>
    %c1_162 = arith.constant 1 : index
    %c0_163 = arith.constant 0 : index
    %c0_164 = arith.constant 0 : index
    %386 = vector.load %arg13[%c1_162, %c0_163, %c0_164] : memref<2x1x32xf32, #tpu.memory_space<vmem>>, vector<1x1x32xf32>
    %387 = vector.shape_cast %386 : vector<1x1x32xf32> to vector<1x32xf32>
    %cst_165 = arith.constant dense<0.000000e+00> : vector<16xf32>
    %388 = vector.multi_reduction <add>, %383, %cst_165 [1] : vector<16x32xf32> to vector<16xf32>
    %389 = vector.shape_cast %388 : vector<16xf32> to vector<16x1xf32>
    %cst_166 = arith.constant 3.200000e+01 : f32
    %390 = vector.broadcast %cst_166 : f32 to vector<16x1xf32>
    %391 = arith.divf %389, %390 : vector<16x1xf32>
    %392 = vector.broadcast %391 : vector<16x1xf32> to vector<16x32xf32>
    %393 = arith.subf %383, %392 : vector<16x32xf32>
    %394 = arith.mulf %393, %393 : vector<16x32xf32>
    %cst_167 = arith.constant dense<0.000000e+00> : vector<16xf32>
    %395 = vector.multi_reduction <add>, %394, %cst_167 [1] : vector<16x32xf32> to vector<16xf32>
    %396 = vector.shape_cast %395 : vector<16xf32> to vector<16x1xf32>
    %cst_168 = arith.constant 3.200000e+01 : f32
    %397 = vector.broadcast %cst_168 : f32 to vector<16x1xf32>
    %398 = arith.divf %396, %397 : vector<16x1xf32>
    %399 = vector.broadcast %391 : vector<16x1xf32> to vector<16x32xf32>
    %400 = arith.subf %383, %399 : vector<16x32xf32>
    %cst_169 = arith.constant 9.99999974E-6 : f32
    %401 = vector.broadcast %cst_169 : f32 to vector<16x1xf32>
    %402 = arith.addf %398, %401 : vector<16x1xf32>
    %403 = math.rsqrt %402 : vector<16x1xf32>
    %404 = vector.broadcast %403 : vector<16x1xf32> to vector<16x32xf32>
    %405 = arith.mulf %400, %404 : vector<16x32xf32>
    %406 = vector.broadcast %385 : vector<1x32xf32> to vector<16x32xf32>
    %407 = arith.mulf %405, %406 : vector<16x32xf32>
    %408 = vector.broadcast %387 : vector<1x32xf32> to vector<16x32xf32>
    %409 = arith.addf %407, %408 : vector<16x32xf32>
    %410 = arith.truncf %409 : vector<16x32xf32> to vector<16x32xbf16>
    %c1_170 = arith.constant 1 : index
    %c0_171 = arith.constant 0 : index
    %c0_172 = arith.constant 0 : index
    %411 = vector.load %arg14[%c1_170, %c0_171, %c0_172] : memref<2x32x128xbf16, #tpu.memory_space<vmem>>, vector<1x32x128xbf16>
    %412 = vector.shape_cast %411 : vector<1x32x128xbf16> to vector<32x128xbf16>
    %cst_173 = arith.constant dense<0.000000e+00> : vector<16x128xf32>
    %413 = tpu.matmul %410, %412, %cst_173 {dimension_numbers = #tpu.dot_dimension_numbers<[1], [0], [0], [1], [0, 0, 1, 1], [], []>} : vector<16x32xbf16>, vector<32x128xbf16>, vector<16x128xf32> -> vector<16x128xf32>
    %c1_174 = arith.constant 1 : index
    %c0_175 = arith.constant 0 : index
    %c0_176 = arith.constant 0 : index
    %414 = vector.load %arg15[%c1_174, %c0_175, %c0_176] : memref<2x1x128xf32, #tpu.memory_space<vmem>>, vector<1x1x128xf32>
    %415 = vector.shape_cast %414 : vector<1x1x128xf32> to vector<1x128xf32>
    %416 = vector.broadcast %415 : vector<1x128xf32> to vector<16x128xf32>
    %417 = arith.addf %413, %416 : vector<16x128xf32>
    %cst_177 = arith.constant 0.000000e+00 : f32
    %418 = vector.broadcast %cst_177 : f32 to vector<16x128xf32>
    %419 = arith.maximumf %417, %418 : vector<16x128xf32>
    %420 = arith.truncf %419 : vector<16x128xf32> to vector<16x128xbf16>
    %c1_178 = arith.constant 1 : index
    %c0_179 = arith.constant 0 : index
    %c0_180 = arith.constant 0 : index
    %421 = vector.load %arg16[%c1_178, %c0_179, %c0_180] : memref<2x128x32xbf16, #tpu.memory_space<vmem>>, vector<1x128x32xbf16>
    %422 = vector.shape_cast %421 : vector<1x128x32xbf16> to vector<128x32xbf16>
    %cst_181 = arith.constant dense<0.000000e+00> : vector<16x32xf32>
    %423 = tpu.matmul %420, %422, %cst_181 {dimension_numbers = #tpu.dot_dimension_numbers<[1], [0], [0], [1], [0, 0, 1, 1], [], []>} : vector<16x128xbf16>, vector<128x32xbf16>, vector<16x32xf32> -> vector<16x32xf32>
    %c1_182 = arith.constant 1 : index
    %c0_183 = arith.constant 0 : index
    %c0_184 = arith.constant 0 : index
    %424 = vector.load %arg17[%c1_182, %c0_183, %c0_184] : memref<2x1x32xf32, #tpu.memory_space<vmem>>, vector<1x1x32xf32>
    %425 = vector.shape_cast %424 : vector<1x1x32xf32> to vector<1x32xf32>
    %426 = vector.broadcast %425 : vector<1x32xf32> to vector<16x32xf32>
    %427 = arith.addf %423, %426 : vector<16x32xf32>
    %428 = arith.addf %383, %427 : vector<16x32xf32>
    %429 = vector.shape_cast %428 : vector<16x32xf32> to vector<2x8x32xf32>
    %c0_185 = arith.constant 0 : index
    %c0_186 = arith.constant 0 : index
    %430 = vector.load %arg18[%c0_185, %c0_186] : memref<1x32xf32, #tpu.memory_space<vmem>>, vector<1x32xf32>
    %431 = vector.shape_cast %430 : vector<1x32xf32> to vector<1x1x32xf32>
    %432 = vector.broadcast %431 : vector<1x1x32xf32> to vector<2x8x32xf32>
    %433 = arith.mulf %429, %432 : vector<2x8x32xf32>
    %cst_187 = arith.constant dense<0.000000e+00> : vector<2x8xf32>
    %434 = vector.multi_reduction <add>, %433, %cst_187 [2] : vector<2x8x32xf32> to vector<2x8xf32>
    %c0_188 = arith.constant 0 : index
    %c0_189 = arith.constant 0 : index
    %435 = vector.load %arg19[%c0_188, %c0_189] : memref<1x1xf32, #tpu.memory_space<vmem>>, vector<1x1xf32>
    %436 = vector.broadcast %435 : vector<1x1xf32> to vector<2x8xf32>
    %437 = arith.addf %434, %436 : vector<2x8xf32>
    %438 = arith.mulf %7, %437 : vector<2x8xf32>
    %439 = arith.subf %1, %438 : vector<2x8xf32>
    %440 = math.rsqrt %3 : vector<2x8xf32>
    %441 = arith.mulf %439, %440 : vector<2x8xf32>
    %442 = vector.shape_cast %441 : vector<2x8xf32> to vector<2x1x8xf32>
    %c0_190 = arith.constant 0 : index
    %c0_191 = arith.constant 0 : index
    %c0_192 = arith.constant 0 : index
    %443 = vector.load %arg20[%c0_190, %c0_191, %c0_192] : memref<2x1x8xf32, #tpu.memory_space<vmem>>, vector<2x1x8xf32>
    tpu.vector_store %arg20[%c0_190, %c0_191, %c0_192], %442 {strides = array<i32>} : memref<2x1x8xf32, #tpu.memory_space<vmem>>, vector<2x1x8xf32>,
    return
  }
  func.func @transform_0(%arg0: i32) -> (i32, i32, i32) {
    %c0_i32 = arith.constant 0 : i32
    %c0_i32_0 = arith.constant 0 : i32
    %c0_i32_1 = arith.constant 0 : i32
    return %arg0, %c0_i32, %c0_i32_0 : i32, i32, i32
  }
  func.func @transform_1(%arg0: i32) -> (i32, i32, i32) {
    %c0_i32 = arith.constant 0 : i32
    %c0_i32_0 = arith.constant 0 : i32
    %c0_i32_1 = arith.constant 0 : i32
    return %arg0, %c0_i32, %c0_i32_0 : i32, i32, i32
  }
  func.func @transform_2(%arg0: i32) -> (i32, i32) {
    %c0_i32 = arith.constant 0 : i32
    %c0_i32_0 = arith.constant 0 : i32
    %c0_i32_1 = arith.constant 0 : i32
    return %c0_i32, %c0_i32_0 : i32, i32
  }
  func.func @transform_3(%arg0: i32) -> (i32, i32) {
    %c0_i32 = arith.constant 0 : i32
    %c0_i32_0 = arith.constant 0 : i32
    %c0_i32_1 = arith.constant 0 : i32
    return %c0_i32, %c0_i32_0 : i32, i32
  }
  func.func @transform_4(%arg0: i32) -> (i32, i32) {
    %c0_i32 = arith.constant 0 : i32
    %c0_i32_0 = arith.constant 0 : i32
    %c0_i32_1 = arith.constant 0 : i32
    return %c0_i32, %c0_i32_0 : i32, i32
  }
  func.func @transform_5(%arg0: i32) -> (i32, i32, i32) {
    %c0_i32 = arith.constant 0 : i32
    %c0_i32_0 = arith.constant 0 : i32
    %c0_i32_1 = arith.constant 0 : i32
    %c0_i32_2 = arith.constant 0 : i32
    return %c0_i32, %c0_i32_0, %c0_i32_1 : i32, i32, i32
  }
  func.func @transform_6(%arg0: i32) -> (i32, i32, i32) {
    %c0_i32 = arith.constant 0 : i32
    %c0_i32_0 = arith.constant 0 : i32
    %c0_i32_1 = arith.constant 0 : i32
    %c0_i32_2 = arith.constant 0 : i32
    return %c0_i32, %c0_i32_0, %c0_i32_1 : i32, i32, i32
  }
  func.func @transform_7(%arg0: i32) -> (i32, i32, i32, i32) {
    %c0_i32 = arith.constant 0 : i32
    %c0_i32_0 = arith.constant 0 : i32
    %c0_i32_1 = arith.constant 0 : i32
    %c0_i32_2 = arith.constant 0 : i32
    %c0_i32_3 = arith.constant 0 : i32
    return %c0_i32, %c0_i32_0, %c0_i32_1, %c0_i32_2 : i32, i32, i32, i32
  }
  func.func @transform_8(%arg0: i32) -> (i32, i32, i32) {
    %c0_i32 = arith.constant 0 : i32
    %c0_i32_0 = arith.constant 0 : i32
    %c0_i32_1 = arith.constant 0 : i32
    %c0_i32_2 = arith.constant 0 : i32
    return %c0_i32, %c0_i32_0, %c0_i32_1 : i32, i32, i32
  }
  func.func @transform_9(%arg0: i32) -> (i32, i32, i32) {
    %c0_i32 = arith.constant 0 : i32
    %c0_i32_0 = arith.constant 0 : i32
    %c0_i32_1 = arith.constant 0 : i32
    %c0_i32_2 = arith.constant 0 : i32
    return %c0_i32, %c0_i32_0, %c0_i32_1 : i32, i32, i32
  }
  func.func @transform_10(%arg0: i32) -> (i32, i32, i32) {
    %c0_i32 = arith.constant 0 : i32
    %c0_i32_0 = arith.constant 0 : i32
    %c0_i32_1 = arith.constant 0 : i32
    %c0_i32_2 = arith.constant 0 : i32
    return %c0_i32, %c0_i32_0, %c0_i32_1 : i32, i32, i32
  }
  func.func @transform_11(%arg0: i32) -> (i32, i32, i32) {
    %c0_i32 = arith.constant 0 : i32
    %c0_i32_0 = arith.constant 0 : i32
    %c0_i32_1 = arith.constant 0 : i32
    %c0_i32_2 = arith.constant 0 : i32
    return %c0_i32, %c0_i32_0, %c0_i32_1 : i32, i32, i32
  }
  func.func @transform_12(%arg0: i32) -> (i32, i32, i32) {
    %c0_i32 = arith.constant 0 : i32
    %c0_i32_0 = arith.constant 0 : i32
    %c0_i32_1 = arith.constant 0 : i32
    %c0_i32_2 = arith.constant 0 : i32
    return %c0_i32, %c0_i32_0, %c0_i32_1 : i32, i32, i32
  }
  func.func @transform_13(%arg0: i32) -> (i32, i32, i32) {
    %c0_i32 = arith.constant 0 : i32
    %c0_i32_0 = arith.constant 0 : i32
    %c0_i32_1 = arith.constant 0 : i32
    %c0_i32_2 = arith.constant 0 : i32
    return %c0_i32, %c0_i32_0, %c0_i32_1 : i32, i32, i32
  }
  func.func @transform_14(%arg0: i32) -> (i32, i32, i32) {
    %c0_i32 = arith.constant 0 : i32
    %c0_i32_0 = arith.constant 0 : i32
    %c0_i32_1 = arith.constant 0 : i32
    %c0_i32_2 = arith.constant 0 : i32
    return %c0_i32, %c0_i32_0, %c0_i32_1 : i32, i32, i32
  }
  func.func @transform_15(%arg0: i32) -> (i32, i32, i32) {
    %c0_i32 = arith.constant 0 : i32
    %c0_i32_0 = arith.constant 0 : i32
    %c0_i32_1 = arith.constant 0 : i32
    %c0_i32_2 = arith.constant 0 : i32
    return %c0_i32, %c0_i32_0, %c0_i32_1 : i32, i32, i32
  }
  func.func @transform_16(%arg0: i32) -> (i32, i32, i32) {
    %c0_i32 = arith.constant 0 : i32
    %c0_i32_0 = arith.constant 0 : i32
    %c0_i32_1 = arith.constant 0 : i32
    %c0_i32_2 = arith.constant 0 : i32
    return %c0_i32, %c0_i32_0, %c0_i32_1 : i32, i32, i32
  }
  func.func @transform_17(%arg0: i32) -> (i32, i32) {
    %c0_i32 = arith.constant 0 : i32
    %c0_i32_0 = arith.constant 0 : i32
    %c0_i32_1 = arith.constant 0 : i32
    return %c0_i32, %c0_i32_0 : i32, i32
  }
  func.func @transform_18(%arg0: i32) -> (i32, i32) {
    %c0_i32 = arith.constant 0 : i32
    %c0_i32_0 = arith.constant 0 : i32
    %c0_i32_1 = arith.constant 0 : i32
    return %c0_i32, %c0_i32_0 : i32, i32
  }
  func.func @transform_19(%arg0: i32) -> (i32, i32, i32) {
    %c0_i32 = arith.constant 0 : i32
    %c0_i32_0 = arith.constant 0 : i32
    %c0_i32_1 = arith.constant 0 : i32
    return %arg0, %c0_i32, %c0_i32_0 : i32, i32, i32
  }
}

</mosaic_0001>

<bundles_post_ra>
// kernel: tpu_custom_call.1
= control target key start
LH: loop header
LB: loop body
LE: loop exit
PB: predicated region body
PF: predicated region fallthrough
CT: control target
= control target key end

     0   :  { %s3370_s0 = inlined_call_operand.vmem [shape: f32[2,1,8], index: 0, kind: input, shape index: {}]   ;;  %s3371_s1 = inlined_call_operand.vmem [shape: f32[2,1,8], index: 1, kind: input, shape index: {}]   ;;  %s3372_s2 = inlined_call_operand.vmem [shape: f32[3,32], index: 2, kind: input, shape index: {}]   ;;  %s3373_s3 = inlined_call_operand.vmem [shape: f32[1,32], index: 3, kind: input, shape index: {}]   ;;  %s3374_s4 = inlined_call_operand.vmem [shape: f32[8,32], index: 4, kind: input, shape index: {}]   ;;  %s3375_s5 = inlined_call_operand.hbm [shape: f32[2,1,32], index: 5, kind: input, shape index: {}]   ;;  %s3376_s6 = inlined_call_operand.hbm [shape: f32[2,1,32], index: 6, kind: input, shape index: {}]   ;;  %s3377_s7 = inlined_call_operand.vmem [shape: bf16[2,3,32,32], index: 7, kind: input, shape index: {}]   ;;  %s3378_s8 = inlined_call_operand.vmem [shape: f32[2,3,32], index: 8, kind: input, shape index: {}]   ;;  %s3379_s9 = inlined_call_operand.vmem [shape: bf16[2,32,32], index: 9, kind: input, shape index: {}]   ;;  %s3380_s10 = inlined_call_operand.vmem [shape: f32[2,1,32], index: 10, kind: input, shape index: {}]   ;;  %s3381_s11 = inlined_call_operand.hbm [shape: f32[2,1,32], index: 11, kind: input, shape index: {}]   ;;  %s3382_s12 = inlined_call_operand.vmem [shape: f32[2,1,32], index: 12, kind: input, shape index: {}]   ;;  %s3383_s13 = inlined_call_operand.vmem [shape: bf16[2,32,128], index: 13, kind: input, shape index: {}]   ;;  %s3384_s14 = inlined_call_operand.vmem [shape: f32[2,1,128], index: 14, kind: input, shape index: {}]   ;;  %s3385_s15 = inlined_call_operand.vmem [shape: bf16[2,128,32], index: 15, kind: input, shape index: {}]   ;;  %s3386_s16 = inlined_call_operand.vmem [shape: f32[2,1,32], index: 16, kind: input, shape index: {}]   ;;  %s3387_s17 = inlined_call_operand.hbm [shape: f32[1,32], index: 17, kind: input, shape index: {}]   ;;  %s3388_s18 = inlined_call_operand.<no memory space> [shape: f32[1,1], index: 18, kind: input, shape index: {}]   ;;  %s3389_s19 = inlined_call_operand.hbm [shape: f32[2,1,8], index: 19, kind: output, shape index: {}]  }
   0x1   :  { %3392 = sst [smem:[#allocation16_spill]] %s3370_s0  ;;  %v24_v0 = vstv %s3388_s18 }
   0x2   :  { %3393 = sst [smem:[#allocation17_spill]] %s3371_s1  ;;  %25 = vst [vmem:[#allocation2] sm:$0x1] %v24_v0 }
   0x3   :  { %3394 = sst [smem:[#allocation18_spill]] %s3372_s2 }
   0x4   :  { %3395 = sst [smem:[#allocation19_spill]] %s3373_s3 }
   0x5   :  { %26 = vsyncpa [#allocation4], 0 }
   0x6   :  { %27 = vsyncpa [#allocation7], 0 }
   0x7   :  { %28 = vsyncpa [#allocation10], 0 }
   0x8   :  { %29 = vsyncpa [#allocation5], 0  ;;  %s57_s1 = sshll.u32 %s3376_s6, 4  ;;  %s2717_s22 = smov [#allocation6]   ;;  %s58_s1 = int_to_ptr.hbm [resolvable:$true] %s57_s1 }
   0x9   :  { %s59_s2 = sshll.u32 %s2717_s22, 4  ;;  %s44_s25 = sshll.u32 %s3375_s5, 4  ;;  %s60_s2 = int_to_ptr.vmem [resolvable:$true] %s59_s2  ;;  %s45_s25 = int_to_ptr.hbm [resolvable:$true] %s44_s25 }
   0xa   :  { %s2718_s3 = smov 16   ;;  %s2719_s26 = smov 1  }
   0xb   :  { %65 = dma.hbm_to_vmem [thread:$0]  %s58_s1, 32, %s60_s2, [#allocation7], %s2718_s3, %s2718_s3, %s2719_s26  }
   0xc   :  { %s2720_s18 = smov [#allocation3]   ;;  %s78_s6 = sshll.u32 %s3381_s11, 4  ;;  %s79_s6 = int_to_ptr.hbm [resolvable:$true] %s78_s6 }
   0xd   :  { %s46_s27 = sshll.u32 %s2720_s18, 4  ;;  %s102_s30 = sshll.u32 %s3387_s17, 4  ;;  %s47_s27 = int_to_ptr.vmem [resolvable:$true] %s46_s27  ;;  %s103_s30 = int_to_ptr.hbm [resolvable:$true] %s102_s30 }
   0xe   :  { %52 = dma.hbm_to_vmem [thread:$0]  %s45_s25, 32, %s47_s27, [#allocation4], %s2718_s3, %s2718_s3, %s2719_s26  }
   0xf   :  { %s2721_s20 = smov [#allocation8]   ;;  %s2722_s1 = smov [#allocation9]  }
  0x10   :  { %s80_s21 = sshll.u32 %s2721_s20, 4  ;;  %s104_s11 = sshll.u32 %s2722_s1, 4  ;;  %s81_s21 = int_to_ptr.vmem [resolvable:$true] %s80_s21  ;;  %s105_s11 = int_to_ptr.vmem [resolvable:$true] %s104_s11 }
  0x11   :  { %86 = dma.hbm_to_vmem [thread:$0]  %s79_s6, 32, %s81_s21, [#allocation7], %s2718_s3, %s2718_s3, %s2719_s26  }
  0x12   :  { %107 = dma.hbm_to_vmem [thread:$0]  %s103_s30, 16, %s105_s11, [#allocation10]  }
  0x13   :  { %2709 = dma.done.wait [#allocation4], 32  }
  0x14   :  { %2710 = vsyncadd [#allocation4], 4294967264 }
  0x15   :  { %2711 = dma.done.wait [#allocation7], 64  }
  0x16   :  { %2712 = vsyncadd [#allocation7], 4294967232 }
  0x17   :  { %2713 = dma.done.wait [#allocation10], 16  }
  0x18   :  { %2714 = vsyncadd [#allocation10], 4294967280  ;;  %v183_v1 = vlaneseq  ;;  %s3396_s2 = sld [smem:[#allocation17_spill]]  ;;  %vm248_vm8 = vcmask 261120   ;;  %s2724_s11 = smov 120  }
  0x19   :  { %s3397_s25 = sld [smem:[#allocation16_spill]]  ;;  %s2725_s22 = smov 112  }
  0x1a   :  { %v184_v2 = vshrl.u32 %v183_v1, 7  ;;  %s3398_s0 = sld [smem:[#allocation18_spill]]  ;;  %s2726_s23 = smov 104  }
  0x1b   :  { %s3399_s21 = sld [smem:[#allocation19_spill]]  ;;  %s2727_s24 = smov 8  }
  0x1c   :  { %2437 = vset.pattern.permute.xlu0 %v184_v2  ;;  %2438 = vset.pattern.permute.xlu1 %v184_v2  ;;  %s2728_s18 = smov 24  }
  0x1d   :  { %2439 = vset.pattern.permute.xlu2 %v184_v2 }
  0x1e   :  { %v129_v3 = vld [vmem:[%s3396_s2] sm:$0x1]  ;;  %v130_v5 = vld [vmem:[%s3396_s2 + $0x1] sm:$0x1] }
  0x1f   :  { %v2472_v4 = vld [vmem:[%s3397_s25] ss:$0 sm:$0xff]  ;;  %2497 = vrsqrt.f32 %v129_v3  ;;  %v155_v6 = vsub.f32 1.0, %v129_v3  ;;  %v156_v7 = vsub.f32 1.0, %v130_v5  ;;  %v2473_v9 = vld [vmem:[%s3397_s25 + $0x1] ss:$0 sm:$0xff] }
  0x20   :  { %2499 = vrsqrt.f32 %v130_v5  ;;  %vm138_vm0 = vcmp.eq.f32.partialorder %v129_v3, inf  ;;  %v141_v27 = vand.u32 2147483648, %v129_v3  ;;  %vm140_vm1 = vcmp.eq.f32.partialorder %v129_v3, 0.0  ;;  %v181_v53 = vld [vmem:[%s3398_s0] sm:$0x7] }
  0x21   :  { %2501 = vrsqrt.f32 %v155_v6  ;;  %vm150_vm2 = vcmp.eq.f32.partialorder %v130_v5, inf  ;;  %vm164_vm3 = vcmp.eq.f32.partialorder %v155_v6, inf  ;;  %v167_v35 = vand.u32 2147483648, %v155_v6  ;;  %v2474_v63 = vld [vmem:[%s3399_s21] ss:$0 sm:$0xff] }
  0x22   :  { %2503 = vrsqrt.f32 %v156_v7  ;;  %v153_v38 = vand.u32 2147483648, %v130_v5  ;;  %vm166_vm4 = vcmp.eq.f32.partialorder %v155_v6, 0.0  ;;  %vm152_vm5 = vcmp.eq.f32.partialorder %v130_v5, 0.0 }
  0x23   :  { %vm176_vm6 = vcmp.eq.f32.partialorder %v156_v7, inf  ;;  %v179_v46 = vand.u32 2147483648, %v156_v7  ;;  %vm178_vm7 = vcmp.eq.f32.partialorder %v156_v7, 0.0  ;;  %v196_v54 = vperm.slane %v181_v53, 0 }
  0x24   :  { %187 = vperm.xlu0 %2437, %v2472_v4   ;;  %v232_v56 = vperm.slane %v181_v53, 2  ;;  %v213_v57 = vperm.slane %v181_v53, 1  ;;  %v243_v4 = vld [vmem:[%s3374_s4] sm:$0xff] }
  0x25   :  { %v2865_v8 = vpop.eup %2497 }
  0x26   :  { %v132_v10 = vmul.f32 %v2865_v8, %v129_v3  ;;  %v2871_v11 = vpop.eup %2499 }
  0x27   :  { %v2502_v12 = vpop.eup %2501  ;;  %v144_v14 = vmul.f32 %v2871_v11, %v130_v5 }
  0x28   :  { %v133_v13 = vmul.f32 %v2865_v8, %v132_v10  ;;  %v158_v15 = vmul.f32 %v2502_v12, %v155_v6  ;;  %v2504_v18 = vpop.eup %2503 }
  0x29   :  { %v145_v17 = vmul.f32 %v2871_v11, %v144_v14  ;;  %v170_v22 = vmul.f32 %v2504_v18, %v156_v7 }
  0x2a   :  { %v134_v16 = vmul.f32 0.5, %v133_v13  ;;  %v159_v19 = vmul.f32 %v2502_v12, %v158_v15 }
  0x2b   :  { %v146_v21 = vmul.f32 0.5, %v145_v17  ;;  %v171_v26 = vmul.f32 %v2504_v18, %v170_v22 }
  0x2c   :  { %194 = vperm.xlu0 %2437, %v2473_v9   ;;  %v135_v20 = vsub.f32 1.5, %v134_v16  ;;  %v160_v23 = vmul.f32 0.5, %v159_v19 }
  0x2d   :  { %v147_v25 = vsub.f32 1.5, %v146_v21  ;;  %v172_v31 = vmul.f32 0.5, %v171_v26 }
  0x2e   :  { %v2877_v24 = vmul.f32 %v2865_v8, %v135_v20  ;;  %v161_v28 = vsub.f32 1.5, %v160_v23  ;;  %v2723_v20 = vmov 32.0  }
  0x2f   :  { %v2881_v30 = vmul.f32 %v2871_v11, %v147_v25  ;;  %v173_v36 = vsub.f32 1.5, %v172_v31  ;;  %2505 = vrcp.f32 %v2723_v20 }
  0x30   :  { %v137_v29 = vmul.f32 %v2877_v24, %v129_v3  ;;  %v162_v32 = vmul.f32 %v2502_v12, %v161_v28 }
  0x31   :  { %v149_v34 = vmul.f32 %v2881_v30, %v130_v5  ;;  %v174_v42 = vmul.f32 %v2504_v18, %v173_v36 }
  0x32   :  { %v139_v33 = vsel %vm138_vm0, %v129_v3, %v137_v29  ;;  %v163_v39 = vmul.f32 %v162_v32, %v155_v6  ;;  %vm486_vm0 = vcmask 1043456  }
  0x33   :  { %v142_v37 = vsel %vm140_vm1, %v141_v27, %v139_v33  ;;  %v151_v41 = vsel %vm150_vm2, %v130_v5, %v149_v34  ;;  %v175_v45 = vmul.f32 %v174_v42, %v156_v7  ;;  %v2387_v42 = vld [vmem:[%s3377_s7] sm:$0xff]  ;;  %vm418_vm1 = vcmask 64512  }
  0x34   :  { %v199_v40 = vperm.slane %v142_v37, 0  ;;  %v165_v43 = vsel %vm164_vm3, %v155_v6, %v163_v39  ;;  %v154_v47 = vsel %vm152_vm5, %v153_v38, %v151_v41  ;;  %v2388_v39 = vld [vmem:[%s3377_s7 + $0x8] sm:$0xff]  ;;  %vm908_vm2 = vcmask 130048  }
  0x35   :  { %v2884_v44 = vsel %vm166_vm4, %v167_v35, %v165_v43  ;;  %v177_v49 = vsel %vm176_vm6, %v156_v7, %v175_v45  ;;  %v206_v50 = vperm.slane %v154_v47, 0  ;;  %v2506_v21 = vpop.eup %2505  ;;  %338 = vmatpush.bf16.msra.mxu1 %v2388_v39  ;;  %v2391_v43 = vld [vmem:[%s3377_s7 + $0x20] sm:$0xff]  ;;  %v2390_v47 = vld [vmem:[%s3377_s7 + $0x18] sm:$0xff]  ;;  %vm911_vm3 = vcmask 195584  }
  0x36   :  { %204 = vperm.xlu1 %2438, %v199_v40   ;;  %v218_v48 = vperm.slane %v2884_v44, 0  ;;  %v2887_v51 = vsel %vm178_vm7, %v179_v46, %v177_v49  ;;  %v256_v22 = vmul.f32 32.0, %v2506_v21  ;;  %vm260_vm9 = vweird.f32 %v2506_v21  ;;  %v2392_v40 = vld [vmem:[%s3377_s7 + $0x28] sm:$0xff] }
  0x37   :  { %v225_v52 = vperm.slane %v2887_v51, 0  ;;  %404 = vmatpush.bf16.msra.mxu2 %v2392_v40 }
  0x38   :  { %223 = vperm.xlu2 %2439, %v218_v48   ;;  %v257_v23 = vsub.f32 1.0, %v256_v22 }
  0x39   :  { %339 = vmatpush.bf16.msra.mxu1 %v2387_v42 }
  0x3a   :  { %v258_v25 = vmul.f32 %v2506_v21, %v257_v23 }
  0x3b   :  { %405 = vmatpush.bf16.msra.mxu2 %v2391_v43 }
  0x3c   :  { %v259_v26 = vadd.f32 %v2506_v21, %v258_v25 }
  0x3d   :  { %371 = vmatpush.bf16.msrb.mxu1 %v2390_v47 }
  0x3e   :  { %211 = vperm.xlu1 %2438, %v206_v50   ;;  %v2907_v27 = vsel %vm260_vm9, %v2506_v21, %v259_v26  ;;  %v2389_v50 = vld [vmem:[%s3377_s7 + $0x10] sm:$0xff]  ;;  %v2478_v21 = vld [vmem:[%s3378_s8 + $0x2] ss:$0 sm:$0xff] }
  0x40   :  { %230 = vperm.xlu2 %2439, %v225_v52  }
  0x41   :  { %372 = vmatpush.bf16.msrb.mxu1 %v2389_v50 }
  0x92   :  { %v224_v58 = vpop.permute.xlu2 %223 }
  0x93   :  { %v233_v61 = vmul.f32 %v232_v56, %v224_v58 }
  0x96   :  { %v188_v55 = vpop.permute.xlu0 %187 }
  0x97   :  { %v197_v59 = vmul.f32 %v196_v54, %v188_v55 }
  0x9a   :  { %v231_v6 = vpop.permute.xlu2 %230 }
  0x9b   :  { %v234_v13 = vmul.f32 %v232_v56, %v231_v6 }
  0x9e   :  { %v195_v3 = vpop.permute.xlu0 %194 }
  0x9f   :  { %v198_v9 = vmul.f32 %v196_v54, %v195_v3  ;;  %v2475_v3 = vld [vmem:[#allocation3] ss:$0 sm:$0xff] }
  0xa8   :  { %v205_v60 = vpop.permute.xlu1 %204 }
  0xa9   :  { %v214_v62 = vmul.f32 %v213_v57, %v205_v60 }
  0xab   :  { %v216_v0 = vadd.f32 %v214_v62, %v197_v59 }
  0xad   :  { %v235_v2 = vadd.f32 %v233_v61, %v216_v0 }
  0xaf   :  { %v241_v5 = vadd.f32 %v2474_v63, %v235_v2 }
  0xb0   :  { %v212_v7 = vpop.permute.xlu1 %211 }
  0xb1   :  { %v215_v10 = vmul.f32 %v213_v57, %v212_v7  ;;  %v2899_v12 = vadd.f32 %v243_v4, %v241_v5 }
  0xb3   :  { %v217_v14 = vadd.f32 %v215_v10, %v198_v9  ;;  %v249_v15 = vsel %vm248_vm8, %v2899_v12, 0.0  ;;  %v2476_v9 = vld [vmem:[#allocation6] ss:$0 sm:$0xff] }
  0xb4   :  { %250 = vadd.xlane.f32.xlu0 %v249_v15 }
  0xb5   :  { %v236_v16 = vadd.f32 %v234_v13, %v217_v14 }
  0xb7   :  { %v242_v17 = vadd.f32 %v2474_v63, %v236_v16  ;;  %v2477_v16 = vld [vmem:[%s3378_s8] ss:$0 sm:$0xff] }
  0xb9   :  { %v2903_v18 = vadd.f32 %v243_v4, %v242_v17 }
  0xbb   :  { %v252_v19 = vsel %vm248_vm8, %v2903_v18, 0.0 }
  0xbc   :  { %253 = vadd.xlane.f32.xlu1 %v252_v19 }
 0x127   :  { %v251_v28 = vpop.xlane.xlu0 %250 }
 0x128   :  { %v262_v29 = vmul.f32 %v2907_v27, %v251_v28 }
 0x12a   :  { %v264_v31 = vsub.f32 %v2899_v12, %v262_v29 }
 0x12c   :  { %v266_v32 = vmul.f32 %v264_v31, %v264_v31 }
 0x12e   :  { %v268_v33 = vsel %vm248_vm8, %v266_v32, 0.0  ;;  %v2479_v32 = vld [vmem:[%s3378_s8 + $0x1] ss:$0 sm:$0xff] }
 0x12f   :  { %v254_v34 = vpop.xlane.xlu1 %253  ;;  %269 = vadd.xlane.f32.xlu2 %v268_v33 }
 0x130   :  { %v263_v35 = vmul.f32 %v2907_v27, %v254_v34 }
 0x132   :  { %v265_v36 = vsub.f32 %v2903_v18, %v263_v35 }
 0x134   :  { %v267_v37 = vmul.f32 %v265_v36, %v265_v36 }
 0x136   :  { %v271_v38 = vsel %vm248_vm8, %v267_v37, 0.0 }
 0x137   :  { %272 = vadd.xlane.f32.xlu2 %v271_v38 }
 0x1a2   :  { %v270_v41 = vpop.xlane.xlu2 %269 }
 0x1a3   :  { %v274_v45 = vmul.f32 %v270_v41, %v2907_v27 }
 0x1a5   :  { %v276_v46 = vadd.f32 1e-05, %v274_v45 }
 0x1a7   :  { %2507 = vrsqrt.f32 %v276_v46  ;;  %vm284_vm11 = vweird.f32 %v276_v46 }
 0x1aa   :  { %v273_v48 = vpop.xlane.xlu2 %272 }
 0x1ab   :  { %v275_v49 = vmul.f32 %v273_v48, %v2907_v27 }
 0x1ad   :  { %v2508_v52 = vpop.eup %2507  ;;  %v277_v53 = vadd.f32 1e-05, %v275_v49 }
 0x1ae   :  { %v279_v54 = vmul.f32 %v2508_v52, %v276_v46  ;;  %vm285_vm10 = vweird.f32 %v2508_v52 }
 0x1af   :  { %2509 = vrsqrt.f32 %v277_v53  ;;  %vm286_vm12 = vmor %vm284_vm11, %vm285_vm10  ;;  %vm294_vm14 = vweird.f32 %v277_v53 }
 0x1b0   :  { %v280_v55 = vmul.f32 %v2508_v52, %v279_v54 }
 0x1b2   :  { %v281_v56 = vmul.f32 0.5, %v280_v55 }
 0x1b4   :  { %v282_v57 = vsub.f32 1.5, %v281_v56 }
 0x1b5   :  { %v2510_v58 = vpop.eup %2509 }
 0x1b6   :  { %v283_v59 = vmul.f32 %v2508_v52, %v282_v57  ;;  %v289_v60 = vmul.f32 %v2510_v58, %v277_v53  ;;  %vm295_vm13 = vweird.f32 %v2510_v58 }
 0x1b7   :  { %vm296_vm15 = vmor %vm294_vm14, %vm295_vm13 }
 0x1b8   :  { %v290_v61 = vmul.f32 %v2510_v58, %v289_v60  ;;  %v287_v62 = vsel %vm286_vm12, %v2508_v52, %v283_v59 }
 0x1b9   :  { %v298_v2 = vmul.f32 %v287_v62, %v264_v31 }
 0x1ba   :  { %v291_v63 = vmul.f32 0.5, %v290_v61 }
 0x1bb   :  { %v303_v7 = vmul.f32 %v2475_v3, %v298_v2 }
 0x1bc   :  { %v292_v0 = vsub.f32 1.5, %v291_v63 }
 0x1bd   :  { %v308_v13 = vadd.f32 %v2476_v9, %v303_v7 }
 0x1be   :  { %v293_v4 = vmul.f32 %v2510_v58, %v292_v0 }
 0x1c0   :  { %v297_v5 = vsel %vm296_vm15, %v2510_v58, %v293_v4 }
 0x1c1   :  { %v299_v6 = vmul.f32 %v297_v5, %v265_v36 }
 0x1c3   :  { %v304_v10 = vmul.f32 %v2475_v3, %v299_v6 }
 0x1c5   :  { %v309_v14 = vadd.f32 %v2476_v9, %v304_v10 }
 0x1c7   :  { %v310_v15 = vpack.c.bf16 %v309_v14, %v308_v13 }
 0x1c9   :  { %2158 = vmatmul.msk.bf16.vlgmr.msra.gmra.mxu1 %vm248_vm8, %v310_v15  ;;  %2184 = vmatmul.msk.bf16.vlgmr.msra.gmra.mxu2 %vm248_vm8, %v310_v15 }
 0x1d9   :  { %2171 = vmatmul.msk.bf16.vlgmr.msrb.gmra.mxu1 %vm248_vm8, %v310_v15 }
 0x246   :  { %v341_v17 = vpop.f32.mrf.mxu1 }
 0x247   :  { %v342_v19 = vadd.f32 %v2477_v16, %v341_v17 }
 0x249   :  { %v412_v20 = vpack.c.bf16 %v342_v19, %v342_v19 }
 0x24b   :  { %v523_v22 = vunpack.c.l.b16 %v412_v20 }
 0x24c   :  { %v407_v23 = vpop.f32.mrf.mxu2 }
 0x24d   :  { %v524_v25 = vpack.c.b16 %v523_v22, %v523_v22  ;;  %v408_v26 = vadd.f32 %v2478_v21, %v407_v23 }
 0x24e   :  { %v343_v28 = vpop.f32.mrf.mxu1 }
 0x24f   :  { %v2944_v29 = vpack.c.bf16 %v408_v26, %v408_v26  ;;  %525 = vrot.lane.b32.xlu2 %v524_v25, %s2724_s11  ;;  %v344_v38 = vadd.f32 %v2477_v16, %v343_v28 }
 0x251   :  { %v488_v31 = vsel %vm486_vm0, %v2944_v29, 0  ;;  %v413_v43 = vpack.c.bf16 %v344_v38, %v344_v38 }
 0x252   :  { %497 = vmatpush.bf16.msra.mxu1 %v488_v31 }
 0x253   :  { %v552_v48 = vunpack.c.l.b16 %v413_v43 }
 0x254   :  { %v409_v33 = vpop.f32.mrf.mxu2 }
 0x255   :  { %v410_v34 = vadd.f32 %v2478_v21, %v409_v33  ;;  %v553_v53 = vpack.c.b16 %v552_v48, %v552_v48 }
 0x256   :  { %v374_v35 = vpop.f32.mrf.mxu1 }
 0x257   :  { %v2952_v36 = vpack.c.bf16 %v410_v34, %v410_v34  ;;  %v375_v37 = vadd.f32 %v2479_v32, %v374_v35  ;;  %654 = vrot.lane.b32.xlu2 %v524_v25, %s2725_s22 }
 0x259   :  { %v414_v39 = vpack.c.bf16 %v375_v37, %v375_v37  ;;  %v507_v40 = vsel %vm486_vm0, %v2952_v36, 0 }
 0x25a   :  { %516 = vmatpush.bf16.msrb.mxu2 %v507_v40 }
 0x25b   :  { %v528_v41 = vunpack.c.l.b16 %v414_v39  ;;  %v423_v42 = vsel %vm418_vm1, %v414_v39, 0 }
 0x25c   :  { %432 = vmatpush.bf16.xpose.msra.mxu3 %v423_v42 }
 0x25d   :  { %v529_v45 = vpack.c.b16 %v528_v41, %v528_v41 }
 0x25e   :  { %v376_v46 = vpop.f32.mrf.mxu1 }
 0x25f   :  { %v377_v47 = vadd.f32 %v2479_v32, %v376_v46  ;;  %530 = vrot.lane.b32.xlu0 %v529_v45, %s2724_s11 }
 0x261   :  { %v415_v49 = vpack.c.bf16 %v377_v47, %v377_v47  ;;  %v631_v47 = vunpack.c.l.b16 %v2952_v36 }
 0x263   :  { %v557_v50 = vunpack.c.l.b16 %v415_v49  ;;  %2185 = vmatmul.msk.bf16.vlgmr.msra.gmra.mxu3 %vm418_vm1, %v412_v20  ;;  %v442_v52 = vsel %vm418_vm1, %v415_v49, 0  ;;  %v2997_v49 = vpack.c.b16 %v631_v47, %v631_v47 }
 0x264   :  { %451 = vmatpush.bf16.xpose.msra.mxu0 %v442_v52 }
 0x265   :  { %v558_v54 = vpack.c.b16 %v557_v50, %v557_v50 }
 0x267   :  { %559 = vrot.lane.b32.xlu1 %v558_v54, %s2724_s11  ;;  %554 = vrot.lane.b32.xlu0 %v553_v53, %s2724_s11 }
 0x268   :  { %793 = vrot.lane.b32.xlu2 %v558_v54, %s2726_s23 }
 0x26b   :  { %2186 = vmatmul.msk.bf16.vlgmr.msra.gmra.mxu0 %vm418_vm1, %v413_v43 }
 0x26f   :  { %656 = vrot.lane.b32.xlu1 %v529_v45, %s2725_s22  ;;  %679 = vrot.lane.b32.xlu0 %v558_v54, %s2725_s22 }
 0x277   :  { %677 = vrot.lane.b32.xlu1 %v553_v53, %s2725_s22  ;;  %770 = vrot.lane.b32.xlu0 %v529_v45, %s2726_s23 }
 0x27f   :  { %791 = vrot.lane.b32.xlu0 %v553_v53, %s2726_s23  ;;  %768 = vrot.lane.b32.xlu1 %v524_v25, %s2726_s23 }
 0x2a9   :  { %v526_v55 = vpop.permute.xlu2 %525 }
 0x2b1   :  { %v655_v58 = vpop.permute.xlu2 %654 }
 0x2c2   :  { %v794_v62 = vpop.permute.xlu2 %793 }
 0x2c3   :  { %v799_v4 = vsel %vm418_vm1, %v794_v62, 0 }
 0x2d1   :  { %v531_v56 = vpop.permute.xlu0 %530 }
 0x2d2   :  { %v536_v57 = vsel %vm418_vm1, %v531_v56, 0 }
 0x2d3   :  { %545 = vmatpush.bf16.xpose.msrb.mxu3 %v536_v57 }
 0x2d9   :  { %v560_v59 = vpop.permute.xlu1 %559  ;;  %v555_v60 = vpop.permute.xlu0 %554 }
 0x2da   :  { %2189 = vmatmul.msk.bf16.vlgmr.msrb.gmra.mxu3 %vm418_vm1, %v526_v55  ;;  %v565_v61 = vsel %vm418_vm1, %v560_v59, 0 }
 0x2db   :  { %574 = vmatpush.bf16.xpose.msrb.mxu0 %v565_v61 }
 0x2e1   :  { %v657_v63 = vpop.permute.xlu1 %656  ;;  %v680_v0 = vpop.permute.xlu0 %679 }
 0x2e2   :  { %v662_v2 = vsel %vm418_vm1, %v657_v63, 0  ;;  %v685_v3 = vsel %vm418_vm1, %v680_v0, 0  ;;  %2190 = vmatmul.msk.bf16.vlgmr.msrb.gmra.mxu0 %vm418_vm1, %v555_v60  ;;  %v607_v0 = vunpack.c.l.b16 %v2944_v29 }
 0x2e3   :  { %671 = vmatpush.bf16.xpose.msra.mxu3 %v662_v2  ;;  %694 = vmatpush.bf16.xpose.msra.mxu0 %v685_v3 }
 0x2e4   :  { %v608_v2 = vpack.c.b16 %v607_v0, %v607_v0 }
 0x2e6   :  { %v434_v5 = vpop.f32.mrf.mxu3 }
 0x2e7   :  { %v457_v6 = vmul.f32 0.35355338, %v434_v5 }
 0x2e8   :  { %v453_v7 = vpop.f32.mrf.mxu0 }
 0x2e9   :  { %v458_v9 = vmul.f32 0.35355338, %v453_v7  ;;  %v771_v10 = vpop.permute.xlu0 %770  ;;  %v459_v13 = vsel %vm418_vm1, %v457_v6, -inf  ;;  %v678_v17 = vpop.permute.xlu1 %677 }
 0x2ea   :  { %v776_v14 = vsel %vm418_vm1, %v771_v10, 0  ;;  %2193 = vmatmul.msk.bf16.vlgmr.msra.gmra.mxu3 %vm418_vm1, %v655_v58  ;;  %460 = vmax.xlane.f32.xlu1 %v459_v13 }
 0x2eb   :  { %808 = vmatpush.bf16.xpose.msrb.mxu0 %v799_v4  ;;  %785 = vmatpush.bf16.xpose.msrb.mxu3 %v776_v14  ;;  %v462_v15 = vsel %vm418_vm1, %v458_v9, -inf }
 0x2ec   :  { %463 = vmax.xlane.f32.xlu2 %v462_v15 }
 0x2ee   :  { %v436_v16 = vpop.f32.mrf.mxu3 }
 0x2f0   :  { %v455_v19 = vpop.f32.mrf.mxu0 }
 0x2f1   :  { %v769_v20 = vpop.permute.xlu1 %768  ;;  %v792_v21 = vpop.permute.xlu0 %791 }
 0x2f2   :  { %2194 = vmatmul.msk.bf16.vlgmr.msra.gmra.mxu0 %vm418_vm1, %v678_v17 }
 0x2fa   :  { %2197 = vmatmul.msk.bf16.vlgmr.msrb.gmra.mxu3 %vm418_vm1, %v769_v20 }
 0x302   :  { %2198 = vmatmul.msk.bf16.vlgmr.msrb.gmra.mxu0 %vm418_vm1, %v792_v21 }
 0x35d   :  { %v547_v22 = vpop.f32.mrf.mxu3  ;;  %v461_v58 = vpop.xlane.xlu1 %460 }
 0x35e   :  { %v580_v23 = vmul.f32 0.35355338, %v547_v22  ;;  %v465_v59 = vsub.f32 %v457_v6, %v461_v58 }
 0x35f   :  { %v576_v25 = vpop.f32.mrf.mxu0  ;;  %v464_v26 = vpop.xlane.xlu2 %463 }
 0x360   :  { %v581_v28 = vmul.f32 0.35355338, %v576_v25  ;;  %v466_v31 = vsub.f32 %v458_v9, %v464_v26  ;;  %v582_v32 = vsel %vm418_vm1, %v580_v23, -inf  ;;  %v467_v60 = vmul.f32 1.442695, %v465_v59 }
 0x361   :  { %583 = vmax.xlane.f32.xlu2 %v582_v32 }
 0x362   :  { %v469_v33 = vmul.f32 1.442695, %v466_v31  ;;  %v585_v34 = vsel %vm418_vm1, %v581_v28, -inf }
 0x363   :  { %586 = vmax.xlane.f32.xlu0 %v585_v34 }
 0x364   :  { %2511 = vpow2.f32 %v469_v33 }
 0x365   :  { %v549_v35 = vpop.f32.mrf.mxu3  ;;  %2513 = vpow2.f32 %v467_v60 }
 0x367   :  { %v578_v37 = vpop.f32.mrf.mxu0 }
 0x36a   :  { %v2512_v38 = vpop.eup %2511 }
 0x36b   :  { %v474_v39 = vsel %vm418_vm1, %v2512_v38, 0.0  ;;  %v2514_v36 = vpop.eup %2513 }
 0x36c   :  { %475 = vadd.xlane.f32.xlu1 %v474_v39  ;;  %v471_v61 = vsel %vm418_vm1, %v2514_v36, 0.0 }
 0x36d   :  { %v673_v40 = vpop.f32.mrf.mxu3 }
 0x36e   :  { %v2988_v41 = vmul.f32 0.35355338, %v673_v40 }
 0x36f   :  { %v696_v42 = vpop.f32.mrf.mxu0 }
 0x370   :  { %v2990_v43 = vmul.f32 0.35355338, %v696_v42  ;;  %v702_v45 = vsel %vm418_vm1, %v2988_v41, -inf }
 0x371   :  { %703 = vmax.xlane.f32.xlu0 %v702_v45 }
 0x372   :  { %v705_v46 = vsel %vm418_vm1, %v2990_v43, -inf }
 0x374   :  { %706 = vmax.xlane.f32.xlu1 %v705_v46 }
 0x375   :  { %v675_v48 = vpop.f32.mrf.mxu3 }
 0x377   :  { %v698_v50 = vpop.f32.mrf.mxu0 }
 0x379   :  { %633 = vrot.lane.b32.xlu2 %v2997_v49, %s2724_s11 }
 0x37d   :  { %v787_v52 = vpop.f32.mrf.mxu3 }
 0x37e   :  { %v814_v53 = vmul.f32 0.35355338, %v787_v52 }
 0x37f   :  { %v810_v54 = vpop.f32.mrf.mxu0 }
 0x380   :  { %v816_v55 = vsel %vm418_vm1, %v814_v53, -inf  ;;  %v815_v62 = vmul.f32 0.35355338, %v810_v54 }
 0x381   :  { %817 = vmax.xlane.f32.xlu0 %v816_v55 }
 0x382   :  { %v819_v63 = vsel %vm418_vm1, %v815_v62, -inf }
 0x385   :  { %v789_v56 = vpop.f32.mrf.mxu3 }
 0x387   :  { %v812_v57 = vpop.f32.mrf.mxu0 }
 0x3a2   :  { %472 = vadd.xlane.f32.xlu2 %v471_v61 }
 0x3aa   :  { %820 = vmax.xlane.f32.xlu2 %v819_v63 }
 0x3c2   :  { %726 = vrot.lane.b32.xlu2 %v608_v2, %s2725_s22 }
 0x3d4   :  { %v584_v3 = vpop.xlane.xlu2 %583 }
 0x3d5   :  { %v588_v4 = vsub.f32 %v580_v23, %v584_v3 }
 0x3d6   :  { %v587_v5 = vpop.xlane.xlu0 %586 }
 0x3d7   :  { %v590_v7 = vmul.f32 1.442695, %v588_v4  ;;  %v589_v6 = vsub.f32 %v581_v28, %v587_v5 }
 0x3d9   :  { %2515 = vpow2.f32 %v590_v7  ;;  %v592_v9 = vmul.f32 1.442695, %v589_v6 }
 0x3db   :  { %2517 = vpow2.f32 %v592_v9 }
 0x3dc   :  { %v634_v10 = vpop.permute.xlu2 %633 }
 0x3dd   :  { %v639_v13 = vsel %vm486_vm0, %v634_v10, 0 }
 0x3de   :  { %648 = vmatpush.bf16.msra.mxu2 %v639_v13 }
 0x3df   :  { %v3007_v14 = vpop.eup %2515  ;;  %v476_v15 = vpop.xlane.xlu1 %475 }
 0x3e0   :  { %2519 = vrcp.f32 %v476_v15  ;;  %v594_v29 = vsel %vm418_vm1, %v3007_v14, 0.0 }
 0x3e1   :  { %v2518_v16 = vpop.eup %2517  ;;  %595 = vadd.xlane.f32.xlu0 %v594_v29 }
 0x3e2   :  { %v597_v17 = vsel %vm418_vm1, %v2518_v16, 0.0 }
 0x3e3   :  { %598 = vadd.xlane.f32.xlu1 %v597_v17 }
 0x3e4   :  { %v704_v22 = vpop.xlane.xlu0 %703 }
 0x3e5   :  { %v708_v32 = vsub.f32 %v2988_v41, %v704_v22 }
 0x3e6   :  { %v2520_v19 = vpop.eup %2519 }
 0x3e7   :  { %v480_v20 = vmul.f32 %v2520_v19, %v2512_v38  ;;  %v710_v33 = vmul.f32 1.442695, %v708_v32  ;;  %v707_v34 = vpop.xlane.xlu1 %706 }
 0x3e8   :  { %v709_v35 = vsub.f32 %v2990_v43, %v707_v34 }
 0x3e9   :  { %v482_v21 = vpack.c.bf16 %v480_v20, %v480_v20 }
 0x3ea   :  { %v712_v38 = vmul.f32 1.442695, %v709_v35 }
 0x3eb   :  { %2188 = vmatmul.msk.bf16.vlgmr.msrb.gmra.mxu2 %vm418_vm1, %v482_v21 }
 0x3f4   :  { %v818_v23 = vpop.xlane.xlu0 %817 }
 0x3f5   :  { %v822_v25 = vsub.f32 %v814_v53, %v818_v23  ;;  %747 = vrot.lane.b32.xlu0 %v2997_v49, %s2725_s22 }
 0x3f7   :  { %v824_v26 = vmul.f32 1.442695, %v822_v25 }
 0x3f9   :  { %2521 = vpow2.f32 %v824_v26 }
 0x3fa   :  { %2523 = vpow2.f32 %v710_v33 }
 0x3fc   :  { %609 = vrot.lane.b32.xlu1 %v608_v2, %s2724_s11 }
 0x3ff   :  { %v3016_v28 = vpop.eup %2521 }
 0x400   :  { %v828_v31 = vsel %vm418_vm1, %v3016_v28, 0.0  ;;  %v2524_v39 = vpop.eup %2523 }
 0x401   :  { %829 = vadd.xlane.f32.xlu2 %v828_v31  ;;  %v714_v47 = vsel %vm418_vm1, %v2524_v39, 0.0 }
 0x415   :  { %v473_v37 = vpop.xlane.xlu2 %472 }
 0x416   :  { %2525 = vrcp.f32 %v473_v37 }
 0x417   :  { %2527 = vpow2.f32 %v712_v38 }
 0x41c   :  { %v2526_v40 = vpop.eup %2525 }
 0x41d   :  { %v479_v42 = vmul.f32 %v2526_v40, %v2514_v36  ;;  %v821_v45 = vpop.xlane.xlu2 %820  ;;  %v2528_v41 = vpop.eup %2527 }
 0x41e   :  { %v823_v46 = vsub.f32 %v815_v62, %v821_v45  ;;  %v717_v43 = vsel %vm418_vm1, %v2528_v41, 0.0 }
 0x41f   :  { %v481_v48 = vpack.c.bf16 %v479_v42, %v479_v42  ;;  %715 = vadd.xlane.f32.xlu0 %v714_v47 }
 0x420   :  { %v826_v50 = vmul.f32 1.442695, %v823_v46 }
 0x421   :  { %2187 = vmatmul.msk.bf16.vlgmr.msra.gmra.mxu1 %vm418_vm1, %v481_v48 }
 0x422   :  { %2529 = vpow2.f32 %v826_v50 }
 0x425   :  { %v727_v61 = vpop.permute.xlu2 %726 }
 0x427   :  { %718 = vadd.xlane.f32.xlu0 %v717_v43 }
 0x428   :  { %v2530_v52 = vpop.eup %2529 }
 0x429   :  { %v831_v53 = vsel %vm418_vm1, %v2530_v52, 0.0 }
 0x42a   :  { %832 = vadd.xlane.f32.xlu1 %v831_v53  ;;  %v2394_v53 = vld [vmem:[%s3379_s9 + $0x8] sm:$0xff] }
 0x42b   :  { %944 = vmatpush.bf16.msra.mxu3 %v2394_v53 }
 0x43b   :  { %861 = vrot.lane.b32.xlu0 %v2997_v49, %s2726_s23 }
 0x443   :  { %840 = vrot.lane.b32.xlu0 %v608_v2, %s2726_s23  ;;  %v732_v2 = vsel %vm486_vm0, %v727_v61, 0 }
 0x454   :  { %v596_v57 = vpop.xlane.xlu0 %595 }
 0x456   :  { %v599_v54 = vpop.xlane.xlu1 %598 }
 0x457   :  { %2531 = vrcp.f32 %v599_v54  ;;  %v2393_v54 = vld [vmem:[%s3379_s9] sm:$0xff] }
 0x458   :  { %2533 = vrcp.f32 %v596_v57  ;;  %945 = vmatpush.bf16.msra.mxu3 %v2393_v54 }
 0x45d   :  { %v2532_v55 = vpop.eup %2531 }
 0x45e   :  { %v603_v56 = vmul.f32 %v2532_v55, %v2518_v16  ;;  %v2534_v36 = vpop.eup %2533 }
 0x45f   :  { %v602_v62 = vmul.f32 %v2534_v36, %v3007_v14 }
 0x460   :  { %v605_v58 = vpack.c.bf16 %v603_v56, %v603_v56 }
 0x461   :  { %v604_v3 = vpack.c.bf16 %v602_v62, %v602_v62 }
 0x462   :  { %2192 = vmatmul.msk.bf16.vlgmr.msra.gmra.mxu2 %vm418_vm1, %v605_v58 }
 0x467   :  { %v748_v59 = vpop.permute.xlu0 %747 }
 0x468   :  { %v753_v60 = vsel %vm486_vm0, %v748_v59, 0 }
 0x469   :  { %762 = vmatpush.bf16.msrb.mxu2 %v753_v60 }
 0x46e   :  { %v3032_v49 = vpop.f32.mrf.mxu2  ;;  %v610_v63 = vpop.permute.xlu1 %609 }
 0x46f   :  { %v615_v0 = vsel %vm486_vm0, %v610_v63, 0 }
 0x470   :  { %624 = vmatpush.bf16.msrb.mxu1 %v615_v0 }
 0x473   :  { %2191 = vmatmul.msk.bf16.vlgmr.msrb.gmra.mxu1 %vm418_vm1, %v604_v3 }
 0x474   :  { %741 = vmatpush.bf16.msra.mxu1 %v732_v2  ;;  %v830_v19 = vpop.xlane.xlu2 %829 }
 0x476   :  { %v520_v4 = vpop.f32.mrf.mxu2 }
 0x492   :  { %v716_v5 = vpop.xlane.xlu0 %715 }
 0x493   :  { %2535 = vrcp.f32 %v716_v5 }
 0x499   :  { %v2536_v7 = vpop.eup %2535 }
 0x49a   :  { %v722_v6 = vmul.f32 %v2536_v7, %v2524_v39  ;;  %v719_v9 = vpop.xlane.xlu0 %718 }
 0x49b   :  { %2537 = vrcp.f32 %v719_v9 }
 0x49c   :  { %v724_v10 = vpack.c.bf16 %v722_v6, %v722_v6  ;;  %v2480_v6 = vld [vmem:[%s3380_s10] ss:$0 sm:$0xff] }
 0x49d   :  { %v833_v16 = vpop.xlane.xlu1 %832 }
 0x49e   :  { %v499_v13 = vpop.f32.mrf.mxu1  ;;  %2195 = vmatmul.msk.bf16.vlgmr.msra.gmra.mxu1 %vm418_vm1, %v724_v10  ;;  %2539 = vrcp.f32 %v833_v16 }
 0x49f   :  { %2541 = vrcp.f32 %v830_v19 }
 0x4a1   :  { %v2538_v14 = vpop.eup %2537 }
 0x4a2   :  { %v723_v15 = vmul.f32 %v2538_v14, %v2528_v41 }
 0x4a4   :  { %v725_v29 = vpack.c.bf16 %v723_v15, %v723_v15  ;;  %v2540_v20 = vpop.eup %2539 }
 0x4a5   :  { %v837_v23 = vmul.f32 %v2540_v20, %v2530_v52  ;;  %v2542_v25 = vpop.eup %2541 }
 0x4a6   :  { %v501_v17 = vpop.f32.mrf.mxu1  ;;  %2196 = vmatmul.msk.bf16.vlgmr.msrb.gmra.mxu2 %vm418_vm1, %v725_v29  ;;  %v836_v26 = vmul.f32 %v2542_v25, %v3016_v28 }
 0x4a7   :  { %v839_v31 = vpack.c.bf16 %v837_v23, %v837_v23 }
 0x4a8   :  { %v838_v34 = vpack.c.bf16 %v836_v26, %v836_v26 }
 0x4ad   :  { %v862_v21 = vpop.permute.xlu0 %861 }
 0x4ae   :  { %v867_v22 = vsel %vm486_vm0, %v862_v21, 0 }
 0x4af   :  { %876 = vmatpush.bf16.msra.mxu2 %v867_v22 }
 0x4b5   :  { %v841_v32 = vpop.permute.xlu0 %840 }
 0x4b6   :  { %v846_v33 = vsel %vm486_vm0, %v841_v32, 0  ;;  %2200 = vmatmul.msk.bf16.vlgmr.msra.gmra.mxu2 %vm418_vm1, %v839_v31  ;;  %v2396_v31 = vld [vmem:[%s3383_s13 + $0x8] sm:$0xff] }
 0x4b7   :  { %855 = vmatpush.bf16.msrb.mxu1 %v846_v33  ;;  %1040 = vmatpush.bf16.msra.mxu0 %v2396_v31 }
 0x4ba   :  { %2199 = vmatmul.msk.bf16.vlgmr.msrb.gmra.mxu1 %vm418_vm1, %v838_v34 }
 0x4e5   :  { %v650_v35 = vpop.f32.mrf.mxu2 }
 0x4ed   :  { %v652_v37 = vpop.f32.mrf.mxu2 }
 0x4ee   :  { %v2404_v37 = vld [vmem:[%s3385_s15 + $0x38] sm:$0xff] }
 0x4ef   :  { %1119 = vmatpush.bf16.msra.mxu1 %v2404_v37 }
 0x4f0   :  { %v626_v38 = vpop.f32.mrf.mxu1 }
 0x4f1   :  { %v2440_v39 = vpack.i.bf16 %v650_v35, %v626_v38  ;;  %v2395_v35 = vld [vmem:[%s3383_s13] sm:$0xff] }
 0x4f2   :  { %1041 = vmatpush.bf16.msra.mxu0 %v2395_v35 }
 0x4f3   :  { %2441 = vrot.lane.b32.xlu0 %v2440_v39, %s2727_s24 }
 0x4f8   :  { %v628_v40 = vpop.f32.mrf.mxu1 }
 0x4f9   :  { %v2403_v40 = vld [vmem:[%s3385_s15 + $0x30] sm:$0xff] }
 0x4fa   :  { %1120 = vmatpush.bf16.msra.mxu1 %v2403_v40 }
 0x51b   :  { %v743_v42 = vpop.f32.mrf.mxu1 }
 0x523   :  { %v745_v28 = vpop.f32.mrf.mxu1 }
 0x529   :  { %v764_v45 = vpop.f32.mrf.mxu2 }
 0x52a   :  { %v2445_v46 = vpack.i.bf16 %v764_v45, %v743_v42 }
 0x52c   :  { %2446 = vrot.lane.b32.xlu0 %v2445_v46, %s2718_s3  ;;  %v2402_v46 = vld [vmem:[%s3385_s15 + $0x28] sm:$0xff] }
 0x52d   :  { %1121 = vmatpush.bf16.msra.mxu1 %v2402_v46  ;;  %v2410_v46 = vld [vmem:[%s3377_s7 + $0x58] sm:$0xff] }
 0x52e   :  { %1289 = vmatpush.bf16.msrb.mxu0 %v2410_v46 }
 0x531   :  { %v766_v47 = vpop.f32.mrf.mxu2 }
 0x537   :  { %v857_v48 = vpop.f32.mrf.mxu1 }
 0x539   :  { %v878_v50 = vpop.f32.mrf.mxu2 }
 0x53a   :  { %v2450_v41 = vpack.i.bf16 %v878_v50, %v857_v48  ;;  %v2401_v50 = vld [vmem:[%s3385_s15 + $0x20] sm:$0xff] }
 0x53b   :  { %1122 = vmatpush.bf16.msra.mxu1 %v2401_v50 }
 0x53c   :  { %2451 = vrot.lane.b32.xlu1 %v2450_v41, %s2728_s18 }
 0x53f   :  { %v859_v43 = vpop.f32.mrf.mxu1 }
 0x541   :  { %v880_v52 = vpop.f32.mrf.mxu2 }
 0x565   :  { %v2442_v55 = vpop.permute.xlu0 %2441 }
 0x566   :  { %v2444_v57 = vunpack.i.h.bf16 %v2442_v55  ;;  %v2443_v58 = vunpack.i.l.bf16 %v2442_v55 }
 0x568   :  { %v907_v61 = vsel %vm418_vm1, %v3032_v49, %v2444_v57  ;;  %v906_v62 = vsel %vm418_vm1, %v499_v13, %v2443_v58  ;;  %v2481_v58 = vld [vmem:[#allocation8] ss:$0 sm:$0xff] }
 0x59e   :  { %v2447_v56 = vpop.permute.xlu0 %2446 }
 0x59f   :  { %v2449_v59 = vunpack.i.h.bf16 %v2447_v56  ;;  %v2448_v60 = vunpack.i.l.bf16 %v2447_v56 }
 0x5a1   :  { %v909_v2 = vsel %vm908_vm2, %v906_v62, %v2448_v60  ;;  %v910_v3 = vsel %vm908_vm2, %v907_v61, %v2449_v59  ;;  %v2482_v61 = vld [vmem:[%s3382_s12] ss:$0 sm:$0xff] }
 0x5ae   :  { %v2452_v36 = vpop.permute.xlu1 %2451 }
 0x5af   :  { %v2454_v63 = vunpack.i.h.bf16 %v2452_v36  ;;  %v2453_v0 = vunpack.i.l.bf16 %v2452_v36 }
 0x5b1   :  { %v912_v4 = vsel %vm911_vm3, %v909_v2, %v2453_v0  ;;  %v913_v5 = vsel %vm911_vm3, %v910_v3, %v2454_v63 }
 0x5b2   :  { %v914_v7 = vpack.c.bf16 %v913_v5, %v912_v4  ;;  %v2400_v5 = vld [vmem:[%s3385_s15 + $0x18] sm:$0xff] }
 0x5b3   :  { %1123 = vmatpush.bf16.msra.mxu1 %v2400_v5 }
 0x5b4   :  { %2209 = vmatmul.msk.bf16.vlgmr.msra.gmra.mxu3 %vm248_vm8, %v914_v7  ;;  %v2399_v7 = vld [vmem:[%s3385_s15 + $0x10] sm:$0xff] }
 0x5b7   :  { %1124 = vmatpush.bf16.msra.mxu1 %v2399_v7 }
 0x637   :  { %v947_v49 = vpop.f32.mrf.mxu3 }
 0x638   :  { %v948_v9 = vadd.f32 %v2480_v6, %v947_v49  ;;  %v2397_v49 = vld [vmem:[%s3385_s15] sm:$0xff] }
 0x63a   :  { %v3065_v10 = vadd.f32 %v948_v9, %v2899_v12 }
 0x63c   :  { %v956_v13 = vsel %vm248_vm8, %v3065_v10, 0.0 }
 0x63d   :  { %957 = vadd.xlane.f32.xlu2 %v956_v13  ;;  %v2483_v13 = vld [vmem:[%s3384_s14] ss:$0 sm:$0xff] }
 0x63f   :  { %v949_v14 = vpop.f32.mrf.mxu3 }
 0x640   :  { %v950_v15 = vadd.f32 %v2480_v6, %v949_v14  ;;  %v2398_v6 = vld [vmem:[%s3385_s15 + $0x8] sm:$0xff] }
 0x641   :  { %1125 = vmatpush.bf16.msra.mxu1 %v2398_v6 }
 0x642   :  { %v3070_v29 = vadd.f32 %v950_v15, %v2903_v18 }
 0x644   :  { %v959_v16 = vsel %vm248_vm8, %v3070_v29, 0.0 }
 0x645   :  { %960 = vadd.xlane.f32.xlu0 %v959_v16  ;;  %1126 = vmatpush.bf16.msra.mxu1 %v2397_v49  ;;  %v2486_v49 = vld [vmem:[#allocation6 + $0x1] ss:$0 sm:$0xff] }
 0x6b0   :  { %v958_v17 = vpop.xlane.xlu2 %957 }
 0x6b1   :  { %v962_v19 = vmul.f32 %v958_v17, %v2907_v27 }
 0x6b3   :  { %v964_v20 = vsub.f32 %v3065_v10, %v962_v19 }
 0x6b5   :  { %v966_v12 = vmul.f32 %v964_v20, %v964_v20 }
 0x6b7   :  { %v968_v21 = vsel %vm248_vm8, %v966_v12, 0.0  ;;  %v2484_v12 = vld [vmem:[%s3386_s16] ss:$0 sm:$0xff] }
 0x6b8   :  { %v961_v22 = vpop.xlane.xlu0 %960  ;;  %969 = vadd.xlane.f32.xlu2 %v968_v21 }
 0x6b9   :  { %v963_v23 = vmul.f32 %v961_v22, %v2907_v27 }
 0x6bb   :  { %v965_v25 = vsub.f32 %v3070_v29, %v963_v23 }
 0x6bd   :  { %v967_v18 = vmul.f32 %v965_v25, %v965_v25 }
 0x6bf   :  { %v971_v26 = vsel %vm248_vm8, %v967_v18, 0.0 }
 0x6c0   :  { %972 = vadd.xlane.f32.xlu2 %v971_v26 }
 0x72b   :  { %v970_v32 = vpop.xlane.xlu2 %969 }
 0x72c   :  { %v974_v33 = vmul.f32 %v970_v32, %v2907_v27 }
 0x72e   :  { %v976_v34 = vadd.f32 1e-05, %v974_v33 }
 0x730   :  { %2543 = vrsqrt.f32 %v976_v34  ;;  %vm984_vm5 = vweird.f32 %v976_v34 }
 0x733   :  { %v973_v38 = vpop.xlane.xlu2 %972 }
 0x734   :  { %v975_v39 = vmul.f32 %v973_v38, %v2907_v27 }
 0x736   :  { %v2544_v42 = vpop.eup %2543  ;;  %v977_v28 = vadd.f32 1e-05, %v975_v39 }
 0x737   :  { %v979_v45 = vmul.f32 %v2544_v42, %v976_v34  ;;  %vm985_vm4 = vweird.f32 %v2544_v42 }
 0x738   :  { %2545 = vrsqrt.f32 %v977_v28  ;;  %vm986_vm6 = vmor %vm984_vm5, %vm985_vm4  ;;  %vm994_vm9 = vweird.f32 %v977_v28 }
 0x739   :  { %v980_v47 = vmul.f32 %v2544_v42, %v979_v45  ;;  %v2408_v45 = vld [vmem:[%s3377_s7 + $0x48] sm:$0xff] }
 0x73a   :  { %1256 = vmatpush.bf16.msrb.mxu3 %v2408_v45 }
 0x73b   :  { %v981_v48 = vmul.f32 0.5, %v980_v47 }
 0x73d   :  { %v982_v41 = vsub.f32 1.5, %v981_v48 }
 0x73e   :  { %v2546_v43 = vpop.eup %2545 }
 0x73f   :  { %v983_v52 = vmul.f32 %v2544_v42, %v982_v41  ;;  %v989_v53 = vmul.f32 %v2546_v43, %v977_v28  ;;  %vm995_vm7 = vweird.f32 %v2546_v43  ;;  %v2406_v28 = vld [vmem:[%s3377_s7 + $0x38] sm:$0xff]  ;;  %v2405_v41 = vld [vmem:[%s3377_s7 + $0x30] sm:$0xff] }
 0x740   :  { %vm996_vm10 = vmor %vm994_vm9, %vm995_vm7  ;;  %1223 = vmatpush.bf16.msrb.mxu2 %v2406_v28  ;;  %vm2111_vm7 = vweird.f32 %v2865_v8 }
 0x741   :  { %v990_v54 = vmul.f32 %v2546_v43, %v989_v53  ;;  %v987_v55 = vsel %vm986_vm6, %v2544_v42, %v983_v52  ;;  %v2409_v52 = vld [vmem:[%s3377_s7 + $0x50] sm:$0xff] }
 0x742   :  { %v998_v59 = vmul.f32 %v987_v55, %v964_v20  ;;  %1290 = vmatpush.bf16.msrb.mxu0 %v2409_v52 }
 0x743   :  { %v991_v56 = vmul.f32 0.5, %v990_v54 }
 0x744   :  { %v1003_v62 = vmul.f32 %v2481_v58, %v998_v59  ;;  %1224 = vmatpush.bf16.msrb.mxu2 %v2405_v41 }
 0x745   :  { %v992_v57 = vsub.f32 1.5, %v991_v56 }
 0x746   :  { %v1008_v2 = vadd.f32 %v2482_v61, %v1003_v62 }
 0x747   :  { %v993_v60 = vmul.f32 %v2546_v43, %v992_v57 }
 0x749   :  { %v997_v36 = vsel %vm996_vm10, %v2546_v43, %v993_v60  ;;  %v2407_v43 = vld [vmem:[%s3377_s7 + $0x40] sm:$0xff]  ;;  %vm2126_vm10 = vcmask 57344  }
 0x74a   :  { %v999_v63 = vmul.f32 %v997_v36, %v965_v25  ;;  %1257 = vmatpush.bf16.msrb.mxu3 %v2407_v43 }
 0x74c   :  { %v1004_v0 = vmul.f32 %v2481_v58, %v999_v63 }
 0x74e   :  { %v1009_v3 = vadd.f32 %v2482_v61, %v1004_v0 }
 0x750   :  { %v1010_v4 = vpack.c.bf16 %v1009_v3, %v1008_v2 }
 0x752   :  { %2218 = vmatmul.msk.bf16.vlgmr.msra.gmra.mxu0 %vm248_vm8, %v1010_v4  ;;  %v2485_v4 = vld [vmem:[#allocation3 + $0x1] ss:$0 sm:$0xff] }
 0x7cf   :  { %v1043_v9 = vpop.f32.mrf.mxu0 }
 0x7d0   :  { %v1044_v14 = vadd.f32 %v2483_v13, %v1043_v9 }
 0x7d2   :  { %v1048_v17 = vmax.f32 %v1044_v14, 0.0 }
 0x7d7   :  { %v1045_v15 = vpop.f32.mrf.mxu0 }
 0x7d8   :  { %v1046_v16 = vadd.f32 %v2483_v13, %v1045_v15 }
 0x7da   :  { %v1049_v19 = vmax.f32 %v1046_v16, 0.0 }
 0x7dc   :  { %v1050_v20 = vpack.c.bf16 %v1049_v19, %v1048_v17  ;;  %v2487_v19 = vld [vmem:[%s3378_s8 + $0x6] ss:$0 sm:$0xff] }
 0x7de   :  { %1127 = vmatmul.bf16.vlgmr.msra.gmra.mxu1 %v1050_v20 }
 0x85b   :  { %v1128_v21 = vpop.f32.mrf.mxu1 }
 0x85c   :  { %v1129_v22 = vadd.f32 %v2484_v12, %v1128_v21  ;;  %v2489_v21 = vld [vmem:[%s3378_s8 + $0x5] ss:$0 sm:$0xff] }
 0x85e   :  { %v3123_v23 = vadd.f32 %v1129_v22, %v3065_v10 }
 0x860   :  { %v1139_v25 = vsel %vm248_vm8, %v3123_v23, 0.0 }
 0x861   :  { %1140 = vadd.xlane.f32.xlu1 %v1139_v25 }
 0x863   :  { %v1130_v18 = vpop.f32.mrf.mxu1 }
 0x864   :  { %v1131_v26 = vadd.f32 %v2484_v12, %v1130_v18  ;;  %v2488_v18 = vld [vmem:[%s3378_s8 + $0x4] ss:$0 sm:$0xff] }
 0x866   :  { %v3128_v31 = vadd.f32 %v1131_v26, %v3070_v29 }
 0x868   :  { %v1142_v32 = vsel %vm248_vm8, %v3128_v31, 0.0 }
 0x869   :  { %1143 = vadd.xlane.f32.xlu2 %v1142_v32 }
 0x8d4   :  { %v1141_v33 = vpop.xlane.xlu1 %1140 }
 0x8d5   :  { %v1145_v34 = vmul.f32 %v1141_v33, %v2907_v27 }
 0x8d7   :  { %v1147_v35 = vsub.f32 %v3123_v23, %v1145_v34 }
 0x8d9   :  { %v1149_v10 = vmul.f32 %v1147_v35, %v1147_v35 }
 0x8db   :  { %v1151_v37 = vsel %vm248_vm8, %v1149_v10, 0.0 }
 0x8dc   :  { %v1144_v38 = vpop.xlane.xlu2 %1143  ;;  %1152 = vadd.xlane.f32.xlu2 %v1151_v37 }
 0x8dd   :  { %v1146_v39 = vmul.f32 %v1144_v38, %v2907_v27 }
 0x8df   :  { %v1148_v40 = vsub.f32 %v3128_v31, %v1146_v39 }
 0x8e1   :  { %v1150_v29 = vmul.f32 %v1148_v40, %v1148_v40 }
 0x8e3   :  { %v1154_v42 = vsel %vm248_vm8, %v1150_v29, 0.0 }
 0x8e4   :  { %1155 = vadd.xlane.f32.xlu2 %v1154_v42 }
 0x94f   :  { %v1153_v47 = vpop.xlane.xlu2 %1152 }
 0x950   :  { %v1157_v48 = vmul.f32 %v1153_v47, %v2907_v27 }
 0x952   :  { %v1159_v50 = vadd.f32 1e-05, %v1157_v48 }
 0x954   :  { %2547 = vrsqrt.f32 %v1159_v50  ;;  %vm1167_vm12 = vweird.f32 %v1159_v50 }
 0x957   :  { %v1156_v53 = vpop.xlane.xlu2 %1155 }
 0x958   :  { %v1158_v54 = vmul.f32 %v1156_v53, %v2907_v27 }
 0x95a   :  { %v2548_v55 = vpop.eup %2547  ;;  %v1160_v56 = vadd.f32 1e-05, %v1158_v54 }
 0x95b   :  { %v1162_v57 = vmul.f32 %v2548_v55, %v1159_v50  ;;  %vm1168_vm11 = vweird.f32 %v2548_v55 }
 0x95c   :  { %2549 = vrsqrt.f32 %v1160_v56  ;;  %vm1169_vm13 = vmor %vm1167_vm12, %vm1168_vm11  ;;  %vm1177_vm15 = vweird.f32 %v1160_v56  ;;  %vm2121_vm12 = vweird.f32 %v2871_v11 }
 0x95d   :  { %v1163_v58 = vmul.f32 %v2548_v55, %v1162_v57 }
 0x95f   :  { %v1164_v59 = vmul.f32 0.5, %v1163_v58 }
 0x961   :  { %v1165_v60 = vsub.f32 1.5, %v1164_v59 }
 0x962   :  { %v2550_v36 = vpop.eup %2549 }
 0x963   :  { %v1166_v61 = vmul.f32 %v2548_v55, %v1165_v60  ;;  %v1172_v62 = vmul.f32 %v2550_v36, %v1160_v56  ;;  %vm1178_vm14 = vweird.f32 %v2550_v36 }
 0x964   :  { %vm1179_vm4 = vmor %vm1177_vm15, %vm1178_vm14 }
 0x965   :  { %v1173_v63 = vmul.f32 %v2550_v36, %v1172_v62  ;;  %v1170_v0 = vsel %vm1169_vm13, %v2548_v55, %v1166_v61 }
 0x966   :  { %v1181_v5 = vmul.f32 %v1170_v0, %v1147_v35 }
 0x967   :  { %v1174_v2 = vmul.f32 0.5, %v1173_v63 }
 0x968   :  { %v1186_v9 = vmul.f32 %v2485_v4, %v1181_v5 }
 0x969   :  { %v1175_v3 = vsub.f32 1.5, %v1174_v2 }
 0x96a   :  { %v1191_v15 = vadd.f32 %v2486_v49, %v1186_v9 }
 0x96b   :  { %v1176_v7 = vmul.f32 %v2550_v36, %v1175_v3 }
 0x96d   :  { %v1180_v6 = vsel %vm1179_vm4, %v2550_v36, %v1176_v7 }
 0x96e   :  { %v1182_v13 = vmul.f32 %v1180_v6, %v1148_v40 }
 0x970   :  { %v1187_v14 = vmul.f32 %v2485_v4, %v1182_v13 }
 0x972   :  { %v1192_v16 = vadd.f32 %v2486_v49, %v1187_v14 }
 0x974   :  { %v1193_v17 = vpack.c.bf16 %v1192_v16, %v1191_v15 }
 0x976   :  { %2264 = vmatmul.msk.bf16.vlgmr.msrb.gmra.mxu2 %vm248_vm8, %v1193_v17  ;;  %2278 = vmatmul.msk.bf16.vlgmr.msrb.gmra.mxu3 %vm248_vm8, %v1193_v17 }
 0x977   :  { %2292 = vmatmul.msk.bf16.vlgmr.msrb.gmra.mxu0 %vm248_vm8, %v1193_v17 }
 0x9f4   :  { %v1292_v20 = vpop.f32.mrf.mxu0 }
 0x9f5   :  { %v1293_v12 = vadd.f32 %v2487_v19, %v1292_v20 }
 0x9f7   :  { %v3167_v22 = vpack.c.bf16 %v1293_v12, %v1293_v12 }
 0x9f9   :  { %v1371_v25 = vsel %vm486_vm0, %v3167_v22, 0  ;;  %v1226_v26 = vpop.f32.mrf.mxu2  ;;  %v1259_v32 = vpop.f32.mrf.mxu3 }
 0x9fa   :  { %v1260_v33 = vadd.f32 %v2489_v21, %v1259_v32  ;;  %1380 = vmatpush.bf16.msra.mxu0 %v1371_v25  ;;  %v1227_v10 = vadd.f32 %v2488_v18, %v1226_v26 }
 0x9fc   :  { %v1299_v34 = vpack.c.bf16 %v1260_v33, %v1260_v33  ;;  %v1294_v35 = vpop.f32.mrf.mxu0  ;;  %v1297_v42 = vpack.c.bf16 %v1227_v10, %v1227_v10 }
 0x9fd   :  { %v1295_v37 = vadd.f32 %v2487_v19, %v1294_v35 }
 0x9fe   :  { %v1307_v38 = vsel %vm418_vm1, %v1299_v34, 0  ;;  %v1411_v39 = vunpack.c.l.b16 %v1299_v34  ;;  %v1406_v43 = vunpack.c.l.b16 %v1297_v42 }
 0x9ff   :  { %v3175_v40 = vpack.c.bf16 %v1295_v37, %v1295_v37  ;;  %1316 = vmatpush.bf16.xpose.msra.mxu2 %v1307_v38 }
 0xa00   :  { %v1412_v29 = vpack.c.b16 %v1411_v39, %v1411_v39  ;;  %v1407_v57 = vpack.c.b16 %v1406_v43, %v1406_v43  ;;  %v1490_v43 = vunpack.c.l.b16 %v3167_v22 }
 0xa01   :  { %v1390_v28 = vsel %vm486_vm0, %v3175_v40, 0  ;;  %v1228_v45 = vpop.f32.mrf.mxu2  ;;  %v1261_v46 = vpop.f32.mrf.mxu3 }
 0xa02   :  { %v1229_v47 = vadd.f32 %v2488_v18, %v1228_v45  ;;  %v1262_v48 = vadd.f32 %v2489_v21, %v1261_v46  ;;  %1399 = vmatpush.bf16.msrb.mxu1 %v1390_v28  ;;  %1413 = vrot.lane.b32.xlu0 %v1412_v29, %s2724_s11 }
 0xa04   :  { %v1298_v50 = vpack.c.bf16 %v1229_v47, %v1229_v47  ;;  %v1300_v41 = vpack.c.bf16 %v1262_v48, %v1262_v48 }
 0xa06   :  { %v1435_v52 = vunpack.c.l.b16 %v1298_v50  ;;  %v1326_v53 = vsel %vm418_vm1, %v1300_v41, 0  ;;  %v1440_v54 = vunpack.c.l.b16 %v1300_v41  ;;  %2293 = vmatmul.msk.bf16.vlgmr.msra.gmra.mxu2 %vm418_vm1, %v1297_v42 }
 0xa07   :  { %1335 = vmatpush.bf16.xpose.msra.mxu3 %v1326_v53 }
 0xa08   :  { %v1436_v55 = vpack.c.b16 %v1435_v52, %v1435_v52  ;;  %v1441_v56 = vpack.c.b16 %v1440_v54, %v1440_v54  ;;  %v3214_v54 = vpack.c.b16 %v1490_v43, %v1490_v43 }
 0xa0a   :  { %1442 = vrot.lane.b32.xlu2 %v1441_v56, %s2724_s11  ;;  %1437 = vrot.lane.b32.xlu1 %v1436_v55, %s2724_s11 }
 0xa0b   :  { %1408 = vrot.lane.b32.xlu0 %v1407_v57, %s2724_s11 }
 0xa0e   :  { %2294 = vmatmul.msk.bf16.vlgmr.msra.gmra.mxu3 %vm418_vm1, %v1298_v50 }
 0xa12   :  { %1562 = vrot.lane.b32.xlu2 %v1441_v56, %s2725_s22  ;;  %1651 = vrot.lane.b32.xlu1 %v1407_v57, %s2726_s23 }
 0xa13   :  { %1539 = vrot.lane.b32.xlu0 %v1412_v29, %s2725_s22 }
 0xa1a   :  { %1560 = vrot.lane.b32.xlu2 %v1436_v55, %s2725_s22 }
 0xa1b   :  { %1537 = vrot.lane.b32.xlu0 %v1407_v57, %s2725_s22 }
 0xa22   :  { %1676 = vrot.lane.b32.xlu2 %v1441_v56, %s2726_s23 }
 0xa23   :  { %1653 = vrot.lane.b32.xlu0 %v1412_v29, %s2726_s23 }
 0xa2b   :  { %1674 = vrot.lane.b32.xlu0 %v1436_v55, %s2726_s23 }
 0xa64   :  { %v1443_v58 = vpop.permute.xlu2 %1442 }
 0xa65   :  { %v1448_v59 = vsel %vm418_vm1, %v1443_v58, 0 }
 0xa66   :  { %1457 = vmatpush.bf16.xpose.msrb.mxu3 %v1448_v59 }
 0xa6c   :  { %v1563_v60 = vpop.permute.xlu2 %1562 }
 0xa6d   :  { %v1568_v36 = vsel %vm418_vm1, %v1563_v60, 0 }
 0xa6e   :  { %1577 = vmatpush.bf16.xpose.msra.mxu3 %v1568_v36 }
 0xa74   :  { %v1414_v61 = vpop.permute.xlu0 %1413  ;;  %v1561_v62 = vpop.permute.xlu2 %1560 }
 0xa75   :  { %v1419_v63 = vsel %vm418_vm1, %v1414_v61, 0 }
 0xa76   :  { %1428 = vmatpush.bf16.xpose.msrb.mxu2 %v1419_v63 }
 0xa7c   :  { %v1677_v0 = vpop.permute.xlu2 %1676  ;;  %v1438_v2 = vpop.permute.xlu1 %1437 }
 0xa7d   :  { %v1682_v3 = vsel %vm418_vm1, %v1677_v0, 0  ;;  %v1409_v4 = vpop.permute.xlu0 %1408  ;;  %2298 = vmatmul.msk.bf16.vlgmr.msrb.gmra.mxu3 %vm418_vm1, %v1438_v2 }
 0xa7e   :  { %2297 = vmatmul.msk.bf16.vlgmr.msrb.gmra.mxu2 %vm418_vm1, %v1409_v4  ;;  %1691 = vmatpush.bf16.xpose.msrb.mxu3 %v1682_v3  ;;  %v1514_v3 = vunpack.c.l.b16 %v3175_v40 }
 0xa80   :  { %v1515_v4 = vpack.c.b16 %v1514_v3, %v1514_v3 }
 0xa84   :  { %v1652_v21 = vpop.permute.xlu1 %1651 }
 0xa85   :  { %v1540_v5 = vpop.permute.xlu0 %1539 }
 0xa86   :  { %v1545_v7 = vsel %vm418_vm1, %v1540_v5, 0 }
 0xa87   :  { %1554 = vmatpush.bf16.xpose.msra.mxu2 %v1545_v7 }
 0xa89   :  { %v1318_v6 = vpop.f32.mrf.mxu2 }
 0xa8a   :  { %v1341_v49 = vmul.f32 0.35355338, %v1318_v6 }
 0xa8c   :  { %v1343_v9 = vsel %vm418_vm1, %v1341_v49, -inf }
 0xa8d   :  { %v1538_v13 = vpop.permute.xlu0 %1537  ;;  %2302 = vmatmul.msk.bf16.vlgmr.msra.gmra.mxu3 %vm418_vm1, %v1561_v62  ;;  %1344 = vmax.xlane.f32.xlu2 %v1343_v9 }
 0xa8e   :  { %2301 = vmatmul.msk.bf16.vlgmr.msra.gmra.mxu2 %vm418_vm1, %v1538_v13 }
 0xa91   :  { %v1320_v14 = vpop.f32.mrf.mxu2  ;;  %v1337_v15 = vpop.f32.mrf.mxu3 }
 0xa92   :  { %v1342_v16 = vmul.f32 0.35355338, %v1337_v15 }
 0xa94   :  { %v1346_v17 = vsel %vm418_vm1, %v1342_v16, -inf }
 0xa95   :  { %v1654_v19 = vpop.permute.xlu0 %1653  ;;  %1347 = vmax.xlane.f32.xlu1 %v1346_v17 }
 0xa96   :  { %v1659_v20 = vsel %vm418_vm1, %v1654_v19, 0 }
 0xa97   :  { %1668 = vmatpush.bf16.xpose.msrb.mxu2 %v1659_v20 }
 0xa99   :  { %v1339_v12 = vpop.f32.mrf.mxu3 }
 0xa9d   :  { %v1675_v25 = vpop.permute.xlu0 %1674 }
 0xa9e   :  { %2305 = vmatmul.msk.bf16.vlgmr.msrb.gmra.mxu2 %vm418_vm1, %v1652_v21  ;;  %2306 = vmatmul.msk.bf16.vlgmr.msrb.gmra.mxu3 %vm418_vm1, %v1675_v25 }
 0xb00   :  { %v1459_v18 = vpop.f32.mrf.mxu3  ;;  %v1345_v26 = vpop.xlane.xlu2 %1344 }
 0xb01   :  { %v1464_v32 = vmul.f32 0.35355338, %v1459_v18  ;;  %v1349_v33 = vsub.f32 %v1341_v49, %v1345_v26  ;;  %v1430_v34 = vpop.f32.mrf.mxu2 }
 0xb02   :  { %v1463_v35 = vmul.f32 0.35355338, %v1430_v34 }
 0xb03   :  { %v1351_v10 = vmul.f32 1.442695, %v1349_v33  ;;  %v1468_v37 = vsel %vm418_vm1, %v1464_v32, -inf }
 0xb04   :  { %1469 = vmax.xlane.f32.xlu2 %v1468_v37  ;;  %v1465_v38 = vsel %vm418_vm1, %v1463_v35, -inf }
 0xb05   :  { %2551 = vpow2.f32 %v1351_v10  ;;  %1466 = vmax.xlane.f32.xlu0 %v1465_v38 }
 0xb08   :  { %v1461_v39 = vpop.f32.mrf.mxu3  ;;  %v1348_v36 = vpop.xlane.xlu1 %1347 }
 0xb09   :  { %v1432_v29 = vpop.f32.mrf.mxu2  ;;  %v1350_v22 = vsub.f32 %v1342_v16, %v1348_v36 }
 0xb0b   :  { %v2552_v42 = vpop.eup %2551  ;;  %v1353_v61 = vmul.f32 1.442695, %v1350_v22 }
 0xb0c   :  { %v1355_v28 = vsel %vm418_vm1, %v2552_v42, 0.0 }
 0xb0d   :  { %1356 = vadd.xlane.f32.xlu0 %v1355_v28  ;;  %2553 = vpow2.f32 %v1353_v61 }
 0xb10   :  { %v1579_v45 = vpop.f32.mrf.mxu3 }
 0xb11   :  { %v1556_v46 = vpop.f32.mrf.mxu2  ;;  %v1584_v47 = vmul.f32 0.35355338, %v1579_v45 }
 0xb12   :  { %v1583_v48 = vmul.f32 0.35355338, %v1556_v46 }
 0xb13   :  { %v1588_v50 = vsel %vm418_vm1, %v1584_v47, -inf  ;;  %v2554_v62 = vpop.eup %2553 }
 0xb14   :  { %v1585_v41 = vsel %vm418_vm1, %v1583_v48, -inf  ;;  %v1358_v63 = vsel %vm418_vm1, %v2554_v62, 0.0 }
 0xb15   :  { %1586 = vmax.xlane.f32.xlu1 %v1585_v41  ;;  %1589 = vmax.xlane.f32.xlu0 %v1588_v50 }
 0xb18   :  { %v1581_v52 = vpop.f32.mrf.mxu3 }
 0xb19   :  { %v1558_v53 = vpop.f32.mrf.mxu2 }
 0xb1c   :  { %1492 = vrot.lane.b32.xlu2 %v3214_v54, %s2724_s11 }
 0xb21   :  { %v1670_v55 = vpop.f32.mrf.mxu2  ;;  %v1693_v56 = vpop.f32.mrf.mxu3 }
 0xb22   :  { %v1698_v57 = vmul.f32 0.35355338, %v1693_v56  ;;  %v3222_v0 = vmul.f32 0.35355338, %v1670_v55 }
 0xb24   :  { %v1702_v58 = vsel %vm418_vm1, %v1698_v57, -inf  ;;  %v1699_v2 = vsel %vm418_vm1, %v3222_v0, -inf }
 0xb25   :  { %1703 = vmax.xlane.f32.xlu1 %v1702_v58 }
 0xb29   :  { %v1672_v59 = vpop.f32.mrf.mxu2  ;;  %v1695_v60 = vpop.f32.mrf.mxu3  ;;  %1609 = vrot.lane.b32.xlu0 %v3214_v54, %s2725_s22 }
 0xb45   :  { %1359 = vadd.xlane.f32.xlu2 %v1358_v63 }
 0xb4d   :  { %1700 = vmax.xlane.f32.xlu2 %v1699_v2 }
 0xb65   :  { %1630 = vrot.lane.b32.xlu2 %v1515_v4, %s2725_s22 }
 0xb77   :  { %v1470_v5 = vpop.xlane.xlu2 %1469 }
 0xb78   :  { %v1472_v7 = vsub.f32 %v1464_v32, %v1470_v5  ;;  %v1467_v6 = vpop.xlane.xlu0 %1466 }
 0xb79   :  { %v1471_v49 = vsub.f32 %v1463_v35, %v1467_v6 }
 0xb7a   :  { %v1475_v9 = vmul.f32 1.442695, %v1472_v7 }
 0xb7b   :  { %v1473_v13 = vmul.f32 1.442695, %v1471_v49 }
 0xb7c   :  { %2555 = vpow2.f32 %v1475_v9 }
 0xb7d   :  { %2557 = vpow2.f32 %v1473_v13 }
 0xb7f   :  { %v1493_v14 = vpop.permute.xlu2 %1492 }
 0xb80   :  { %v1498_v15 = vsel %vm486_vm0, %v1493_v14, 0  ;;  %v1357_v16 = vpop.xlane.xlu0 %1356 }
 0xb81   :  { %2559 = vrcp.f32 %v1357_v16  ;;  %1507 = vmatpush.bf16.msrb.mxu0 %v1498_v15 }
 0xb82   :  { %v3229_v17 = vpop.eup %2555 }
 0xb83   :  { %v2558_v40 = vpop.eup %2557  ;;  %v1480_v19 = vsel %vm418_vm1, %v3229_v17, 0.0 }
 0xb84   :  { %1481 = vadd.xlane.f32.xlu0 %v1480_v19  ;;  %v1477_v20 = vsel %vm418_vm1, %v2558_v40, 0.0 }
 0xb85   :  { %1478 = vadd.xlane.f32.xlu1 %v1477_v20 }
 0xb87   :  { %v2560_v12 = vpop.eup %2559 }
 0xb88   :  { %v1363_v21 = vmul.f32 %v2560_v12, %v2552_v42  ;;  %v1587_v25 = vpop.xlane.xlu1 %1586  ;;  %v1590_v18 = vpop.xlane.xlu0 %1589 }
 0xb89   :  { %v1591_v26 = vsub.f32 %v1583_v48, %v1587_v25  ;;  %v1592_v34 = vsub.f32 %v1584_v47, %v1590_v18 }
 0xb8a   :  { %v1365_v32 = vpack.c.bf16 %v1363_v21, %v1363_v21 }
 0xb8b   :  { %v1593_v33 = vmul.f32 1.442695, %v1591_v26  ;;  %v1595_v35 = vmul.f32 1.442695, %v1592_v34 }
 0xb8c   :  { %2295 = vmatmul.msk.bf16.vlgmr.msra.gmra.mxu0 %vm418_vm1, %v1365_v32 }
 0xb8d   :  { %2561 = vpow2.f32 %v1593_v33 }
 0xb8e   :  { %2563 = vpow2.f32 %v1595_v35 }
 0xb93   :  { %v2562_v10 = vpop.eup %2561 }
 0xb94   :  { %v1597_v37 = vsel %vm418_vm1, %v2562_v10, 0.0  ;;  %v2564_v39 = vpop.eup %2563 }
 0xb95   :  { %1598 = vadd.xlane.f32.xlu0 %v1597_v37  ;;  %v1600_v46 = vsel %vm418_vm1, %v2564_v39, 0.0 }
 0xb98   :  { %v1704_v38 = vpop.xlane.xlu1 %1703 }
 0xb99   :  { %v1706_v29 = vsub.f32 %v1698_v57, %v1704_v38 }
 0xb9b   :  { %v1709_v28 = vmul.f32 1.442695, %v1706_v29  ;;  %v1610_v42 = vpop.permute.xlu0 %1609 }
 0xb9c   :  { %v1615_v45 = vsel %vm486_vm0, %v1610_v42, 0 }
 0xb9d   :  { %2565 = vpow2.f32 %v1709_v28  ;;  %1601 = vadd.xlane.f32.xlu0 %v1600_v46  ;;  %1624 = vmatpush.bf16.msra.mxu0 %v1615_v45 }
 0xb9e   :  { %1516 = vrot.lane.b32.xlu1 %v1515_v4, %s2724_s11 }
 0xba3   :  { %v2566_v47 = vpop.eup %2565 }
 0xba4   :  { %v1714_v48 = vsel %vm418_vm1, %v2566_v47, 0.0 }
 0xba5   :  { %1715 = vadd.xlane.f32.xlu2 %v1714_v48 }
 0xbb1   :  { %1723 = vrot.lane.b32.xlu0 %v3214_v54, %s2726_s23 }
 0xbb8   :  { %v1360_v50 = vpop.xlane.xlu2 %1359 }
 0xbb9   :  { %2567 = vrcp.f32 %v1360_v50  ;;  %1744 = vrot.lane.b32.xlu0 %v1515_v4, %s2726_s23 }
 0xbbf   :  { %v2568_v41 = vpop.eup %2567 }
 0xbc0   :  { %v1364_v43 = vmul.f32 %v2568_v41, %v2554_v62  ;;  %v1701_v52 = vpop.xlane.xlu2 %1700 }
 0xbc1   :  { %v1705_v53 = vsub.f32 %v3222_v0, %v1701_v52 }
 0xbc2   :  { %v1366_v55 = vpack.c.bf16 %v1364_v43, %v1364_v43 }
 0xbc3   :  { %v1707_v56 = vmul.f32 1.442695, %v1705_v53 }
 0xbc4   :  { %2296 = vmatmul.msk.bf16.vlgmr.msrb.gmra.mxu1 %vm418_vm1, %v1366_v55 }
 0xbc5   :  { %2569 = vpow2.f32 %v1707_v56  ;;  %v2412_v56 = vld [vmem:[%s3379_s9 + $0x18] sm:$0xff] }
 0xbc6   :  { %1827 = vmatpush.bf16.msra.mxu2 %v2412_v56 }
 0xbc8   :  { %v1631_v2 = vpop.permute.xlu2 %1630 }
 0xbc9   :  { %v1636_v49 = vsel %vm486_vm0, %v1631_v2, 0 }
 0xbcb   :  { %v2570_v57 = vpop.eup %2569 }
 0xbcc   :  { %v1711_v58 = vsel %vm418_vm1, %v2570_v57, 0.0 }
 0xbcd   :  { %1712 = vadd.xlane.f32.xlu1 %v1711_v58 }
 0xbf7   :  { %v1482_v60 = vpop.xlane.xlu0 %1481 }
 0xbf8   :  { %v1479_v59 = vpop.xlane.xlu1 %1478 }
 0xbf9   :  { %2571 = vrcp.f32 %v1479_v59 }
 0xbfa   :  { %2573 = vrcp.f32 %v1482_v60 }
 0xbff   :  { %v2572_v54 = vpop.eup %2571 }
 0xc00   :  { %v1485_v36 = vmul.f32 %v2572_v54, %v2558_v40  ;;  %v2574_v63 = vpop.eup %2573 }
 0xc01   :  { %v1486_v3 = vmul.f32 %v2574_v63, %v3229_v17 }
 0xc02   :  { %v1487_v22 = vpack.c.bf16 %v1485_v36, %v1485_v36 }
 0xc03   :  { %v1488_v13 = vpack.c.bf16 %v1486_v3, %v1486_v3 }
 0xc04   :  { %2299 = vmatmul.msk.bf16.vlgmr.msrb.gmra.mxu0 %vm418_vm1, %v1487_v22 }
 0xc08   :  { %v1599_v61 = vpop.xlane.xlu0 %1598 }
 0xc09   :  { %2575 = vrcp.f32 %v1599_v61  ;;  %v3247_v62 = vpop.f32.mrf.mxu0 }
 0xc0f   :  { %v2576_v0 = vpop.eup %2575 }
 0xc10   :  { %v1605_v4 = vmul.f32 %v2576_v0, %v2562_v10  ;;  %v1517_v5 = vpop.permute.xlu1 %1516  ;;  %v1602_v14 = vpop.xlane.xlu0 %1601 }
 0xc11   :  { %v1522_v7 = vsel %vm486_vm0, %v1517_v5, 0  ;;  %v1384_v6 = vpop.f32.mrf.mxu0  ;;  %2577 = vrcp.f32 %v1602_v14 }
 0xc12   :  { %v1607_v9 = vpack.c.bf16 %v1605_v4, %v1605_v4  ;;  %1531 = vmatpush.bf16.msra.mxu1 %v1522_v7 }
 0xc14   :  { %2303 = vmatmul.msk.bf16.vlgmr.msra.gmra.mxu0 %vm418_vm1, %v1607_v9  ;;  %v2490_v9 = vld [vmem:[%s3380_s10 + $0x1] ss:$0 sm:$0xff] }
 0xc15   :  { %2300 = vmatmul.msk.bf16.vlgmr.msra.gmra.mxu1 %vm418_vm1, %v1488_v13 }
 0xc16   :  { %1645 = vmatpush.bf16.msrb.mxu1 %v1636_v49 }
 0xc17   :  { %v2578_v15 = vpop.eup %2577 }
 0xc18   :  { %v1606_v16 = vmul.f32 %v2578_v15, %v2564_v39  ;;  %v1716_v40 = vpop.xlane.xlu2 %1715 }
 0xc19   :  { %2579 = vrcp.f32 %v1716_v40 }
 0xc1a   :  { %v1608_v17 = vpack.c.bf16 %v1606_v16, %v1606_v16 }
 0xc1f   :  { %v2580_v21 = vpop.eup %2579 }
 0xc20   :  { %v1720_v18 = vmul.f32 %v2580_v21, %v2566_v47 }
 0xc22   :  { %v1722_v26 = vpack.c.bf16 %v1720_v18, %v1720_v18 }
 0xc23   :  { %v1724_v19 = vpop.permute.xlu0 %1723 }
 0xc24   :  { %v1729_v20 = vsel %vm486_vm0, %v1724_v19, 0 }
 0xc25   :  { %2304 = vmatmul.msk.bf16.vlgmr.msrb.gmra.mxu1 %vm418_vm1, %v1608_v17  ;;  %1738 = vmatpush.bf16.msrb.mxu0 %v1729_v20 }
 0xc2b   :  { %v1745_v12 = vpop.permute.xlu0 %1744 }
 0xc2c   :  { %v1750_v25 = vsel %vm486_vm0, %v1745_v12, 0 }
 0xc2d   :  { %1759 = vmatpush.bf16.msra.mxu1 %v1750_v25 }
 0xc35   :  { %2308 = vmatmul.msk.bf16.vlgmr.msra.gmra.mxu1 %vm418_vm1, %v1722_v26 }
 0xc40   :  { %v1713_v32 = vpop.xlane.xlu1 %1712 }
 0xc41   :  { %2581 = vrcp.f32 %v1713_v32  ;;  %v1401_v33 = vpop.f32.mrf.mxu1 }
 0xc47   :  { %v2582_v34 = vpop.eup %2581 }
 0xc48   :  { %v1719_v35 = vmul.f32 %v2582_v34, %v2570_v57  ;;  %v2411_v57 = vld [vmem:[%s3379_s9 + $0x10] sm:$0xff]  ;;  %v2414_v34 = vld [vmem:[%s3383_s13 + $0x18] sm:$0xff] }
 0xc49   :  { %v1403_v10 = vpop.f32.mrf.mxu1  ;;  %1828 = vmatpush.bf16.msra.mxu2 %v2411_v57  ;;  %1927 = vmatpush.bf16.msra.mxu3 %v2414_v34 }
 0xc4a   :  { %v1721_v37 = vpack.c.bf16 %v1719_v35, %v1719_v35 }
 0xc4c   :  { %2307 = vmatmul.msk.bf16.vlgmr.msrb.gmra.mxu0 %vm418_vm1, %v1721_v37 }
 0xc81   :  { %v1509_v38 = vpop.f32.mrf.mxu0 }
 0xc89   :  { %v1511_v39 = vpop.f32.mrf.mxu0 }
 0xc8a   :  { %v2422_v39 = vld [vmem:[%s3385_s15 + $0x78] sm:$0xff] }
 0xc8b   :  { %2008 = vmatpush.bf16.msra.mxu0 %v2422_v39 }
 0xc91   :  { %v1626_v29 = vpop.f32.mrf.mxu0 }
 0xc92   :  { %v1533_v28 = vpop.f32.mrf.mxu1 }
 0xc93   :  { %v2455_v42 = vpack.i.bf16 %v1533_v28, %v1509_v38  ;;  %v2413_v38 = vld [vmem:[%s3383_s13 + $0x10] sm:$0xff]  ;;  %s2730_s13 = smov [#allocation11]  }
 0xc94   :  { %1928 = vmatpush.bf16.msra.mxu3 %v2413_v38  ;;  %s2133_s20 = sshll.u32 %s2730_s13, 4  ;;  %s2134_s20 = int_to_ptr.vmem [resolvable:$true] %s2133_s20 }
 0xc95   :  { %2456 = vrot.lane.b32.xlu0 %v2455_v42, %s2727_s24  ;;  %v2421_v42 = vld [vmem:[%s3385_s15 + $0x70] sm:$0xff] }
 0xc96   :  { %2009 = vmatpush.bf16.msra.mxu0 %v2421_v42 }
 0xc99   :  { %v1628_v45 = vpop.f32.mrf.mxu0 }
 0xc9a   :  { %v1535_v46 = vpop.f32.mrf.mxu1 }
 0xca2   :  { %v1647_v47 = vpop.f32.mrf.mxu1 }
 0xca3   :  { %v2460_v48 = vpack.i.bf16 %v1647_v47, %v1626_v29 }
 0xca5   :  { %2461 = vrot.lane.b32.xlu0 %v2460_v48, %s2718_s3  ;;  %v2420_v48 = vld [vmem:[%s3385_s15 + $0x68] sm:$0xff] }
 0xca6   :  { %2010 = vmatpush.bf16.msra.mxu0 %v2420_v48 }
 0xcaa   :  { %v1649_v50 = vpop.f32.mrf.mxu1 }
 0xcb2   :  { %v1761_v41 = vpop.f32.mrf.mxu1 }
 0xcba   :  { %v1763_v43 = vpop.f32.mrf.mxu1 }
 0xcc9   :  { %v1740_v52 = vpop.f32.mrf.mxu0 }
 0xcca   :  { %v2465_v53 = vpack.i.bf16 %v1761_v41, %v1740_v52 }
 0xccc   :  { %2466 = vrot.lane.b32.xlu1 %v2465_v53, %s2728_s18 }
 0xcd1   :  { %v1742_v55 = vpop.f32.mrf.mxu0 }
 0xd07   :  { %v2457_v58 = vpop.permute.xlu0 %2456 }
 0xd08   :  { %v2459_v54 = vunpack.i.h.bf16 %v2457_v58  ;;  %v2458_v60 = vunpack.i.l.bf16 %v2457_v58 }
 0xd0a   :  { %v1790_v63 = vsel %vm418_vm1, %v1401_v33, %v2459_v54  ;;  %v1789_v0 = vsel %vm418_vm1, %v3247_v62, %v2458_v60  ;;  %v2491_v54 = vld [vmem:[#allocation8 + $0x1] ss:$0 sm:$0xff] }
 0xd17   :  { %v2462_v59 = vpop.permute.xlu0 %2461 }
 0xd18   :  { %v2464_v36 = vunpack.i.h.bf16 %v2462_v59  ;;  %v2463_v22 = vunpack.i.l.bf16 %v2462_v59 }
 0xd1a   :  { %v1792_v4 = vsel %vm908_vm2, %v1790_v63, %v2464_v36  ;;  %v1791_v5 = vsel %vm908_vm2, %v1789_v0, %v2463_v22 }
 0xd3e   :  { %v2467_v61 = vpop.permute.xlu1 %2466 }
 0xd3f   :  { %v2469_v2 = vunpack.i.h.bf16 %v2467_v61  ;;  %v2468_v3 = vunpack.i.l.bf16 %v2467_v61  ;;  %v2492_v61 = vld [vmem:[%s3382_s12 + $0x1] ss:$0 sm:$0xff] }
 0xd41   :  { %v1794_v7 = vsel %vm911_vm3, %v1792_v4, %v2469_v2  ;;  %v1793_v6 = vsel %vm911_vm3, %v1791_v5, %v2468_v3 }
 0xd42   :  { %v1795_v49 = vpack.c.bf16 %v1794_v7, %v1793_v6  ;;  %v2418_v7 = vld [vmem:[%s3385_s15 + $0x58] sm:$0xff]  ;;  %v2417_v6 = vld [vmem:[%s3385_s15 + $0x50] sm:$0xff] }
 0xd44   :  { %2322 = vmatmul.msk.bf16.vlgmr.msra.gmra.mxu2 %vm248_vm8, %v1795_v49  ;;  %v2416_v49 = vld [vmem:[%s3385_s15 + $0x48] sm:$0xff] }
 0xdc7   :  { %v1830_v13 = vpop.f32.mrf.mxu2 }
 0xdc8   :  { %v1831_v14 = vadd.f32 %v2490_v9, %v1830_v13 }
 0xdca   :  { %v3280_v62 = vadd.f32 %v1831_v14, %v3123_v23  ;;  %v2493_v14 = vld [vmem:[%s3384_s14 + $0x1] ss:$0 sm:$0xff] }
 0xdcc   :  { %v1841_v15 = vsel %vm248_vm8, %v3280_v62, 0.0 }
 0xdcd   :  { %1842 = vadd.xlane.f32.xlu2 %v1841_v15 }
 0xdcf   :  { %v1832_v16 = vpop.f32.mrf.mxu2 }
 0xdd0   :  { %v1833_v17 = vadd.f32 %v2490_v9, %v1832_v16  ;;  %v2415_v9 = vld [vmem:[%s3385_s15 + $0x40] sm:$0xff] }
 0xdd2   :  { %v3285_v40 = vadd.f32 %v1833_v17, %v3128_v31 }
 0xdd4   :  { %v1844_v19 = vsel %vm248_vm8, %v3285_v40, 0.0 }
 0xdd5   :  { %1845 = vadd.xlane.f32.xlu0 %v1844_v19 }
 0xe40   :  { %v1843_v20 = vpop.xlane.xlu2 %1842 }
 0xe41   :  { %v1847_v12 = vmul.f32 %v1843_v20, %v2907_v27 }
 0xe43   :  { %v1849_v21 = vsub.f32 %v3280_v62, %v1847_v12 }
 0xe45   :  { %v1851_v23 = vmul.f32 %v1849_v21, %v1849_v21 }
 0xe47   :  { %v1853_v25 = vsel %vm248_vm8, %v1851_v23, 0.0  ;;  %v2729_v23 = vmov 0  }
 0xe48   :  { %v1846_v18 = vpop.xlane.xlu0 %1845  ;;  %1854 = vadd.xlane.f32.xlu2 %v1853_v25  ;;  %2471 = vset.pattern.permute.xlu0 %v2729_v23  ;;  %v2494_v25 = vld [vmem:[%s3386_s16 + $0x1] ss:$0 sm:$0xff] }
 0xe49   :  { %v1848_v26 = vmul.f32 %v1846_v18, %v2907_v27  ;;  %2470 = vset.pattern.permute.xlu2 %v2729_v23 }
 0xe4b   :  { %v1850_v32 = vsub.f32 %v3285_v40, %v1848_v26 }
 0xe4d   :  { %v1852_v31 = vmul.f32 %v1850_v32, %v1850_v32 }
 0xe4f   :  { %v1856_v33 = vsel %vm248_vm8, %v1852_v31, 0.0 }
 0xe50   :  { %1857 = vadd.xlane.f32.xlu2 %v1856_v33 }
 0xebb   :  { %v1855_v35 = vpop.xlane.xlu2 %1854 }
 0xebc   :  { %v1859_v10 = vmul.f32 %v1855_v35, %v2907_v27 }
 0xebe   :  { %v1861_v37 = vadd.f32 1e-05, %v1859_v10 }
 0xec0   :  { %2583 = vrsqrt.f32 %v1861_v37  ;;  %vm1869_vm1 = vweird.f32 %v1861_v37 }
 0xec3   :  { %v1858_v29 = vpop.xlane.xlu2 %1857 }
 0xec4   :  { %v1860_v28 = vmul.f32 %v1858_v29, %v2907_v27  ;;  %v2419_v27 = vld [vmem:[%s3385_s15 + $0x60] sm:$0xff] }
 0xec5   :  { %2011 = vmatpush.bf16.msra.mxu0 %v2419_v27 }
 0xec6   :  { %v2584_v45 = vpop.eup %2583  ;;  %v1862_v46 = vadd.f32 1e-05, %v1860_v28 }
 0xec7   :  { %v1864_v47 = vmul.f32 %v2584_v45, %v1861_v37  ;;  %vm1870_vm0 = vweird.f32 %v2584_v45 }
 0xec8   :  { %2585 = vrsqrt.f32 %v1862_v46  ;;  %vm1871_vm2 = vmor %vm1869_vm1, %vm1870_vm0  ;;  %vm1879_vm5 = vweird.f32 %v1862_v46 }
 0xec9   :  { %v1865_v50 = vmul.f32 %v2584_v45, %v1864_v47  ;;  %2012 = vmatpush.bf16.msra.mxu0 %v2418_v7  ;;  %v2588_v7 = vld [vmem:[%s3396_s2 + $0x1] sm:$0x1] }
 0xeca   :  { %vm2120_vm11 = vweird.f32 %v2588_v7 }
 0xecb   :  { %v1866_v41 = vmul.f32 0.5, %v1865_v50  ;;  %vm2122_vm13 = vmor %vm2120_vm11, %vm2121_vm12 }
 0xecd   :  { %v1867_v43 = vsub.f32 1.5, %v1866_v41  ;;  %2013 = vmatpush.bf16.msra.mxu0 %v2417_v6 }
 0xece   :  { %v2586_v52 = vpop.eup %2585 }
 0xecf   :  { %v1868_v53 = vmul.f32 %v2584_v45, %v1867_v43  ;;  %v1874_v55 = vmul.f32 %v2586_v52, %v1862_v46  ;;  %vm1880_vm3 = vweird.f32 %v2586_v52 }
 0xed0   :  { %vm1881_vm6 = vmor %vm1879_vm5, %vm1880_vm3 }
 0xed1   :  { %v1875_v56 = vmul.f32 %v2586_v52, %v1874_v55  ;;  %v1872_v57 = vsel %vm1871_vm2, %v2584_v45, %v1868_v53  ;;  %2014 = vmatpush.bf16.msra.mxu0 %v2416_v49 }
 0xed2   :  { %v1883_v60 = vmul.f32 %v1872_v57, %v1849_v21  ;;  %v2496_v21 = vld [vmem:[#allocation2] ss:$0 sm:$0xff] }
 0xed3   :  { %v1876_v58 = vmul.f32 0.5, %v1875_v56  ;;  %2040 = vperm.xlu2 %2470, %v2496_v21  }
 0xed4   :  { %v1888_v63 = vmul.f32 %v2491_v54, %v1883_v60 }
 0xed5   :  { %v1877_v59 = vsub.f32 1.5, %v1876_v58  ;;  %2015 = vmatpush.bf16.msra.mxu0 %v2415_v9 }
 0xed6   :  { %v1893_v3 = vadd.f32 %v2492_v61, %v1888_v63 }
 0xed7   :  { %v1878_v36 = vmul.f32 %v2586_v52, %v1877_v59 }
 0xed9   :  { %v1882_v22 = vsel %vm1881_vm6, %v2586_v52, %v1878_v36 }
 0xeda   :  { %v1884_v0 = vmul.f32 %v1882_v22, %v1850_v32  ;;  %v2495_v32 = vld [vmem:[#allocation9] ss:$0 sm:$0xff]  ;;  %v2095_v22 = vand.u32 127, %v183_v1 }
 0xedc   :  { %v1889_v2 = vmul.f32 %v2491_v54, %v1884_v0 }
 0xede   :  { %v1894_v4 = vadd.f32 %v2492_v61, %v1889_v2  ;;  %v2587_v61 = vld [vmem:[%s3396_s2] sm:$0x1]  ;;  %s2135_s2 = sshll.u32 %s3389_s19, 4  ;;  %s2136_s2 = int_to_ptr.hbm [resolvable:$true] %s2135_s2 }
 0xedf   :  { %v127_v2 = vld [vmem:[%s3397_s25] sm:$0x1] }
 0xee0   :  { %v1895_v5 = vpack.c.bf16 %v1894_v4, %v1893_v3 }
 0xee2   :  { %2337 = vmatmul.msk.bf16.vlgmr.msra.gmra.mxu3 %vm248_vm8, %v1895_v5 }
 0xf2d   :  { %v2041_v29 = vpop.permute.xlu2 %2040 }
 0xf65   :  { %v1930_v13 = vpop.f32.mrf.mxu3 }
 0xf66   :  { %v1931_v15 = vadd.f32 %v2493_v14, %v1930_v13 }
 0xf68   :  { %v1935_v19 = vmax.f32 %v1931_v15, 0.0 }
 0xf6d   :  { %v1932_v16 = vpop.f32.mrf.mxu3 }
 0xf6e   :  { %v1933_v17 = vadd.f32 %v2493_v14, %v1932_v16 }
 0xf70   :  { %v1936_v20 = vmax.f32 %v1933_v17, 0.0 }
 0xf72   :  { %v1937_v12 = vpack.c.bf16 %v1936_v20, %v1935_v19 }
 0xf74   :  { %2016 = vmatmul.bf16.vlgmr.msra.gmra.mxu0 %v1937_v12 }
 0xff1   :  { %v2017_v18 = vpop.f32.mrf.mxu0 }
 0xff2   :  { %v2018_v26 = vadd.f32 %v2494_v25, %v2017_v18 }
 0xff4   :  { %v2022_v31 = vadd.f32 %v2018_v26, %v3280_v62 }
 0xff6   :  { %v2028_v33 = vmul.f32 %v2495_v32, %v2022_v31 }
 0xff8   :  { %v2030_v34 = vsel %vm248_vm8, %v2028_v33, 0.0 }
 0xff9   :  { %v2019_v35 = vpop.f32.mrf.mxu0  ;;  %2031 = vadd.xlane.f32.xlu1 %v2030_v34 }
 0xffa   :  { %v2020_v10 = vadd.f32 %v2494_v25, %v2019_v35 }
 0xffc   :  { %v2023_v37 = vadd.f32 %v2020_v10, %v3285_v40 }
 0xffe   :  { %v2029_v38 = vmul.f32 %v2495_v32, %v2023_v37 }
0x1000   :  { %v2033_v39 = vsel %vm248_vm8, %v2029_v38, 0.0  ;;  %vm2110_vm8 = vweird.f32 %v2587_v61 }
0x1001   :  { %2034 = vadd.xlane.f32.xlu0 %v2033_v39  ;;  %vm2112_vm9 = vmor %vm2110_vm8, %vm2111_vm7 }
0x1002   :  { %v2113_v4 = vsel %vm2112_vm9, %v2865_v8, %v2877_v24  ;;  %v2123_v24 = vsel %vm2122_vm13, %v2871_v11, %v2881_v30 }
0x106c   :  { %v2032_v28 = vpop.xlane.xlu1 %2031 }
0x106d   :  { %v2043_v42 = vadd.f32 %v2041_v29, %v2032_v28 }
0x106f   :  { %v2047_v45 = vperm.slane %v2043_v42, 0  ;;  %v2048_v46 = vperm.slane %v2043_v42, 1  ;;  %v2049_v47 = vperm.slane %v2043_v42, 2  ;;  %v2050_v48 = vperm.slane %v2043_v42, 3 }
0x1070   :  { %v2051_v62 = vperm.slane %v2043_v42, 4  ;;  %v2052_v50 = vperm.slane %v2043_v42, 5  ;;  %v2053_v41 = vperm.slane %v2043_v42, 6  ;;  %v2054_v27 = vperm.slane %v2043_v42, 7 }
0x1071   :  { %2063 = vst [vmem:[#allocation1] ss:$9 sm:$0xff] %v2047_v45 }
0x1072   :  { %2065 = vst [vmem:[#allocation1 + $0x1] ss:$9 sm:$0xff] %v2048_v46 }
0x1073   :  { %2067 = vst [vmem:[#allocation1 + $0x2] ss:$9 sm:$0xff] %v2049_v47 }
0x1074   :  { %2069 = vst [vmem:[#allocation1 + $0x3] ss:$9 sm:$0xff] %v2050_v48  ;;  %v2035_v40 = vpop.xlane.xlu0 %2034 }
0x1075   :  { %2071 = vst [vmem:[#allocation1 + $0x4] ss:$9 sm:$0xff] %v2051_v62  ;;  %v2044_v43 = vadd.f32 %v2041_v29, %v2035_v40 }
0x1076   :  { %2073 = vst [vmem:[#allocation1 + $0x5] ss:$9 sm:$0xff] %v2052_v50 }
0x1077   :  { %2075 = vst [vmem:[#allocation1 + $0x6] ss:$9 sm:$0xff] %v2053_v41  ;;  %v2055_v52 = vperm.slane %v2044_v43, 0  ;;  %v2056_v53 = vperm.slane %v2044_v43, 1  ;;  %v2057_v55 = vperm.slane %v2044_v43, 2  ;;  %v2058_v56 = vperm.slane %v2044_v43, 3 }
0x1078   :  { %2077 = vst [vmem:[#allocation1 + $0x7] ss:$9 sm:$0xff] %v2054_v27  ;;  %v2059_v58 = vperm.slane %v2044_v43, 4  ;;  %v2060_v59 = vperm.slane %v2044_v43, 5  ;;  %v2061_v54 = vperm.slane %v2044_v43, 6  ;;  %v2062_v60 = vperm.slane %v2044_v43, 7 }
0x107f   :  { %v2078_v57 = vld [vmem:[#allocation1] sm:$0xff] }
0x1080   :  { %2089 = vperm.xlu2 %2470, %v2078_v57   ;;  %2079 = vst [vmem:[#allocation1] ss:$9 sm:$0xff] %v2055_v52 }
0x1081   :  { %2080 = vst [vmem:[#allocation1 + $0x1] ss:$9 sm:$0xff] %v2056_v53 }
0x1082   :  { %2081 = vst [vmem:[#allocation1 + $0x2] ss:$9 sm:$0xff] %v2057_v55 }
0x1083   :  { %2082 = vst [vmem:[#allocation1 + $0x3] ss:$9 sm:$0xff] %v2058_v56 }
0x1084   :  { %2083 = vst [vmem:[#allocation1 + $0x4] ss:$9 sm:$0xff] %v2059_v58 }
0x1085   :  { %2084 = vst [vmem:[#allocation1 + $0x5] ss:$9 sm:$0xff] %v2060_v59 }
0x1086   :  { %2085 = vst [vmem:[#allocation1 + $0x6] ss:$9 sm:$0xff] %v2061_v54 }
0x1087   :  { %2086 = vst [vmem:[#allocation1 + $0x7] ss:$9 sm:$0xff] %v2062_v60 }
0x108e   :  { %v2087_v36 = vld [vmem:[#allocation1] sm:$0xff] }
0x108f   :  { %2092 = vperm.xlu0 %2471, %v2087_v36  }
0x10da   :  { %v2090_v63 = vpop.permute.xlu2 %2089 }
0x10db   :  { %v2096_v0 = vperm.slane %v2090_v63, %v2095_v22 }
0x10dd   :  { %v2100_v3 = vmul.f32 %v2096_v0, %v2884_v44  ;;  %v128_v44 = vld [vmem:[%s3397_s25 + $0x1] sm:$0x1] }
0x10df   :  { %v2102_v1 = vsub.f32 %v127_v2, %v2100_v3 }
0x10e1   :  { %v2124_v5 = vmul.f32 %v2113_v4, %v2102_v1 }
0x10e3   :  { %2127 = vst.msk [vmem:[#allocation11] sm:$0x1] %vm2126_vm10, %v2124_v5 }
0x1101   :  { %v2093_v6 = vpop.permute.xlu0 %2092 }
0x1102   :  { %v2097_v49 = vperm.slane %v2093_v6, %v2095_v22 }
0x1104   :  { %v2101_v8 = vmul.f32 %v2097_v49, %v2887_v51 }
0x1106   :  { %v2103_v9 = vsub.f32 %v128_v44, %v2101_v8 }
0x1108   :  { %v2125_v13 = vmul.f32 %v2123_v24, %v2103_v9 }
0x110a   :  { %2128 = vst.msk [vmem:[#allocation11 + $0x1] sm:$0x1] %vm2126_vm10, %v2125_v13 }
0x110b   :  { %2141 = dma.vmem_to_hbm [thread:$0]  %s2134_s20, 32, %s2136_s2, [#allocation5], %s2718_s3, %s2718_s3, %s2719_s26  }
0x110c   :  { %2715 = dma.done.wait [#allocation5], 32  }
0x110d   :  { %2716 = vsyncadd [#allocation5], 4294967264 }
0x110e   :  { %2146 = vsyncpa [#allocation4], 1 }
0x110f   :  { %2147 = vsyncpa [#allocation7], 1 }
0x1110   :  { %2148 = vsyncpa [#allocation10], 1 }
0x1111   :  { %2149 = vsyncpa [#allocation5], 1 }

</bundles_post_ra>
